<compile_context>
chip_gen: v5e
topology: v5e:2x2
jax: 0.10.0
libtpu: 0.0.40
codegen_flags: <defaults>
</compile_context>

<pallas_src>
import jax
import jax.numpy as jnp
from jax.experimental import pallas as pl
from jax.experimental.pallas import tpu as pltpu

# ----------------------------- problem sizes --------------------------------
N_OBJ = 8            # number of object proposals (single image)
N_REL = 16           # number of proposal pairs (relations)
C = 128              # feature_extractor.out_channels
H = W = 4            # per-ROI spatial size before AdaptiveAvgPool2d(1)
NUM_CLS = 32         # object classes (box predictor)
NUM_REL_CLS = 32     # predicate classes (relation predictor)
T_STEPS = 2          # cfg.MODEL.SG_HEAD.FEATURE_UPDATE_STEP

N_ALL = N_OBJ + N_REL        # 24 stacked obj+pred rows
R2 = 2 * N_REL               # 32 = [subject-role rows ; object-role rows]
HEAD_W = 3 * C               # 384 lane-dense fused predictor output width


# ------------------------- fused IMP kernel ----------------------------------
def imp_kernel(xo_roi_ref, xp_roi_ref, so_row_ref, so_col_ref,
               w_gate_ref, w_gru_ref, w_heads_ref, b_all_ref,
               x_obj_out_ref, x_pred_out_ref, heads_out_ref):
    f32, bf16 = jnp.float32, jnp.bfloat16

    # --- AdaptiveAvgPool2d(1): spatial mean over H*W, fused into this kernel --
    x_obj = jnp.mean(xo_roi_ref[...], axis=1)       # (N_OBJ, C) f32
    x_pred = jnp.mean(xp_roi_ref[...], axis=1)      # (N_REL, C) f32

    # --- _get_map_idxs: build [Ms|Mo] / [Ms^T;Mo^T] from pair ids in-kernel ---
    so_row = so_row_ref[...]                        # (1, 2*N_REL) int32
    so_col = so_col_ref[...]                        # (2*N_REL, 1) int32
    obj_iota = jax.lax.broadcasted_iota(jnp.int32, (N_OBJ, R2), 0)
    rel_iota = jax.lax.broadcasted_iota(jnp.int32, (R2, N_OBJ), 1)
    m = (obj_iota == so_row).astype(f32)            # [Ms | Mo]      (N_OBJ, 2*N_REL)
    mt_bf = (rel_iota == so_col).astype(bf16)       # [Ms^T ; Mo^T]  (2*N_REL, N_OBJ)

    # prepare_message mean(0): 1/in-degree (>=1) folded into M, hoisted out of loop
    deg_s = jnp.maximum(jnp.sum(m[:, :N_REL], axis=1, keepdims=True), 1.0)
    deg_o = jnp.maximum(jnp.sum(m[:, N_REL:], axis=1, keepdims=True), 1.0)
    inv_s = pl.reciprocal(deg_s, approx=True)
    inv_o = pl.reciprocal(deg_o, approx=True)
    col_iota = jax.lax.broadcasted_iota(jnp.int32, (N_OBJ, R2), 1)
    m_norm_bf = (m * jnp.where(col_iota < N_REL, inv_s, inv_o)).astype(bf16)

    # --- packed weights (bf16 MXU operands) and f32 biases ---
    w_gate = w_gate_ref[...]                        # (C, 4)   bf16
    w_gru = w_gru_ref[...]                          # (2C, 4C) bf16: [r|z|n_x|n_h]
    w_heads = w_heads_ref[...]                      # (C, 3C)  bf16: [cls|box|0|rel|0]
    b_gru = b_all_ref[0:1, :]                       # (1, 4C)  f32
    b_heads = b_all_ref[1:2, 0:HEAD_W]              # (1, 3C)  f32
    b_e2v = b_all_ref[2:3, 0:1]                     # (1, 1)   f32
    b_v2e = b_all_ref[2:3, 1:2]                     # (1, 1)   f32

    def gru(x, h):
        # torch.nn.GRUCell (gate order r,z,n), obj+pred rows batched,
        # x.Wih and h.Whh fused into a single (N_ALL,2C)x(2C,4C) matmul.
        xh = jnp.concatenate([x, h], axis=1).astype(bf16)            # (N_ALL, 2C)
        g = jnp.dot(xh, w_gru, preferred_element_type=f32) + b_gru   # (N_ALL, 4C)
        r = jax.nn.sigmoid(g[:, 0:C])
        z = jax.nn.sigmoid(g[:, C:2 * C])
        n = jnp.tanh(g[:, 2 * C:3 * C] + r * g[:, 3 * C:4 * C])
        return (1.0 - z) * n + z * h

    for _ in range(T_STEPS):
        h_cat = jnp.concatenate([x_obj, x_pred], axis=0)              # (N_ALL, C)
        # MessagePassingUnit_v1 gate projection: obj+pred rows in one matmul
        g4 = jnp.dot(jnp.maximum(h_cat, 0.0).astype(bf16), w_gate,
                     preferred_element_type=f32)                      # (N_ALL, 4)
        c_e2v = g4[N_OBJ:, 1:2]       # w_pair(e2v)  . relu(x_pred)   (N_REL, 1)
        c_v2e = g4[N_OBJ:, 2:3]       # w_unary(v2e) . relu(x_pred)

        # gather the obj-side gate terms to relations (subj & obj roles at once)
        ga = jnp.dot(mt_bf, g4[0:N_OBJ, :].astype(bf16),
                     preferred_element_type=f32)                      # (2*N_REL, 4)
        c_e2v2 = jnp.concatenate([c_e2v, c_e2v], axis=0)              # (2*N_REL, 1)
        c_v2e2 = jnp.concatenate([c_v2e, c_v2e], axis=0)
        gate_e2v = jax.nn.sigmoid(ga[:, 0:1] + c_e2v2 + b_e2v)        # [gate_s ; gate_o]
        gate_v2e = jax.nn.sigmoid(ga[:, 3:4] + c_v2e2 + b_v2e)        # [g_sub  ; g_obj ]

        # object update: mean of gated edge->vertex messages (subj + obj roles)
        xp2 = jnp.concatenate([x_pred, x_pred], axis=0)               # (2*N_REL, C)
        obj_msg = jnp.dot(m_norm_bf, (gate_e2v * xp2).astype(bf16),
                          preferred_element_type=f32)                 # (N_OBJ, C)

        # predicate update: gated vertex->edge messages (index_select == one-hot matmul)
        feas = jnp.dot(mt_bf, x_obj.astype(bf16),
                       preferred_element_type=f32)                    # [fea_sub ; fea_obj]
        gf = gate_v2e * feas
        pred_msg = gf[0:N_REL, :] + gf[N_REL:, :]                     # (N_REL, C)

        h_new = gru(jnp.concatenate([obj_msg, pred_msg], axis=0), h_cat)  # vert_rnn
        x_obj = h_new[0:N_OBJ, :]
        x_pred = h_new[N_OBJ:, :]

    x_obj_out_ref[...] = x_obj
    x_pred_out_ref[...] = x_pred
    # box.predictor + relation.predictor fused into one lane-dense matmul
    hf = jnp.concatenate([x_obj, x_pred], axis=0).astype(bf16)        # (N_ALL, C)
    heads_out_ref[...] = jnp.dot(hf, w_heads, preferred_element_type=f32) + b_heads


# ------------------------- host-side weight packing --------------------------
def _pack_params(params):
    (wg, bg, wih, whh, bih, bhh, wcls, bcls, wbox, bbox, wrel, brel) = params
    bf16 = jnp.bfloat16
    # Fused GRUCell weights: [x | h] (2C) -> [r | z | n_x | n_h] (4C) columns.
    zc = jnp.zeros((C, C), jnp.float32)
    top = jnp.concatenate([wih[:, :2 * C], wih[:, 2 * C:], zc], axis=1)   # x rows
    bot = jnp.concatenate([whh[:, :2 * C], zc, whh[:, 2 * C:]], axis=1)   # h rows
    w_gru = jnp.concatenate([top, bot], axis=0).astype(bf16)              # (2C, 4C)
    b_gru = jnp.concatenate(
        [bih[:, :2 * C] + bhh[:, :2 * C], bih[:, 2 * C:], bhh[:, 2 * C:]], axis=1)  # (1, 4C)

    # Fused predictors, lane-dense: [cls | box | pad->2C | rel | pad->3C].
    pad_obj = jnp.zeros((C, 2 * C - NUM_CLS - 4 * NUM_CLS), jnp.float32)
    pad_rel = jnp.zeros((C, C - NUM_REL_CLS), jnp.float32)
    w_heads = jnp.concatenate([wcls, wbox, pad_obj, wrel, pad_rel], axis=1).astype(bf16)
    b_heads = jnp.concatenate([bcls, bbox, pad_obj[:1], brel, pad_rel[:1]], axis=1)

    # All f32 biases in one slab: row0 = GRU, row1 = heads, row2 = gate scalars.
    b_all = jnp.zeros((3, 4 * C), jnp.float32)
    b_all = b_all.at[0:1, :].set(b_gru)
    b_all = b_all.at[1:2, :HEAD_W].set(b_heads)
    b_all = b_all.at[2, 0].set(bg[0, 0])   # b_e2v (edge->vertex gate bias)
    b_all = b_all.at[2, 1].set(bg[0, 2])   # b_v2e (vertex->edge gate bias)
    return wg.astype(bf16), w_gru, w_heads, b_all


# ------------------------------- wrapper --------------------------------------
def imp_forward(obj_feats_nchw, rel_feats_nchw, pair_idxs, params):
    # Glue: NCHW -> (N, H*W, C) channels-last so C sits on the 128-lane axis.
    xo_roi = jnp.transpose(obj_feats_nchw, (0, 2, 3, 1)).reshape(N_OBJ, H * W, C)
    xp_roi = jnp.transpose(rel_feats_nchw, (0, 2, 3, 1)).reshape(N_REL, H * W, C)

    # pair ids, both layouts (row / column vectors) so no in-kernel transpose.
    so = jnp.concatenate([pair_idxs[:, 0], pair_idxs[:, 1]], axis=0).astype(jnp.int32)
    so_row = so[None, :]     # (1, 2*N_REL)
    so_col = so[:, None]     # (2*N_REL, 1)

    w_gate, w_gru, w_heads, b_all = _pack_params(params)

    out_shape = (
        jax.ShapeDtypeStruct((N_OBJ, C), jnp.float32),          # x_obj (updated)
        jax.ShapeDtypeStruct((N_REL, C), jnp.float32),          # x_pred (updated)
        jax.ShapeDtypeStruct((N_ALL, HEAD_W), jnp.float32),     # fused predictor slab
    )
    vmem = lambda: pl.BlockSpec(memory_space=pltpu.MemorySpace.VMEM)
    inputs = (xo_roi, xp_roi, so_row, so_col, w_gate, w_gru, w_heads, b_all)

    # TODO(synk): loss_evaluator / post_processor (sampling, matching, NMS) are
    # not expressible as a TPU kernel; logits are returned instead of losses.
    x_obj, x_pred, heads = pl.pallas_call(
        imp_kernel,
        out_shape=out_shape,
        in_specs=[vmem() for _ in inputs],
        out_specs=tuple(vmem() for _ in out_shape),
    )(*inputs)

    cls_logits = heads[:N_OBJ, 0:NUM_CLS]
    box_regression = heads[:N_OBJ, NUM_CLS:NUM_CLS + 4 * NUM_CLS]
    rel_logits = heads[N_OBJ:, 2 * C:2 * C + NUM_REL_CLS]
    return x_obj, x_pred, cls_logits, box_regression, rel_logits


# -------------------------------- main ----------------------------------------
if __name__ == "__main__":
    key = jax.random.PRNGKey(0)
    keys = jax.random.split(key, 16)

    # synthetic per-ROI feature maps (stand-ins for the ROI feature extractors), NCHW
    obj_feats = jax.random.normal(keys[0], (N_OBJ, C, H, W), jnp.float32)
    rel_feats = jax.random.normal(keys[1], (N_REL, C, H, W), jnp.float32)
    # proposal_pairs 'idx_pairs' field: (subject_idx, object_idx) per relation
    pair_idxs = jax.random.randint(keys[2], (N_REL, 2), 0, N_OBJ)

    s = 0.05
    params = (
        (jax.random.normal(keys[3], (C, 4)) * s).astype(jnp.float32),            # gate Linear(2C,1) x2, split
        (jax.random.normal(keys[4], (1, 4)) * s).astype(jnp.float32),            # gate biases
        (jax.random.normal(keys[5], (C, 3 * C)) * s).astype(jnp.float32),        # GRU W_ih^T
        (jax.random.normal(keys[6], (C, 3 * C)) * s).astype(jnp.float32),        # GRU W_hh^T
        (jax.random.normal(keys[7], (1, 3 * C)) * s).astype(jnp.float32),        # GRU b_ih
        (jax.random.normal(keys[8], (1, 3 * C)) * s).astype(jnp.float32),        # GRU b_hh
        (jax.random.normal(keys[9], (C, NUM_CLS)) * s).astype(jnp.float32),      # cls_score^T
        (jax.random.normal(keys[10], (1, NUM_CLS)) * s).astype(jnp.float32),
        (jax.random.normal(keys[11], (C, NUM_CLS * 4)) * s).astype(jnp.float32), # bbox_pred^T
        (jax.random.normal(keys[12], (1, NUM_CLS * 4)) * s).astype(jnp.float32),
        (jax.random.normal(keys[13], (C, NUM_REL_CLS)) * s).astype(jnp.float32), # rel predictor^T
        (jax.random.normal(keys[14], (1, NUM_REL_CLS)) * s).astype(jnp.float32),
    )

    outs = imp_forward(obj_feats, rel_feats, pair_idxs, params)
    jax.block_until_ready(outs)
    print("KERNEL_OK")
</pallas_src>

<mosaic_0001>
module attributes {stable_mosaic.version = 11 : i64} {
  func.func @imp_kernel(%arg0: memref<8x16x128xf32, #tpu.memory_space<vmem>>, %arg1: memref<16x16x128xf32, #tpu.memory_space<vmem>>, %arg2: memref<1x32xi32, #tpu.memory_space<vmem>>, %arg3: memref<32x1xi32, #tpu.memory_space<vmem>>, %arg4: memref<128x4xbf16, #tpu.memory_space<vmem>>, %arg5: memref<256x512xbf16, #tpu.memory_space<vmem>>, %arg6: memref<128x384xbf16, #tpu.memory_space<vmem>>, %arg7: memref<3x512xf32, #tpu.memory_space<vmem>>, %arg8: memref<8x128xf32, #tpu.memory_space<vmem>>, %arg9: memref<16x128xf32, #tpu.memory_space<vmem>>, %arg10: memref<24x384xf32, #tpu.memory_space<vmem>>) attributes {dimension_semantics = [], scalar_prefetch = 0 : i64, scratch_operands = 0 : i64, tpu.core_type = #tpu.core_type<tc>} {
    %c0 = arith.constant 0 : index
    %c0_0 = arith.constant 0 : index
    %c0_1 = arith.constant 0 : index
    %0 = vector.load %arg0[%c0, %c0_0, %c0_1] : memref<8x16x128xf32, #tpu.memory_space<vmem>>, vector<8x16x128xf32>
    %cst = arith.constant dense<0.000000e+00> : vector<8x128xf32>
    %1 = vector.multi_reduction <add>, %0, %cst [1] : vector<8x16x128xf32> to vector<8x128xf32>
    %cst_2 = arith.constant 1.600000e+01 : f32
    %2 = vector.broadcast %cst_2 : f32 to vector<8x128xf32>
    %3 = arith.divf %1, %2 : vector<8x128xf32>
    %c0_3 = arith.constant 0 : index
    %c0_4 = arith.constant 0 : index
    %c0_5 = arith.constant 0 : index
    %4 = vector.load %arg1[%c0_3, %c0_4, %c0_5] : memref<16x16x128xf32, #tpu.memory_space<vmem>>, vector<16x16x128xf32>
    %cst_6 = arith.constant dense<0.000000e+00> : vector<16x128xf32>
    %5 = vector.multi_reduction <add>, %4, %cst_6 [1] : vector<16x16x128xf32> to vector<16x128xf32>
    %cst_7 = arith.constant 1.600000e+01 : f32
    %6 = vector.broadcast %cst_7 : f32 to vector<16x128xf32>
    %7 = arith.divf %5, %6 : vector<16x128xf32>
    %c0_8 = arith.constant 0 : index
    %c0_9 = arith.constant 0 : index
    %8 = vector.load %arg2[%c0_8, %c0_9] : memref<1x32xi32, #tpu.memory_space<vmem>>, vector<1x32xi32>
    %c0_10 = arith.constant 0 : index
    %c0_11 = arith.constant 0 : index
    %9 = vector.load %arg3[%c0_10, %c0_11] : memref<32x1xi32, #tpu.memory_space<vmem>>, vector<32x1xi32>
    %10 = tpu.iota {dimensions = array<i32: 0>} : vector<8x32xi32>
    %11 = tpu.iota {dimensions = array<i32: 1>} : vector<32x8xi32>
    %12 = vector.broadcast %8 : vector<1x32xi32> to vector<8x32xi32>
    %13 = arith.cmpi eq, %10, %12 : vector<8x32xi32>
    %14 = arith.extui %13 : vector<8x32xi1> to vector<8x32xi32>
    %15 = arith.sitofp %14 : vector<8x32xi32> to vector<8x32xf32>
    %16 = vector.broadcast %9 : vector<32x1xi32> to vector<32x8xi32>
    %17 = arith.cmpi eq, %11, %16 : vector<32x8xi32>
    %18 = arith.extui %17 : vector<32x8xi1> to vector<32x8xi32>
    %19 = arith.sitofp %18 : vector<32x8xi32> to vector<32x8xf32>
    %20 = arith.truncf %19 : vector<32x8xf32> to vector<32x8xbf16>
    %21 = vector.extract_strided_slice %15 {offsets = [0, 0], sizes = [8, 16], strides = [1, 1]} : vector<8x32xf32> to vector<8x16xf32>
    %cst_12 = arith.constant dense<0.000000e+00> : vector<8xf32>
    %22 = vector.multi_reduction <add>, %21, %cst_12 [1] : vector<8x16xf32> to vector<8xf32>
    %23 = vector.shape_cast %22 : vector<8xf32> to vector<8x1xf32>
    %cst_13 = arith.constant 1.000000e+00 : f32
    %24 = vector.broadcast %cst_13 : f32 to vector<8x1xf32>
    %25 = arith.maximumf %23, %24 : vector<8x1xf32>
    %26 = vector.extract_strided_slice %15 {offsets = [0, 16], sizes = [8, 16], strides = [1, 1]} : vector<8x32xf32> to vector<8x16xf32>
    %cst_14 = arith.constant dense<0.000000e+00> : vector<8xf32>
    %27 = vector.multi_reduction <add>, %26, %cst_14 [1] : vector<8x16xf32> to vector<8xf32>
    %28 = vector.shape_cast %27 : vector<8xf32> to vector<8x1xf32>
    %cst_15 = arith.constant 1.000000e+00 : f32
    %29 = vector.broadcast %cst_15 : f32 to vector<8x1xf32>
    %30 = arith.maximumf %28, %29 : vector<8x1xf32>
    %31 = tpu.reciprocal %25 {approx = true} : vector<8x1xf32> -> vector<8x1xf32>
    %32 = tpu.reciprocal %30 {approx = true} : vector<8x1xf32> -> vector<8x1xf32>
    %33 = tpu.iota {dimensions = array<i32: 1>} : vector<8x32xi32>
    %c16_i32 = arith.constant 16 : i32
    %34 = vector.broadcast %c16_i32 : i32 to vector<8x32xi32>
    %35 = arith.cmpi slt, %33, %34 : vector<8x32xi32>
    %36 = vector.shape_cast %31 : vector<8x1xf32> to vector<8x1xf32>
    %37 = vector.broadcast %36 : vector<8x1xf32> to vector<8x32xf32>
    %38 = vector.shape_cast %32 : vector<8x1xf32> to vector<8x1xf32>
    %39 = vector.broadcast %38 : vector<8x1xf32> to vector<8x32xf32>
    %40 = arith.select %35, %37, %39 : vector<8x32xi1>, vector<8x32xf32>
    %41 = arith.mulf %15, %40 : vector<8x32xf32>
    %42 = arith.truncf %41 : vector<8x32xf32> to vector<8x32xbf16>
    %c0_16 = arith.constant 0 : index
    %c0_17 = arith.constant 0 : index
    %43 = vector.load %arg4[%c0_16, %c0_17] : memref<128x4xbf16, #tpu.memory_space<vmem>>, vector<128x4xbf16>
    %c0_18 = arith.constant 0 : index
    %c0_19 = arith.constant 0 : index
    %44 = vector.load %arg5[%c0_18, %c0_19] : memref<256x512xbf16, #tpu.memory_space<vmem>>, vector<256x512xbf16>
    %c0_20 = arith.constant 0 : index
    %c0_21 = arith.constant 0 : index
    %45 = vector.load %arg6[%c0_20, %c0_21] : memref<128x384xbf16, #tpu.memory_space<vmem>>, vector<128x384xbf16>
    %c0_22 = arith.constant 0 : index
    %c0_23 = arith.constant 0 : index
    %46 = vector.load %arg7[%c0_22, %c0_23] : memref<3x512xf32, #tpu.memory_space<vmem>>, vector<1x512xf32>
    %c1 = arith.constant 1 : index
    %c0_24 = arith.constant 0 : index
    %47 = vector.load %arg7[%c1, %c0_24] : memref<3x512xf32, #tpu.memory_space<vmem>>, vector<1x384xf32>
    %c2 = arith.constant 2 : index
    %c0_25 = arith.constant 0 : index
    %48 = vector.load %arg7[%c2, %c0_25] : memref<3x512xf32, #tpu.memory_space<vmem>>, vector<1x1xf32>
    %c2_26 = arith.constant 2 : index
    %c1_27 = arith.constant 1 : index
    %49 = vector.load %arg7[%c2_26, %c1_27] : memref<3x512xf32, #tpu.memory_space<vmem>>, vector<1x1xf32>
    %50 = tpu.concatenate %3, %7 in 0 : vector<8x128xf32>, vector<16x128xf32> -> vector<24x128xf32>
    %cst_28 = arith.constant 0.000000e+00 : f32
    %51 = vector.broadcast %cst_28 : f32 to vector<24x128xf32>
    %52 = arith.maximumf %50, %51 : vector<24x128xf32>
    %53 = arith.truncf %52 : vector<24x128xf32> to vector<24x128xbf16>
    %cst_29 = arith.constant dense<0.000000e+00> : vector<24x4xf32>
    %54 = tpu.matmul %53, %43, %cst_29 {dimension_numbers = #tpu.dot_dimension_numbers<[1], [0], [0], [1], [0, 0, 1, 1], [], []>} : vector<24x128xbf16>, vector<128x4xbf16>, vector<24x4xf32> -> vector<24x4xf32>
    %55 = vector.extract_strided_slice %54 {offsets = [8, 1], sizes = [16, 1], strides = [1, 1]} : vector<24x4xf32> to vector<16x1xf32>
    %56 = vector.extract_strided_slice %54 {offsets = [8, 2], sizes = [16, 1], strides = [1, 1]} : vector<24x4xf32> to vector<16x1xf32>
    %57 = vector.extract_strided_slice %54 {offsets = [0, 0], sizes = [8, 4], strides = [1, 1]} : vector<24x4xf32> to vector<8x4xf32>
    %58 = arith.truncf %57 : vector<8x4xf32> to vector<8x4xbf16>
    %cst_30 = arith.constant dense<0.000000e+00> : vector<32x4xf32>
    %59 = tpu.matmul %20, %58, %cst_30 {dimension_numbers = #tpu.dot_dimension_numbers<[1], [0], [0], [1], [0, 0, 1, 1], [], []>} : vector<32x8xbf16>, vector<8x4xbf16>, vector<32x4xf32> -> vector<32x4xf32>
    %60 = tpu.concatenate %55, %55 in 0 : vector<16x1xf32>, vector<16x1xf32> -> vector<32x1xf32>
    %61 = tpu.concatenate %56, %56 in 0 : vector<16x1xf32>, vector<16x1xf32> -> vector<32x1xf32>
    %62 = vector.extract_strided_slice %59 {offsets = [0, 0], sizes = [32, 1], strides = [1, 1]} : vector<32x4xf32> to vector<32x1xf32>
    %63 = arith.addf %62, %60 : vector<32x1xf32>
    %64 = vector.broadcast %48 : vector<1x1xf32> to vector<32x1xf32>
    %65 = arith.addf %63, %64 : vector<32x1xf32>
    %66 = arith.negf %65 : vector<32x1xf32>
    %67 = math.exp %66 : vector<32x1xf32>
    %cst_31 = arith.constant 1.000000e+00 : f32
    %68 = vector.broadcast %cst_31 : f32 to vector<32x1xf32>
    %69 = arith.addf %68, %67 : vector<32x1xf32>
    %70 = arith.divf %68, %69 : vector<32x1xf32>
    %71 = vector.extract_strided_slice %59 {offsets = [0, 3], sizes = [32, 1], strides = [1, 1]} : vector<32x4xf32> to vector<32x1xf32>
    %72 = arith.addf %71, %61 : vector<32x1xf32>
    %73 = vector.broadcast %49 : vector<1x1xf32> to vector<32x1xf32>
    %74 = arith.addf %72, %73 : vector<32x1xf32>
    %75 = arith.negf %74 : vector<32x1xf32>
    %76 = math.exp %75 : vector<32x1xf32>
    %cst_32 = arith.constant 1.000000e+00 : f32
    %77 = vector.broadcast %cst_32 : f32 to vector<32x1xf32>
    %78 = arith.addf %77, %76 : vector<32x1xf32>
    %79 = arith.divf %77, %78 : vector<32x1xf32>
    %80 = tpu.concatenate %7, %7 in 0 : vector<16x128xf32>, vector<16x128xf32> -> vector<32x128xf32>
    %81 = vector.broadcast %70 : vector<32x1xf32> to vector<32x128xf32>
    %82 = arith.mulf %81, %80 : vector<32x128xf32>
    %83 = arith.truncf %82 : vector<32x128xf32> to vector<32x128xbf16>
    %cst_33 = arith.constant dense<0.000000e+00> : vector<8x128xf32>
    %84 = tpu.matmul %42, %83, %cst_33 {dimension_numbers = #tpu.dot_dimension_numbers<[1], [0], [0], [1], [0, 0, 1, 1], [], []>} : vector<8x32xbf16>, vector<32x128xbf16>, vector<8x128xf32> -> vector<8x128xf32>
    %85 = arith.truncf %3 : vector<8x128xf32> to vector<8x128xbf16>
    %cst_34 = arith.constant dense<0.000000e+00> : vector<32x128xf32>
    %86 = tpu.matmul %20, %85, %cst_34 {dimension_numbers = #tpu.dot_dimension_numbers<[1], [0], [0], [1], [0, 0, 1, 1], [], []>} : vector<32x8xbf16>, vector<8x128xbf16>, vector<32x128xf32> -> vector<32x128xf32>
    %87 = vector.broadcast %79 : vector<32x1xf32> to vector<32x128xf32>
    %88 = arith.mulf %87, %86 : vector<32x128xf32>
    %89 = vector.extract_strided_slice %88 {offsets = [0, 0], sizes = [16, 128], strides = [1, 1]} : vector<32x128xf32> to vector<16x128xf32>
    %90 = vector.extract_strided_slice %88 {offsets = [16, 0], sizes = [16, 128], strides = [1, 1]} : vector<32x128xf32> to vector<16x128xf32>
    %91 = arith.addf %89, %90 : vector<16x128xf32>
    %92 = tpu.concatenate %84, %91 in 0 : vector<8x128xf32>, vector<16x128xf32> -> vector<24x128xf32>
    %93 = tpu.concatenate %92, %50 in 1 : vector<24x128xf32>, vector<24x128xf32> -> vector<24x256xf32>
    %94 = arith.truncf %93 : vector<24x256xf32> to vector<24x256xbf16>
    %cst_35 = arith.constant dense<0.000000e+00> : vector<24x512xf32>
    %95 = tpu.matmul %94, %44, %cst_35 {dimension_numbers = #tpu.dot_dimension_numbers<[1], [0], [0], [1], [0, 0, 1, 1], [], []>} : vector<24x256xbf16>, vector<256x512xbf16>, vector<24x512xf32> -> vector<24x512xf32>
    %96 = vector.broadcast %46 : vector<1x512xf32> to vector<24x512xf32>
    %97 = arith.addf %95, %96 : vector<24x512xf32>
    %98 = vector.extract_strided_slice %97 {offsets = [0, 0], sizes = [24, 128], strides = [1, 1]} : vector<24x512xf32> to vector<24x128xf32>
    %99 = arith.negf %98 : vector<24x128xf32>
    %100 = math.exp %99 : vector<24x128xf32>
    %cst_36 = arith.constant 1.000000e+00 : f32
    %101 = vector.broadcast %cst_36 : f32 to vector<24x128xf32>
    %102 = arith.addf %101, %100 : vector<24x128xf32>
    %103 = arith.divf %101, %102 : vector<24x128xf32>
    %104 = vector.extract_strided_slice %97 {offsets = [0, 128], sizes = [24, 128], strides = [1, 1]} : vector<24x512xf32> to vector<24x128xf32>
    %105 = arith.negf %104 : vector<24x128xf32>
    %106 = math.exp %105 : vector<24x128xf32>
    %cst_37 = arith.constant 1.000000e+00 : f32
    %107 = vector.broadcast %cst_37 : f32 to vector<24x128xf32>
    %108 = arith.addf %107, %106 : vector<24x128xf32>
    %109 = arith.divf %107, %108 : vector<24x128xf32>
    %110 = vector.extract_strided_slice %97 {offsets = [0, 256], sizes = [24, 128], strides = [1, 1]} : vector<24x512xf32> to vector<24x128xf32>
    %111 = vector.extract_strided_slice %97 {offsets = [0, 384], sizes = [24, 128], strides = [1, 1]} : vector<24x512xf32> to vector<24x128xf32>
    %112 = arith.mulf %103, %111 : vector<24x128xf32>
    %113 = arith.addf %110, %112 : vector<24x128xf32>
    %114 = math.tanh %113 : vector<24x128xf32>
    %cst_38 = arith.constant 1.000000e+00 : f32
    %115 = vector.broadcast %cst_38 : f32 to vector<24x128xf32>
    %116 = arith.subf %115, %109 : vector<24x128xf32>
    %117 = arith.mulf %116, %114 : vector<24x128xf32>
    %118 = arith.mulf %109, %50 : vector<24x128xf32>
    %119 = arith.addf %117, %118 : vector<24x128xf32>
    %120 = vector.extract_strided_slice %119 {offsets = [0, 0], sizes = [8, 128], strides = [1, 1]} : vector<24x128xf32> to vector<8x128xf32>
    %121 = vector.extract_strided_slice %119 {offsets = [8, 0], sizes = [16, 128], strides = [1, 1]} : vector<24x128xf32> to vector<16x128xf32>
    %122 = tpu.concatenate %120, %121 in 0 : vector<8x128xf32>, vector<16x128xf32> -> vector<24x128xf32>
    %cst_39 = arith.constant 0.000000e+00 : f32
    %123 = vector.broadcast %cst_39 : f32 to vector<24x128xf32>
    %124 = arith.maximumf %122, %123 : vector<24x128xf32>
    %125 = arith.truncf %124 : vector<24x128xf32> to vector<24x128xbf16>
    %cst_40 = arith.constant dense<0.000000e+00> : vector<24x4xf32>
    %126 = tpu.matmul %125, %43, %cst_40 {dimension_numbers = #tpu.dot_dimension_numbers<[1], [0], [0], [1], [0, 0, 1, 1], [], []>} : vector<24x128xbf16>, vector<128x4xbf16>, vector<24x4xf32> -> vector<24x4xf32>
    %127 = vector.extract_strided_slice %126 {offsets = [8, 1], sizes = [16, 1], strides = [1, 1]} : vector<24x4xf32> to vector<16x1xf32>
    %128 = vector.extract_strided_slice %126 {offsets = [8, 2], sizes = [16, 1], strides = [1, 1]} : vector<24x4xf32> to vector<16x1xf32>
    %129 = vector.extract_strided_slice %126 {offsets = [0, 0], sizes = [8, 4], strides = [1, 1]} : vector<24x4xf32> to vector<8x4xf32>
    %130 = arith.truncf %129 : vector<8x4xf32> to vector<8x4xbf16>
    %cst_41 = arith.constant dense<0.000000e+00> : vector<32x4xf32>
    %131 = tpu.matmul %20, %130, %cst_41 {dimension_numbers = #tpu.dot_dimension_numbers<[1], [0], [0], [1], [0, 0, 1, 1], [], []>} : vector<32x8xbf16>, vector<8x4xbf16>, vector<32x4xf32> -> vector<32x4xf32>
    %132 = tpu.concatenate %127, %127 in 0 : vector<16x1xf32>, vector<16x1xf32> -> vector<32x1xf32>
    %133 = tpu.concatenate %128, %128 in 0 : vector<16x1xf32>, vector<16x1xf32> -> vector<32x1xf32>
    %134 = vector.extract_strided_slice %131 {offsets = [0, 0], sizes = [32, 1], strides = [1, 1]} : vector<32x4xf32> to vector<32x1xf32>
    %135 = arith.addf %134, %132 : vector<32x1xf32>
    %136 = vector.broadcast %48 : vector<1x1xf32> to vector<32x1xf32>
    %137 = arith.addf %135, %136 : vector<32x1xf32>
    %138 = arith.negf %137 : vector<32x1xf32>
    %139 = math.exp %138 : vector<32x1xf32>
    %cst_42 = arith.constant 1.000000e+00 : f32
    %140 = vector.broadcast %cst_42 : f32 to vector<32x1xf32>
    %141 = arith.addf %140, %139 : vector<32x1xf32>
    %142 = arith.divf %140, %141 : vector<32x1xf32>
    %143 = vector.extract_strided_slice %131 {offsets = [0, 3], sizes = [32, 1], strides = [1, 1]} : vector<32x4xf32> to vector<32x1xf32>
    %144 = arith.addf %143, %133 : vector<32x1xf32>
    %145 = vector.broadcast %49 : vector<1x1xf32> to vector<32x1xf32>
    %146 = arith.addf %144, %145 : vector<32x1xf32>
    %147 = arith.negf %146 : vector<32x1xf32>
    %148 = math.exp %147 : vector<32x1xf32>
    %cst_43 = arith.constant 1.000000e+00 : f32
    %149 = vector.broadcast %cst_43 : f32 to vector<32x1xf32>
    %150 = arith.addf %149, %148 : vector<32x1xf32>
    %151 = arith.divf %149, %150 : vector<32x1xf32>
    %152 = tpu.concatenate %121, %121 in 0 : vector<16x128xf32>, vector<16x128xf32> -> vector<32x128xf32>
    %153 = vector.broadcast %142 : vector<32x1xf32> to vector<32x128xf32>
    %154 = arith.mulf %153, %152 : vector<32x128xf32>
    %155 = arith.truncf %154 : vector<32x128xf32> to vector<32x128xbf16>
    %cst_44 = arith.constant dense<0.000000e+00> : vector<8x128xf32>
    %156 = tpu.matmul %42, %155, %cst_44 {dimension_numbers = #tpu.dot_dimension_numbers<[1], [0], [0], [1], [0, 0, 1, 1], [], []>} : vector<8x32xbf16>, vector<32x128xbf16>, vector<8x128xf32> -> vector<8x128xf32>
    %157 = arith.truncf %120 : vector<8x128xf32> to vector<8x128xbf16>
    %cst_45 = arith.constant dense<0.000000e+00> : vector<32x128xf32>
    %158 = tpu.matmul %20, %157, %cst_45 {dimension_numbers = #tpu.dot_dimension_numbers<[1], [0], [0], [1], [0, 0, 1, 1], [], []>} : vector<32x8xbf16>, vector<8x128xbf16>, vector<32x128xf32> -> vector<32x128xf32>
    %159 = vector.broadcast %151 : vector<32x1xf32> to vector<32x128xf32>
    %160 = arith.mulf %159, %158 : vector<32x128xf32>
    %161 = vector.extract_strided_slice %160 {offsets = [0, 0], sizes = [16, 128], strides = [1, 1]} : vector<32x128xf32> to vector<16x128xf32>
    %162 = vector.extract_strided_slice %160 {offsets = [16, 0], sizes = [16, 128], strides = [1, 1]} : vector<32x128xf32> to vector<16x128xf32>
    %163 = arith.addf %161, %162 : vector<16x128xf32>
    %164 = tpu.concatenate %156, %163 in 0 : vector<8x128xf32>, vector<16x128xf32> -> vector<24x128xf32>
    %165 = tpu.concatenate %164, %122 in 1 : vector<24x128xf32>, vector<24x128xf32> -> vector<24x256xf32>
    %166 = arith.truncf %165 : vector<24x256xf32> to vector<24x256xbf16>
    %cst_46 = arith.constant dense<0.000000e+00> : vector<24x512xf32>
    %167 = tpu.matmul %166, %44, %cst_46 {dimension_numbers = #tpu.dot_dimension_numbers<[1], [0], [0], [1], [0, 0, 1, 1], [], []>} : vector<24x256xbf16>, vector<256x512xbf16>, vector<24x512xf32> -> vector<24x512xf32>
    %168 = vector.broadcast %46 : vector<1x512xf32> to vector<24x512xf32>
    %169 = arith.addf %167, %168 : vector<24x512xf32>
    %170 = vector.extract_strided_slice %169 {offsets = [0, 0], sizes = [24, 128], strides = [1, 1]} : vector<24x512xf32> to vector<24x128xf32>
    %171 = arith.negf %170 : vector<24x128xf32>
    %172 = math.exp %171 : vector<24x128xf32>
    %cst_47 = arith.constant 1.000000e+00 : f32
    %173 = vector.broadcast %cst_47 : f32 to vector<24x128xf32>
    %174 = arith.addf %173, %172 : vector<24x128xf32>
    %175 = arith.divf %173, %174 : vector<24x128xf32>
    %176 = vector.extract_strided_slice %169 {offsets = [0, 128], sizes = [24, 128], strides = [1, 1]} : vector<24x512xf32> to vector<24x128xf32>
    %177 = arith.negf %176 : vector<24x128xf32>
    %178 = math.exp %177 : vector<24x128xf32>
    %cst_48 = arith.constant 1.000000e+00 : f32
    %179 = vector.broadcast %cst_48 : f32 to vector<24x128xf32>
    %180 = arith.addf %179, %178 : vector<24x128xf32>
    %181 = arith.divf %179, %180 : vector<24x128xf32>
    %182 = vector.extract_strided_slice %169 {offsets = [0, 256], sizes = [24, 128], strides = [1, 1]} : vector<24x512xf32> to vector<24x128xf32>
    %183 = vector.extract_strided_slice %169 {offsets = [0, 384], sizes = [24, 128], strides = [1, 1]} : vector<24x512xf32> to vector<24x128xf32>
    %184 = arith.mulf %175, %183 : vector<24x128xf32>
    %185 = arith.addf %182, %184 : vector<24x128xf32>
    %186 = math.tanh %185 : vector<24x128xf32>
    %cst_49 = arith.constant 1.000000e+00 : f32
    %187 = vector.broadcast %cst_49 : f32 to vector<24x128xf32>
    %188 = arith.subf %187, %181 : vector<24x128xf32>
    %189 = arith.mulf %188, %186 : vector<24x128xf32>
    %190 = arith.mulf %181, %122 : vector<24x128xf32>
    %191 = arith.addf %189, %190 : vector<24x128xf32>
    %192 = vector.extract_strided_slice %191 {offsets = [0, 0], sizes = [8, 128], strides = [1, 1]} : vector<24x128xf32> to vector<8x128xf32>
    %193 = vector.extract_strided_slice %191 {offsets = [8, 0], sizes = [16, 128], strides = [1, 1]} : vector<24x128xf32> to vector<16x128xf32>
    %c0_50 = arith.constant 0 : index
    %c0_51 = arith.constant 0 : index
    %194 = vector.load %arg8[%c0_50, %c0_51] : memref<8x128xf32, #tpu.memory_space<vmem>>, vector<8x128xf32>
    tpu.vector_store %arg8[%c0_50, %c0_51], %192 {strides = array<i32>} : memref<8x128xf32, #tpu.memory_space<vmem>>, vector<8x128xf32>,
    %c0_52 = arith.constant 0 : index
    %c0_53 = arith.constant 0 : index
    %195 = vector.load %arg9[%c0_52, %c0_53] : memref<16x128xf32, #tpu.memory_space<vmem>>, vector<16x128xf32>
    tpu.vector_store %arg9[%c0_52, %c0_53], %193 {strides = array<i32>} : memref<16x128xf32, #tpu.memory_space<vmem>>, vector<16x128xf32>,
    %196 = tpu.concatenate %192, %193 in 0 : vector<8x128xf32>, vector<16x128xf32> -> vector<24x128xf32>
    %197 = arith.truncf %196 : vector<24x128xf32> to vector<24x128xbf16>
    %cst_54 = arith.constant dense<0.000000e+00> : vector<24x384xf32>
    %198 = tpu.matmul %197, %45, %cst_54 {dimension_numbers = #tpu.dot_dimension_numbers<[1], [0], [0], [1], [0, 0, 1, 1], [], []>} : vector<24x128xbf16>, vector<128x384xbf16>, vector<24x384xf32> -> vector<24x384xf32>
    %199 = vector.broadcast %47 : vector<1x384xf32> to vector<24x384xf32>
    %200 = arith.addf %198, %199 : vector<24x384xf32>
    %c0_55 = arith.constant 0 : index
    %c0_56 = arith.constant 0 : index
    %201 = vector.load %arg10[%c0_55, %c0_56] : memref<24x384xf32, #tpu.memory_space<vmem>>, vector<24x384xf32>
    tpu.vector_store %arg10[%c0_55, %c0_56], %200 {strides = array<i32>} : memref<24x384xf32, #tpu.memory_space<vmem>>, vector<24x384xf32>,
    return
  }
}

</mosaic_0001>

<bundles_post_ra>
// kernel: tpu_custom_call.1
= control target key start
LH: loop header
LB: loop body
LE: loop exit
PB: predicated region body
PF: predicated region fallthrough
CT: control target
= control target key end

     0   :  { %16 = vsyncpa [#allocation3], 0  ;;  %s4398_s0 = inlined_call_operand.hbm [shape: f32[8,16,128], index: 0, kind: input, shape index: {}]   ;;  %s4399_s1 = inlined_call_operand.hbm [shape: f32[16,16,128], index: 1, kind: input, shape index: {}]   ;;  %s4400_s2 = inlined_call_operand.vmem [shape: s32[1,32], index: 2, kind: input, shape index: {}]   ;;  %s4401_s3 = inlined_call_operand.vmem [shape: s32[32,1], index: 3, kind: input, shape index: {}]   ;;  %s4402_s4 = inlined_call_operand.vmem [shape: bf16[128,4], index: 4, kind: input, shape index: {}]   ;;  %s4403_s5 = inlined_call_operand.hbm [shape: bf16[256,512], index: 5, kind: input, shape index: {}]   ;;  %s4404_s6 = inlined_call_operand.hbm [shape: bf16[128,384], index: 6, kind: input, shape index: {}]   ;;  %s4405_s7 = inlined_call_operand.vmem [shape: f32[3,512], index: 7, kind: input, shape index: {}]   ;;  %s4406_s8 = inlined_call_operand.hbm [shape: f32[8,128], index: 8, kind: output, shape index: {0}]   ;;  %s4407_s9 = inlined_call_operand.hbm [shape: f32[16,128], index: 9, kind: output, shape index: {1}]   ;;  %s4408_s10 = inlined_call_operand.hbm [shape: f32[24,384], index: 10, kind: output, shape index: {2}]  }
   0x1   :  { %17 = vsyncpa [#allocation6], 0 }
   0x2   :  { %18 = vsyncpa [#allocation9], 0 }
   0x3   :  { %19 = vsyncpa [#allocation4], 0 }
   0x4   :  { %20 = vsyncpa [#allocation12], 0  ;;  %s38_s15 = sshll.u32 %s4399_s1, 4  ;;  %s3331_s16 = smov [#allocation5]   ;;  %s39_s15 = int_to_ptr.hbm [resolvable:$true] %s38_s15 }
   0x5   :  { %s40_s17 = sshll.u32 %s3331_s16, 4  ;;  %s25_s20 = sshll.u32 %s4398_s0, 4  ;;  %s41_s17 = int_to_ptr.vmem [resolvable:$true] %s40_s17  ;;  %s26_s20 = int_to_ptr.hbm [resolvable:$true] %s25_s20 }
   0x6   :  { %s3332_s21 = smov 128   ;;  %s3333_s22 = smov 8  }
   0x7   :  { %46 = dma.hbm_to_vmem [thread:$0]  %s39_s15, 4096, %s41_s17, [#allocation6], %s3332_s21, %s3332_s21, %s3333_s22  }
   0x8   :  { %s3334_s23 = smov [#allocation2]   ;;  %s57_s1 = sshll.u32 %s4403_s5, 4  ;;  %s58_s1 = int_to_ptr.hbm [resolvable:$true] %s57_s1 }
   0x9   :  { %s27_s24 = sshll.u32 %s3334_s23, 4  ;;  %s3335_s0 = smov [#allocation7]   ;;  %s28_s24 = int_to_ptr.vmem [resolvable:$true] %s27_s24 }
   0xa   :  { %33 = dma.hbm_to_vmem [thread:$0]  %s26_s20, 2048, %s28_s24, [#allocation3], %s3332_s21, %s3332_s21, %s3333_s22  }
   0xb   :  { %s59_s27 = sshll.u32 %s3335_s0, 4  ;;  %s70_s30 = sshll.u32 %s4404_s6, 4  ;;  %s60_s27 = int_to_ptr.vmem [resolvable:$true] %s59_s27  ;;  %s71_s30 = int_to_ptr.hbm [resolvable:$true] %s70_s30 }
   0xc   :  { %s3336_s11 = smov 256   ;;  %s3337_s12 = smov 16  }
   0xd   :  { %65 = dma.hbm_to_vmem [thread:$0]  %s58_s1, 8192, %s60_s27, [#allocation6], %s3336_s11, %s3336_s11, %s3337_s12  }
   0xe   :  { %s3338_s13 = smov [#allocation8]   ;;  %s3339_s5 = smov 192  }
   0xf   :  { %s72_s14 = sshll.u32 %s3338_s13, 4  ;;  %s3340_s15 = smov 12   ;;  %s73_s14 = int_to_ptr.vmem [resolvable:$true] %s72_s14 }
  0x10   :  { %78 = dma.hbm_to_vmem [thread:$0]  %s71_s30, 3072, %s73_s14, [#allocation9], %s3339_s5, %s3339_s5, %s3340_s15  }
  0x11   :  { %3321 = dma.done.wait [#allocation3], 2048  }
  0x12   :  { %3322 = vsyncadd [#allocation3], 4294965248 }
  0x13   :  { %3323 = dma.done.wait [#allocation6], 12288  }
  0x14   :  { %3324 = vsyncadd [#allocation6], 4294955008 }
  0x15   :  { %3325 = dma.done.wait [#allocation9], 3072  }
  0x16   :  { %3326 = vsyncadd [#allocation9], 4294964224  ;;  %v3341_v0 = vmov 0   ;;  %v3342_v1 = vmov 16.0   ;;  %v2889_v3 = vld [vmem:[%s4402_s4 + $0x38] sm:$0xff]  ;;  %v2888_v5 = vld [vmem:[%s4402_s4 + $0x30] sm:$0xff] }
  0x17   :  { %3001 = vset.pattern.permute.xlu0 %v3341_v0  ;;  %3014 = vrcp.f32 %v3342_v1  ;;  %3002 = vset.pattern.permute.xlu1 %v3341_v0  ;;  %v346_v6 = vld [vmem:[%s4401_s3] sm:$0xff]  ;;  %v99_v8 = vld [vmem:[#allocation2 + $0x8] sm:$0xff]  ;;  %v100_v11 = vld [vmem:[#allocation2 + $0x10] sm:$0xff]  ;;  %vm527_vm1 = vcmask 1041409   ;;  %vm529_vm2 = vcmask 1042434   ;;  %vm531_vm3 = vcmask 1043459  }
  0x18   :  { %627 = vmatpush.bf16.msra.mxu0 %v2889_v3  ;;  %359 = vperm.xlu0 %3001, %v346_v6   ;;  %v98_v7 = vld [vmem:[#allocation2] sm:$0xff]  ;;  %v2887_v10 = vld [vmem:[%s4402_s4 + $0x28] sm:$0xff]  ;;  %v101_v12 = vld [vmem:[#allocation2 + $0x18] sm:$0xff]  ;;  %vm533_vm4 = vcmask 1044484   ;;  %vm535_vm5 = vcmask 1045509   ;;  %vm537_vm6 = vcmask 1046534  }
  0x19   :  { %v102_v13 = vld [vmem:[#allocation2 + $0x20] sm:$0xff]  ;;  %v114_v14 = vadd.f32 %v99_v8, %v98_v7  ;;  %v103_v15 = vld [vmem:[#allocation2 + $0x28] sm:$0xff]  ;;  %v104_v16 = vld [vmem:[#allocation2 + $0x30] sm:$0xff]  ;;  %v121_v18 = vadd.f32 %v101_v12, %v100_v11  ;;  %vm539_vm7 = vcmask 1047559   ;;  %vm653_vm9 = vcmask 1043456   ;;  %s3345_s18 = smov 127  }
  0x1a   :  { %v105_v17 = vld [vmem:[#allocation2 + $0x38] sm:$0xff]  ;;  %v106_v20 = vld [vmem:[#allocation2 + $0x40] sm:$0xff]  ;;  %v107_v21 = vld [vmem:[#allocation2 + $0x48] sm:$0xff]  ;;  %v128_v24 = vadd.f32 %v103_v15, %v102_v13  ;;  %vm646_vm12 = vcmask 64512   ;;  %vm384_vm14 = vcmask 130048   ;;  %s3346_s19 = smov 1  }
  0x1b   :  { %v108_v22 = vld [vmem:[#allocation2 + $0x50] sm:$0xff]  ;;  %v115_v23 = vrot.slane %v114_v14, 4  ;;  %v135_v25 = vadd.f32 %v105_v17, %v104_v16  ;;  %v109_v26 = vld [vmem:[#allocation2 + $0x58] sm:$0xff]  ;;  %v110_v27 = vld [vmem:[#allocation2 + $0x60] sm:$0xff]  ;;  %v122_v29 = vrot.slane %v121_v18, 4  ;;  %v142_v30 = vadd.f32 %v107_v21, %v106_v20  ;;  %s3347_s24 = smov 2  }
  0x1c   :  { %628 = vmatpush.bf16.msra.mxu0 %v2888_v5  ;;  %v111_v28 = vld [vmem:[#allocation2 + $0x68] sm:$0xff]  ;;  %v112_v33 = vld [vmem:[#allocation2 + $0x70] sm:$0xff]  ;;  %v113_v34 = vld [vmem:[#allocation2 + $0x78] sm:$0xff]  ;;  %v129_v36 = vrot.slane %v128_v24, 4  ;;  %v149_v38 = vadd.f32 %v109_v26, %v108_v22  ;;  %s2417_s20 = sshll.u32 %s4407_s9, 4  ;;  %s3349_s23 = smov [#allocation11]   ;;  %s2418_s20 = int_to_ptr.hbm [resolvable:$true] %s2417_s20 }
  0x1d   :  { %v3429_v2 = vpop.eup %3014  ;;  %v347_v32 = vld [vmem:[%s4401_s3 + $0x8] sm:$0xff]  ;;  %v116_v35 = vadd.f32 %v115_v23, %v114_v14  ;;  %v136_v37 = vrot.slane %v135_v25, 4  ;;  %v123_v39 = vadd.f32 %v122_v29, %v121_v18  ;;  %v143_v40 = vrot.slane %v142_v30, 4  ;;  %v2886_v43 = vld [vmem:[%s4402_s4 + $0x20] sm:$0xff]  ;;  %v2885_v60 = vld [vmem:[%s4402_s4 + $0x18] sm:$0xff]  ;;  %s3350_s25 = smov [#allocation10]  }
  0x1e   :  { %v171_v4 = vmul.f32 16.0, %v3429_v2  ;;  %vm175_vm0 = vweird.f32 %v3429_v2  ;;  %v156_v41 = vadd.f32 %v111_v28, %v110_v27  ;;  %v163_v42 = vadd.f32 %v113_v34, %v112_v33  ;;  %v2884_v7 = vld [vmem:[%s4402_s4 + $0x10] sm:$0xff]  ;;  %v185_v12 = vld [vmem:[#allocation5] sm:$0xff]  ;;  %v186_v17 = vld [vmem:[#allocation5 + $0x8] sm:$0xff]  ;;  %s2405_s26 = sshll.u32 %s3350_s25, 4  ;;  %s2407_s27 = sshll.u32 %s4406_s8, 4  ;;  %s2406_s26 = int_to_ptr.vmem [resolvable:$true] %s2405_s26  ;;  %s2408_s27 = int_to_ptr.hbm [resolvable:$true] %s2407_s27 }
  0x1f   :  { %v117_v44 = vrot.slane %v116_v35, 2  ;;  %v130_v45 = vadd.f32 %v129_v36, %v128_v24  ;;  %v137_v46 = vadd.f32 %v136_v37, %v135_v25  ;;  %v150_v47 = vrot.slane %v149_v38, 4  ;;  %v187_v18 = vld [vmem:[#allocation5 + $0x10] sm:$0xff]  ;;  %v189_v24 = vld [vmem:[#allocation5 + $0x20] sm:$0xff]  ;;  %v190_v25 = vld [vmem:[#allocation5 + $0x28] sm:$0xff]  ;;  %s3352_s30 = smov 384  }
  0x20   :  { %v172_v9 = vsub.f32 1.0, %v171_v4  ;;  %629 = vmatpush.bf16.msra.mxu0 %v2887_v10  ;;  %362 = vperm.xlu0 %3001, %v347_v32   ;;  %v124_v48 = vrot.slane %v123_v39, 2  ;;  %v144_v49 = vadd.f32 %v143_v40, %v142_v30  ;;  %v157_v50 = vrot.slane %v156_v41, 4  ;;  %v191_v26 = vld [vmem:[#allocation5 + $0x30] sm:$0xff]  ;;  %v192_v32 = vld [vmem:[#allocation5 + $0x38] sm:$0xff]  ;;  %v193_v33 = vld [vmem:[#allocation5 + $0x40] sm:$0xff] }
  0x21   :  { %v164_v51 = vrot.slane %v163_v42, 4  ;;  %v118_v52 = vadd.f32 %v117_v44, %v116_v35  ;;  %v131_v53 = vrot.slane %v130_v45, 2  ;;  %v138_v54 = vrot.slane %v137_v46, 2  ;;  %v348_v34 = vld [vmem:[%s4401_s3 + $0x10] sm:$0xff]  ;;  %v197_v44 = vld [vmem:[#allocation5 + $0x60] sm:$0xff]  ;;  %s3353_s11 = smov 24  }
  0x22   :  { %v173_v19 = vmul.f32 %v3429_v2, %v172_v9  ;;  %v151_v55 = vadd.f32 %v150_v47, %v149_v38  ;;  %v125_v56 = vadd.f32 %v124_v48, %v123_v39  ;;  %v145_v57 = vrot.slane %v144_v49, 2  ;;  %v194_v38 = vld [vmem:[#allocation5 + $0x48] sm:$0xff]  ;;  %365 = vperm.xlu1 %3002, %v348_v34   ;;  %v199_v48 = vld [vmem:[#allocation5 + $0x70] sm:$0xff] }
  0x23   :  { %v158_v58 = vadd.f32 %v157_v50, %v156_v41  ;;  %v165_v59 = vadd.f32 %v164_v51, %v163_v42  ;;  %v119_v61 = vrot.slane %v118_v52, 1  ;;  %v132_v62 = vadd.f32 %v131_v53, %v130_v45  ;;  %v195_v42 = vld [vmem:[#allocation5 + $0x50] sm:$0xff]  ;;  %v198_v47 = vld [vmem:[#allocation5 + $0x68] sm:$0xff] }
  0x24   :  { %v174_v31 = vadd.f32 %v3429_v2, %v173_v19  ;;  %630 = vmatpush.bf16.msra.mxu0 %v2886_v43  ;;  %v139_v63 = vadd.f32 %v138_v54, %v137_v46  ;;  %v152_v1 = vrot.slane %v151_v55, 2  ;;  %v126_v3 = vrot.slane %v125_v56, 1  ;;  %v188_v19 = vld [vmem:[#allocation5 + $0x18] sm:$0xff] }
  0x25   :  { %v146_v4 = vadd.f32 %v145_v57, %v144_v49  ;;  %v159_v5 = vrot.slane %v158_v58, 2  ;;  %v166_v6 = vrot.slane %v165_v59, 2  ;;  %v120_v8 = vadd.f32 %v119_v61, %v118_v52  ;;  %v196_v43 = vld [vmem:[#allocation5 + $0x58] sm:$0xff] }
  0x26   :  { %v133_v9 = vrot.slane %v132_v62, 1  ;;  %v140_v10 = vrot.slane %v139_v63, 1  ;;  %v153_v11 = vadd.f32 %v152_v1, %v151_v55  ;;  %v127_v13 = vadd.f32 %v126_v3, %v125_v56  ;;  %v200_v49 = vld [vmem:[#allocation5 + $0x78] sm:$0xff] }
  0x27   :  { %v147_v14 = vrot.slane %v146_v4, 1  ;;  %v160_v15 = vadd.f32 %v159_v5, %v158_v58  ;;  %v167_v16 = vadd.f32 %v166_v6, %v165_v59  ;;  %v3462_v23 = vsel %vm175_vm0, %v3429_v2, %v174_v31  ;;  %v2883_v2 = vld [vmem:[%s4402_s4 + $0x8] sm:$0xff]  ;;  %v349_v3 = vld [vmem:[%s4401_s3 + $0x18] sm:$0xff] }
  0x28   :  { %631 = vmatpush.bf16.msra.mxu0 %v2885_v60  ;;  %v134_v20 = vadd.f32 %v133_v9, %v132_v62  ;;  %v141_v21 = vadd.f32 %v140_v10, %v139_v63  ;;  %v154_v22 = vrot.slane %v153_v11, 1  ;;  %v3465_v30 = vmul.f32 %v3462_v23, %v120_v8 }
  0x29   :  { %v148_v27 = vadd.f32 %v147_v14, %v146_v4  ;;  %v161_v28 = vrot.slane %v160_v15, 1  ;;  %v168_v29 = vrot.slane %v167_v16, 1  ;;  %v3474_v35 = vmul.f32 %v3462_v23, %v127_v13  ;;  %v2882_v4 = vld [vmem:[%s4402_s4] sm:$0xff] }
  0x2a   :  { %v155_v31 = vadd.f32 %v154_v22, %v153_v11  ;;  %v3477_v36 = vmul.f32 %v3462_v23, %v134_v20  ;;  %v3480_v37 = vmul.f32 %v3462_v23, %v141_v21  ;;  %v217_v45 = vadd.f32 %v186_v17, %v185_v12  ;;  %368 = vperm.xlu1 %3002, %v349_v3  }
  0x2b   :  { %v162_v39 = vadd.f32 %v161_v28, %v160_v15  ;;  %v169_v40 = vadd.f32 %v168_v29, %v167_v16  ;;  %v3483_v41 = vmul.f32 %v3462_v23, %v148_v27  ;;  %v224_v50 = vadd.f32 %v188_v19, %v187_v18 }
  0x2c   :  { %632 = vmatpush.bf16.msra.mxu0 %v2884_v7  ;;  %v3486_v46 = vmul.f32 %v3462_v23, %v155_v31  ;;  %v231_v51 = vadd.f32 %v190_v25, %v189_v24  ;;  %v238_v52 = vadd.f32 %v192_v32, %v191_v26  ;;  %v218_v55 = vrot.slane %v217_v45, 4 }
  0x2d   :  { %v3489_v53 = vmul.f32 %v3462_v23, %v162_v39  ;;  %v3492_v54 = vmul.f32 %v3462_v23, %v169_v40  ;;  %v245_v56 = vadd.f32 %v194_v38, %v193_v33  ;;  %v225_v57 = vrot.slane %v224_v50, 4 }
  0x2e   :  { %v232_v58 = vrot.slane %v231_v51, 4  ;;  %v239_v59 = vrot.slane %v238_v52, 4  ;;  %v252_v60 = vadd.f32 %v196_v43, %v195_v42  ;;  %v219_v61 = vadd.f32 %v218_v55, %v217_v45 }
  0x2f   :  { %v246_v62 = vrot.slane %v245_v56, 4  ;;  %v259_v63 = vadd.f32 %v198_v47, %v197_v44  ;;  %v266_v1 = vadd.f32 %v200_v49, %v199_v48  ;;  %v226_v5 = vadd.f32 %v225_v57, %v224_v50 }
  0x30   :  { %633 = vmatpush.bf16.msra.mxu0 %v2883_v2  ;;  %v233_v6 = vadd.f32 %v232_v58, %v231_v51  ;;  %v240_v7 = vadd.f32 %v239_v59, %v238_v52  ;;  %v253_v8 = vrot.slane %v252_v60, 4  ;;  %v220_v9 = vrot.slane %v219_v61, 2 }
  0x31   :  { %v247_v10 = vadd.f32 %v246_v62, %v245_v56  ;;  %v260_v11 = vrot.slane %v259_v63, 4  ;;  %v267_v12 = vrot.slane %v266_v1, 4  ;;  %v227_v13 = vrot.slane %v226_v5, 2  ;;  %v202_v62 = vld [vmem:[#allocation5 + $0x88] sm:$0xff] }
  0x32   :  { %v234_v14 = vrot.slane %v233_v6, 2  ;;  %v241_v15 = vrot.slane %v240_v7, 2  ;;  %v254_v16 = vadd.f32 %v253_v8, %v252_v60  ;;  %v221_v17 = vadd.f32 %v220_v9, %v219_v61  ;;  %v201_v61 = vld [vmem:[#allocation5 + $0x80] sm:$0xff] }
  0x33   :  { %v248_v18 = vrot.slane %v247_v10, 2  ;;  %v261_v19 = vadd.f32 %v260_v11, %v259_v63  ;;  %v268_v20 = vadd.f32 %v267_v12, %v266_v1  ;;  %v228_v21 = vadd.f32 %v227_v13, %v226_v5  ;;  %v203_v63 = vld [vmem:[#allocation5 + $0x90] sm:$0xff]  ;;  %v205_v5 = vld [vmem:[#allocation5 + $0xa0] sm:$0xff]  ;;  %v208_v11 = vld [vmem:[#allocation5 + $0xb8] sm:$0xff] }
  0x34   :  { %634 = vmatpush.bf16.msra.mxu0 %v2882_v4  ;;  %v235_v22 = vadd.f32 %v234_v14, %v233_v6  ;;  %v242_v24 = vadd.f32 %v241_v15, %v240_v7  ;;  %v255_v25 = vrot.slane %v254_v16, 2  ;;  %v222_v26 = vrot.slane %v221_v17, 1  ;;  %v204_v4 = vld [vmem:[#allocation5 + $0x98] sm:$0xff]  ;;  %v206_v6 = vld [vmem:[#allocation5 + $0xa8] sm:$0xff] }
  0x35   :  { %v249_v27 = vadd.f32 %v248_v18, %v247_v10  ;;  %v262_v28 = vrot.slane %v261_v19, 2  ;;  %v269_v29 = vrot.slane %v268_v20, 2  ;;  %v229_v32 = vrot.slane %v228_v21, 1  ;;  %v207_v10 = vld [vmem:[#allocation5 + $0xb0] sm:$0xff] }
  0x36   :  { %v236_v33 = vrot.slane %v235_v22, 1  ;;  %v243_v34 = vrot.slane %v242_v24, 1  ;;  %v256_v2 = vadd.f32 %v255_v25, %v254_v16  ;;  %v223_v31 = vadd.f32 %v222_v26, %v221_v17 }
  0x37   :  { %v250_v38 = vrot.slane %v249_v27, 1  ;;  %v263_v39 = vadd.f32 %v262_v28, %v261_v19  ;;  %v270_v40 = vadd.f32 %v269_v29, %v268_v20  ;;  %v230_v42 = vadd.f32 %v229_v32, %v228_v21  ;;  %v209_v21 = vld [vmem:[#allocation5 + $0xc0] sm:$0xff]  ;;  %v211_v28 = vld [vmem:[#allocation5 + $0xd0] sm:$0xff]  ;;  %v212_v29 = vld [vmem:[#allocation5 + $0xd8] sm:$0xff] }
  0x38   :  { %v237_v43 = vadd.f32 %v236_v33, %v235_v22  ;;  %v244_v44 = vadd.f32 %v243_v34, %v242_v24  ;;  %v257_v45 = vrot.slane %v256_v2, 1  ;;  %v329_v50 = vmul.f32 %v223_v31, %v3462_v23  ;;  %v210_v22 = vld [vmem:[#allocation5 + $0xc8] sm:$0xff] }
  0x39   :  { %v251_v47 = vadd.f32 %v250_v38, %v249_v27  ;;  %v264_v48 = vrot.slane %v263_v39, 1  ;;  %v271_v49 = vrot.slane %v270_v40, 1  ;;  %v330_v52 = vmul.f32 %v230_v42, %v3462_v23  ;;  %v214_v42 = vld [vmem:[#allocation5 + $0xe8] sm:$0xff] }
  0x3a   :  { %v258_v51 = vadd.f32 %v257_v45, %v256_v2  ;;  %v331_v55 = vmul.f32 %v237_v43, %v3462_v23  ;;  %v332_v56 = vmul.f32 %v244_v44, %v3462_v23  ;;  %v528_v60 = vsel %vm527_vm1, %v3474_v35, %v3465_v30 }
  0x3b   :  { %v265_v57 = vadd.f32 %v264_v48, %v263_v39  ;;  %v272_v58 = vadd.f32 %v271_v49, %v270_v40  ;;  %v333_v59 = vmul.f32 %v251_v47, %v3462_v23  ;;  %v530_v3 = vsel %vm529_vm2, %v3477_v36, %v528_v60  ;;  %v213_v40 = vld [vmem:[#allocation5 + $0xe0] sm:$0xff] }
  0x3c   :  { %v334_v1 = vmul.f32 %v258_v51, %v3462_v23  ;;  %v532_v9 = vsel %vm531_vm3, %v3480_v37, %v530_v3  ;;  %v558_v13 = vsel %vm527_vm1, %v330_v52, %v329_v50  ;;  %v273_v14 = vadd.f32 %v202_v62, %v201_v61 }
  0x3d   :  { %v335_v7 = vmul.f32 %v265_v57, %v3462_v23  ;;  %v336_v8 = vmul.f32 %v272_v58, %v3462_v23  ;;  %v534_v12 = vsel %vm533_vm4, %v3483_v41, %v532_v9  ;;  %v559_v16 = vsel %vm529_vm2, %v331_v55, %v558_v13  ;;  %v215_v57 = vld [vmem:[#allocation5 + $0xf0] sm:$0xff]  ;;  %v216_v58 = vld [vmem:[#allocation5 + $0xf8] sm:$0xff] }
  0x3e   :  { %v536_v15 = vsel %vm535_vm5, %v3486_v46, %v534_v12  ;;  %v280_v17 = vadd.f32 %v204_v4, %v203_v63  ;;  %v287_v18 = vadd.f32 %v206_v6, %v205_v5  ;;  %v560_v20 = vsel %vm531_vm3, %v332_v56, %v559_v16 }
  0x3f   :  { %v538_v19 = vsel %vm537_vm6, %v3489_v53, %v536_v15  ;;  %v274_v24 = vrot.slane %v273_v14, 4  ;;  %v294_v25 = vadd.f32 %v208_v11, %v207_v10  ;;  %v561_v27 = vsel %vm533_vm4, %v333_v59, %v560_v20 }
  0x40   :  { %v3526_v26 = vsel %vm539_vm7, %v3492_v54, %v538_v19  ;;  %v281_v32 = vrot.slane %v280_v17, 4  ;;  %v288_v33 = vrot.slane %v287_v18, 4  ;;  %v562_v34 = vsel %vm535_vm5, %v334_v1, %v561_v27 }
  0x41   :  { %v574_v2 = vmax.f32 %v3526_v26, 0.0  ;;  %v275_v31 = vadd.f32 %v274_v24, %v273_v14  ;;  %v295_v38 = vrot.slane %v294_v25, 4  ;;  %v563_v39 = vsel %vm537_vm6, %v335_v7, %v562_v34 }
  0x42   :  { %v282_v43 = vadd.f32 %v281_v32, %v280_v17  ;;  %v289_v44 = vadd.f32 %v288_v33, %v287_v18  ;;  %v301_v45 = vadd.f32 %v210_v22, %v209_v21  ;;  %v3533_v47 = vsel %vm539_vm7, %v336_v8, %v563_v39 }
  0x43   :  { %v276_v48 = vrot.slane %v275_v31, 2  ;;  %v296_v49 = vadd.f32 %v295_v38, %v294_v25  ;;  %v308_v50 = vadd.f32 %v212_v29, %v211_v28  ;;  %v575_v51 = vmax.f32 %v3533_v47, 0.0  ;;  %v3012_v38 = vld [vmem:[%s4400_s2] ss:$0 sm:$0xff]  ;;  %s3344_s2 = smov 112  }
  0x44   :  { %v283_v52 = vrot.slane %v282_v43, 2  ;;  %v290_v55 = vrot.slane %v289_v44, 2  ;;  %v302_v56 = vrot.slane %v301_v45, 4  ;;  %v315_v62 = vadd.f32 %v214_v42, %v213_v40 }
  0x45   :  { %v277_v59 = vadd.f32 %v276_v48, %v275_v31  ;;  %v297_v60 = vrot.slane %v296_v49, 2  ;;  %v309_v61 = vrot.slane %v308_v50, 4  ;;  %v577_v63 = vpack.c.bf16 %v575_v51, %v574_v2 }
  0x46   :  { %v284_v1 = vadd.f32 %v283_v52, %v282_v43  ;;  %v291_v3 = vadd.f32 %v290_v55, %v289_v44  ;;  %v303_v4 = vadd.f32 %v302_v56, %v301_v45  ;;  %v316_v8 = vrot.slane %v315_v62, 4 }
  0x47   :  { %v278_v5 = vrot.slane %v277_v59, 1  ;;  %v298_v6 = vadd.f32 %v297_v60, %v296_v49  ;;  %v310_v7 = vadd.f32 %v309_v61, %v308_v50  ;;  %635 = vmatmul.bf16.vlgmr.msra.gmra.mxu0 %v577_v63  ;;  %v322_v12 = vadd.f32 %v216_v58, %v215_v57 }
  0x48   :  { %v285_v9 = vrot.slane %v284_v1, 1  ;;  %v292_v10 = vrot.slane %v291_v3, 1  ;;  %v304_v11 = vrot.slane %v303_v4, 2  ;;  %v317_v16 = vadd.f32 %v316_v8, %v315_v62 }
  0x49   :  { %v279_v13 = vadd.f32 %v278_v5, %v277_v59  ;;  %v299_v14 = vrot.slane %v298_v6, 1  ;;  %v311_v15 = vrot.slane %v310_v7, 2  ;;  %v323_v20 = vrot.slane %v322_v12, 4 }
  0x4a   :  { %v286_v17 = vadd.f32 %v285_v9, %v284_v1  ;;  %v293_v18 = vadd.f32 %v292_v10, %v291_v3  ;;  %v305_v19 = vadd.f32 %v304_v11, %v303_v4  ;;  %v318_v24 = vrot.slane %v317_v16, 2 }
  0x4b   :  { %v300_v21 = vadd.f32 %v299_v14, %v298_v6  ;;  %v312_v22 = vadd.f32 %v311_v15, %v310_v7  ;;  %v337_v25 = vmul.f32 %v279_v13, %v3462_v23  ;;  %v324_v28 = vadd.f32 %v323_v20, %v322_v12 }
  0x4c   :  { %v306_v27 = vrot.slane %v305_v19, 1  ;;  %v338_v29 = vmul.f32 %v286_v17, %v3462_v23  ;;  %v339_v32 = vmul.f32 %v293_v18, %v3462_v23  ;;  %v319_v34 = vadd.f32 %v318_v24, %v317_v16 }
  0x4d   :  { %v313_v33 = vrot.slane %v312_v22, 1  ;;  %v340_v2 = vmul.f32 %v300_v21, %v3462_v23  ;;  %v350_v31 = vlaneseq  ;;  %v325_v40 = vrot.slane %v324_v28, 2 }
  0x4e   :  { %v307_v39 = vadd.f32 %v306_v27, %v305_v19  ;;  %v565_v42 = vsel %vm527_vm1, %v338_v29, %v337_v25  ;;  %v320_v44 = vrot.slane %v319_v34, 1  ;;  %v3343_v58 = vmov 0.0  }
  0x4f   :  { %v314_v43 = vadd.f32 %v313_v33, %v312_v22  ;;  %v566_v45 = vsel %vm529_vm2, %v339_v32, %v565_v42  ;;  %v351_v48 = vshrl.u32 %v350_v31, 7  ;;  %v326_v49 = vadd.f32 %v325_v40, %v324_v28 }
  0x50   :  { %v341_v50 = vmul.f32 %v307_v39, %v3462_v23  ;;  %v567_v51 = vsel %vm531_vm3, %v340_v2, %v566_v45  ;;  %v321_v52 = vadd.f32 %v320_v44, %v319_v34  ;;  %v906_v6 = vpack.c.bf16 %v3465_v30, %v3465_v30 }
  0x51   :  { %v342_v55 = vmul.f32 %v314_v43, %v3462_v23  ;;  %vm355_vm8 = vcmp.eq.s32.totalorder %v351_v48, %v3012_v38  ;;  %v327_v56 = vrot.slane %v326_v49, 1  ;;  %v907_v7 = vpack.c.bf16 %v3474_v35, %v3474_v35 }
  0x52   :  { %v568_v57 = vsel %vm533_vm4, %v341_v50, %v567_v51  ;;  %v3549_v59 = vsel %vm355_vm8, 1.0, %v3343_v58  ;;  %v343_v60 = vmul.f32 %v321_v52, %v3462_v23  ;;  %v908_v8 = vpack.c.bf16 %v3477_v36, %v3477_v36  ;;  %v3013_v50 = vld [vmem:[%s4405_s7 + $0x2] ss:$0 sm:$0xff] }
  0x53   :  { %v569_v61 = vsel %vm535_vm5, %v342_v55, %v568_v57  ;;  %390 = vrot.lane.b32.xlu0 %v3549_v59, %s3344_s2  ;;  %v328_v62 = vadd.f32 %v327_v56, %v326_v49  ;;  %v909_v9 = vpack.c.bf16 %v3480_v37, %v3480_v37  ;;  %v911_v10 = vpack.c.bf16 %v3486_v46, %v3486_v46 }
  0x54   :  { %v570_v63 = vsel %vm537_vm6, %v343_v60, %v569_v61  ;;  %v912_v11 = vpack.c.bf16 %v3489_v53, %v3489_v53  ;;  %v913_v30 = vpack.c.bf16 %v3492_v54, %v3492_v54  ;;  %v922_v12 = vunpack.c.l.b16 %v906_v6 }
  0x55   :  { %v344_v1 = vmul.f32 %v328_v62, %v3462_v23  ;;  %v910_v23 = vpack.c.bf16 %v3483_v41, %v3483_v41  ;;  %v923_v35 = vunpack.c.l.b16 %v907_v7  ;;  %v924_v13 = vunpack.c.l.b16 %v908_v8 }
  0x56   :  { %v925_v14 = vunpack.c.l.b16 %v909_v9  ;;  %v927_v15 = vunpack.c.l.b16 %v911_v10  ;;  %v928_v16 = vunpack.c.l.b16 %v912_v11  ;;  %v929_v17 = vunpack.c.l.b16 %v913_v30 }
  0x57   :  { %v3557_v3 = vsel %vm539_vm7, %v344_v1, %v570_v63  ;;  %v926_v36 = vunpack.c.l.b16 %v910_v23  ;;  %v930_v37 = vsel %vm527_vm1, %v923_v35, %v922_v12  ;;  %v3584_v24 = vand.u32 127, %v350_v31 }
  0x58   :  { %v576_v4 = vmax.f32 %v3557_v3, 0.0  ;;  %v931_v41 = vsel %vm529_vm2, %v924_v13, %v930_v37  ;;  %v385_v2 = vsel %vm384_vm14, %v3549_v59, 0.0 }
  0x59   :  { %v932_v46 = vsel %vm531_vm3, %v925_v14, %v931_v41  ;;  %386 = vadd.xlane.f32.xlu1 %v385_v2 }
  0x5a   :  { %v578_v5 = vpack.c.bf16 %v576_v4, %v576_v4  ;;  %v933_v18 = vsel %vm533_vm4, %v926_v36, %v932_v46 }
  0x5b   :  { %v934_v53 = vsel %vm535_vm5, %v927_v15, %v933_v18 }
  0x5c   :  { %640 = vmatmul.bf16.gmra.mxu0 %v578_v5  ;;  %v935_v54 = vsel %vm537_vm6, %v928_v16, %v934_v53 }
  0x5d   :  { %v936_v19 = vsel %vm539_vm7, %v929_v17, %v935_v54 }
  0x5e   :  { %v937_v20 = vpack.c.b16 %v936_v19, %v936_v19 }
  0x60   :  { %v939_v21 = vsel %vm653_vm9, %v937_v20, 0 }
  0x61   :  { %948 = vmatpush.bf16.msra.mxu3 %v939_v21 }
  0x8a   :  { %v360_v22 = vpop.permute.xlu0 %359 }
  0x8b   :  { %vm370_vm10 = vcmp.eq.s32.totalorder %v3584_v24, %v360_v22 }
  0x8c   :  { %v2455_v25 = vsel %vm370_vm10, 1.0, %v3343_v58 }
  0x92   :  { %v363_v27 = vpop.permute.xlu0 %362 }
  0x93   :  { %vm371_vm11 = vcmp.eq.s32.totalorder %v3584_v24, %v363_v27 }
  0x94   :  { %v2456_v28 = vsel %vm371_vm11, 1.0, %v3343_v58  ;;  %v366_v32 = vpop.permute.xlu1 %365 }
  0x95   :  { %v3588_v29 = vpack.c.bf16 %v2456_v28, %v2455_v25  ;;  %vm372_vm13 = vcmp.eq.s32.totalorder %v3584_v24, %v366_v32  ;;  %v4409_v32 = vmov 3  }
  0x96   :  { %v2457_v33 = vsel %vm372_vm13, 1.0, %v3343_v58  ;;  %3004 = vset.pattern.permute.xlu2 %v4409_v32  ;;  %3005 = vset.pattern.permute.xlu1 %v4409_v32 }
  0x97   :  { %2503 = vmatmul.msk.bf16.vlgmr.msra.gmra.mxu3 %vm646_vm12, %v3588_v29 }
  0x9c   :  { %v369_v34 = vpop.permute.xlu1 %368 }
  0x9d   :  { %vm373_vm15 = vcmp.eq.s32.totalorder %v3584_v24, %v369_v34 }
  0x9e   :  { %v2458_v31 = vsel %vm373_vm15, 1.0, %v3343_v58 }
  0x9f   :  { %v3596_v38 = vpack.c.bf16 %v2458_v31, %v2457_v33 }
  0xa1   :  { %4440 = vst [vmem:[#allocation19_spill] sm:$0xff] %v3596_v38 }
  0xa7   :  { %2504 = vmatmul.msk.bf16.gmra.mxu3 %vm646_vm12, %v3596_v38 }
  0xc4   :  { %v636_v39 = vpop.f32.mrf.mxu0 }
  0xc5   :  { %v645_v40 = vpack.c.bf16 %v636_v39, %v636_v39  ;;  %v391_v48 = vpop.permute.xlu0 %390 }
  0xc6   :  { %v393_v49 = vsel %vm384_vm14, %v391_v48, 0.0 }
  0xc7   :  { %v655_v42 = vsel %vm653_vm9, %v645_v40, 0 }
  0xc8   :  { %664 = vmatpush.bf16.msra.mxu1 %v655_v42 }
  0xcb   :  { %2492 = vmatmul.msk.bf16.vlgmr.msra.gmra.mxu1 %vm646_vm12, %v3588_v29 }
  0xcc   :  { %v3603_v43 = vpop.f32.mrf.mxu0  ;;  %v3627_v21 = vpop.xlane.xlu1 %386 }
  0xcd   :  { %678 = vrot.lane.b32.xlu2 %v3603_v43, %s3345_s18 }
  0xd9   :  { %v641_v44 = vpop.f32.mrf.mxu0 }
  0xda   :  { %680 = vrot.lane.b32.xlu2 %v641_v44, %s3345_s18  ;;  %771 = vrot.lane.b32.xlu1 %v641_v44, %s3346_s19 }
  0xdb   :  { %2493 = vmatmul.msk.bf16.gmra.mxu1 %vm646_vm12, %v3596_v38  ;;  %v2891_v38 = vld [vmem:[#allocation7 + $0xc] sm:$0xf] }
  0xe1   :  { %v643_v45 = vpop.f32.mrf.mxu0 }
 0x103   :  { %394 = vadd.xlane.f32.xlu2 %v393_v49 }
 0x11b   :  { %780 = vrot.lane.b32.xlu2 %v3013_v50, %s3347_s24  ;;  %s2415_s24 = sshll.u32 %s3349_s23, 4  ;;  %s2416_s24 = int_to_ptr.vmem [resolvable:$true] %s2415_s24 }
 0x127   :  { %v679_v51 = vpop.permute.xlu2 %678 }
 0x134   :  { %v681_v58 = vpop.permute.xlu2 %680 }
 0x148   :  { %v3615_v52 = vpop.f32.mrf.mxu1 }
 0x149   :  { %v684_v55 = vadd.f32 %v679_v51, %v3615_v52 }
 0x14b   :  { %v689_v56 = vadd.f32 %v3013_v50, %v684_v55 }
 0x14c   :  { %v772_v49 = vpop.permute.xlu1 %771 }
 0x14d   :  { %v2494_v57 = vmul.f32 -1.442695, %v689_v56 }
 0x14f   :  { %3016 = vpow2.f32 %v2494_v57 }
 0x150   :  { %v3618_v60 = vpop.f32.mrf.mxu1 }
 0x151   :  { %v685_v61 = vadd.f32 %v681_v58, %v3618_v60 }
 0x153   :  { %v690_v1 = vadd.f32 %v3013_v50, %v685_v61 }
 0x155   :  { %v3017_v62 = vpop.eup %3016  ;;  %v2495_v6 = vmul.f32 -1.442695, %v690_v1 }
 0x156   :  { %v705_v63 = vadd.f32 1.0, %v3017_v62 }
 0x158   :  { %3018 = vrcp.f32 %v705_v63  ;;  %v3621_v4 = vpop.f32.mrf.mxu1  ;;  %v720_v12 = vand.u32 2147483648, %v705_v63  ;;  %v718_v14 = vand.u32 2147483647, %v705_v63  ;;  %vm714_vm1 = vweird.f32 %v705_v63 }
 0x159   :  { %v686_v5 = vadd.f32 %v679_v51, %v3621_v4  ;;  %3020 = vpow2.f32 %v2495_v6 }
 0x15a   :  { %v721_v17 = vor.u32 1.1754944e-38, %v720_v12  ;;  %vm719_vm3 = vcmp.eq.f32.partialorder %v718_v14, 8.507059e+37 }
 0x15b   :  { %v691_v7 = vadd.f32 %v3013_v50, %v686_v5 }
 0x15d   :  { %v2496_v8 = vmul.f32 -1.442695, %v691_v7 }
 0x15e   :  { %v3019_v9 = vpop.eup %3018 }
 0x15f   :  { %3022 = vpow2.f32 %v2496_v8  ;;  %v710_v23 = vmul.f32 %v3019_v9, %v705_v63  ;;  %vm715_vm0 = vweird.f32 %v3019_v9  ;;  %v3021_v36 = vpop.eup %3020 }
 0x160   :  { %v673_v10 = vpop.f32.mrf.mxu1  ;;  %vm716_vm2 = vmor %vm714_vm1, %vm715_vm0  ;;  %v3624_v18 = vadd.f32 1.0, %v3021_v36 }
 0x161   :  { %v687_v11 = vadd.f32 %v681_v58, %v673_v10  ;;  %v711_v30 = vsub.f32 1.0, %v710_v23  ;;  %v776_v58 = vadd.f32 %v772_v49, %v3618_v60  ;;  %v778_v61 = vadd.f32 %v772_v49, %v673_v10 }
 0x162   :  { %v735_v10 = vand.u32 2147483648, %v3624_v18  ;;  %vm729_vm15 = vweird.f32 %v3624_v18 }
 0x163   :  { %v692_v35 = vadd.f32 %v3013_v50, %v687_v11  ;;  %v712_v13 = vmul.f32 %v3019_v9, %v711_v30  ;;  %v733_v30 = vand.u32 2147483647, %v3624_v18 }
 0x165   :  { %v3023_v15 = vpop.eup %3022  ;;  %v2497_v37 = vmul.f32 -1.442695, %v692_v35  ;;  %v713_v16 = vadd.f32 %v3019_v9, %v712_v13  ;;  %v736_v35 = vor.u32 1.1754944e-38, %v735_v10  ;;  %vm734_vm1 = vcmp.eq.f32.partialorder %v733_v30, 8.507059e+37  ;;  %v2952_v10 = vld [vmem:[#allocation7 + $0x1ec] sm:$0xf0] }
 0x166   :  { %v707_v41 = vadd.f32 1.0, %v3023_v15  ;;  %v2619_v30 = vld [vmem:[#allocation7 + $0xe0] sm:$0xf] }
 0x167   :  { %3024 = vpow2.f32 %v2497_v37  ;;  %v717_v46 = vsel %vm716_vm2, %v3019_v9, %v713_v16 }
 0x168   :  { %3026 = vrcp.f32 %v707_v41  ;;  %v722_v53 = vsel %vm719_vm3, %v721_v17, %v717_v46  ;;  %v750_v28 = vand.u32 2147483648, %v707_v41  ;;  %v748_v34 = vand.u32 2147483647, %v707_v41 }
 0x169   :  { %865 = vperm.xlu0 %3001, %v722_v53   ;;  %3028 = vrcp.f32 %v3624_v18  ;;  %vm744_vm5 = vweird.f32 %v707_v41 }
 0x16a   :  { %v751_v42 = vor.u32 1.1754944e-38, %v750_v28  ;;  %vm749_vm7 = vcmp.eq.f32.partialorder %v748_v34, 8.507059e+37 }
 0x16d   :  { %v3025_v54 = vpop.eup %3024 }
 0x16e   :  { %v3027_v19 = vpop.eup %3026  ;;  %v708_v20 = vadd.f32 1.0, %v3025_v54 }
 0x16f   :  { %v740_v22 = vmul.f32 %v3027_v19, %v707_v41  ;;  %v3029_v27 = vpop.eup %3028  ;;  %vm745_vm4 = vweird.f32 %v3027_v19 }
 0x170   :  { %3030 = vrcp.f32 %v708_v20  ;;  %v725_v31 = vmul.f32 %v3029_v27, %v3624_v18  ;;  %vm746_vm6 = vmor %vm744_vm5, %vm745_vm4  ;;  %v765_v55 = vand.u32 2147483648, %v708_v20  ;;  %v763_v57 = vand.u32 2147483647, %v708_v20 }
 0x171   :  { %v741_v25 = vsub.f32 1.0, %v740_v22  ;;  %vm759_vm10 = vweird.f32 %v708_v20  ;;  %vm730_vm14 = vweird.f32 %v3029_v27 }
 0x172   :  { %v726_v51 = vsub.f32 1.0, %v725_v31  ;;  %v766_v5 = vor.u32 1.1754944e-38, %v765_v55  ;;  %vm764_vm13 = vcmp.eq.f32.partialorder %v763_v57, 8.507059e+37  ;;  %vm731_vm0 = vmor %vm729_vm15, %vm730_vm14 }
 0x173   :  { %v742_v33 = vmul.f32 %v3027_v19, %v741_v25 }
 0x174   :  { %v727_v63 = vmul.f32 %v3029_v27, %v726_v51 }
 0x175   :  { %v743_v2 = vadd.f32 %v3027_v19, %v742_v33 }
 0x176   :  { %v3031_v39 = vpop.eup %3030  ;;  %v3632_v40 = vpop.xlane.xlu2 %394  ;;  %v728_v23 = vadd.f32 %v3029_v27, %v727_v63 }
 0x177   :  { %v747_v44 = vsel %vm746_vm6, %v3027_v19, %v743_v2  ;;  %v755_v45 = vmul.f32 %v3031_v39, %v708_v20  ;;  %vm760_vm8 = vweird.f32 %v3031_v39 }
 0x178   :  { %v752_v48 = vsel %vm749_vm7, %v751_v42, %v747_v44  ;;  %vm761_vm11 = vmor %vm759_vm10, %vm760_vm8  ;;  %v732_v12 = vsel %vm731_vm0, %v3029_v27, %v728_v23  ;;  %v388_v44 = vmax.f32 %v3627_v21, 1.0 }
 0x179   :  { %875 = vperm.xlu0 %3001, %v752_v48   ;;  %v756_v50 = vsub.f32 1.0, %v755_v45  ;;  %v737_v13 = vsel %vm734_vm1, %v736_v35, %v732_v12  ;;  %v396_v45 = vmax.f32 %v3632_v40, 1.0  ;;  %v2920_v35 = vld [vmem:[#allocation7 + $0xec] sm:$0xf0] }
 0x17b   :  { %v757_v56 = vmul.f32 %v3031_v39, %v756_v50 }
 0x17d   :  { %v758_v62 = vadd.f32 %v3031_v39, %v757_v56 }
 0x17e   :  { %v3635_v1 = vpop.permute.xlu2 %780 }
 0x17f   :  { %4441 = vst [vmem:[#allocation20_spill] sm:$0xff] %v3635_v1  ;;  %v762_v6 = vsel %vm761_vm11, %v3031_v39, %v758_v62  ;;  %v786_v7 = vadd.f32 %v3635_v1, %v778_v61  ;;  %v784_v8 = vadd.f32 %v3635_v1, %v776_v58  ;;  %vm399_vm11 = vcmp.lt.s32.totalorder %v3584_v24, 16 }
 0x180   :  { %v767_v9 = vsel %vm764_vm13, %v766_v5, %v762_v6  ;;  %vm889_vm13 = vcmask 261120  }
 0x181   :  { %880 = vperm.xlu0 %3001, %v767_v9   ;;  %v2501_v11 = vmul.f32 -1.442695, %v786_v7  ;;  %v2499_v60 = vmul.f32 -1.442695, %v784_v8 }
 0x183   :  { %3032 = vpow2.f32 %v2501_v11 }
 0x184   :  { %3034 = vpow2.f32 %v2499_v60  ;;  %v2747_v60 = vld [vmem:[#allocation7 + $0x1e0] sm:$0xf] }
 0x185   :  { %v3663_v12 = vor.u32 %v2952_v10, %v2747_v60  ;;  %v2910_v10 = vld [vmem:[#allocation7 + $0xa4] sm:$0xf] }
 0x187   :  { %1337 = vmatpush.bf16.msrb.mxu3 %v3663_v12 }
 0x189   :  { %v3033_v14 = vpop.eup %3032  ;;  %870 = vperm.xlu0 %3001, %v737_v13   ;;  %v2731_v13 = vld [vmem:[#allocation7 + $0x1c0] sm:$0xf] }
 0x18a   :  { %v3035_v36 = vpop.eup %3034  ;;  %v802_v15 = vadd.f32 1.0, %v3033_v14  ;;  %v2948_v14 = vld [vmem:[#allocation7 + $0x1cc] sm:$0xf0] }
 0x18b   :  { %v800_v37 = vadd.f32 1.0, %v3035_v36  ;;  %v3665_v36 = vor.u32 %v2920_v35, %v2619_v30  ;;  %v2589_v30 = vld [vmem:[#allocation7 + $0xb0] sm:$0xf0]  ;;  %v2942_v35 = vld [vmem:[#allocation7 + $0x1a4] sm:$0xf] }
 0x18c   :  { %3036 = vrcp.f32 %v802_v15  ;;  %v859_v53 = vand.u32 2147483648, %v802_v15  ;;  %v857_v20 = vand.u32 2147483647, %v802_v15  ;;  %vm853_vm4 = vweird.f32 %v802_v15 }
 0x18d   :  { %3038 = vrcp.f32 %v800_v37  ;;  %v829_v22 = vand.u32 2147483648, %v800_v37  ;;  %v827_v27 = vand.u32 2147483647, %v800_v37  ;;  %vm823_vm6 = vweird.f32 %v800_v37  ;;  %1319 = vmatpush.bf16.msrb.mxu1 %v3665_v36 }
 0x18e   :  { %vm858_vm7 = vcmp.eq.f32.partialorder %v857_v20, 8.507059e+37  ;;  %3040 = vrcp.f32 %v388_v44 }
 0x18f   :  { %v830_v2 = vor.u32 1.1754944e-38, %v829_v22  ;;  %vm828_vm10 = vcmp.eq.f32.partialorder %v827_v27, 8.507059e+37  ;;  %3042 = vrcp.f32 %v396_v45 }
 0x191   :  { %769 = vrot.lane.b32.xlu0 %v3603_v43, %s3346_s19  ;;  %v860_v43 = vor.u32 1.1754944e-38, %v859_v53 }
 0x192   :  { %v3037_v16 = vpop.eup %3036  ;;  %3003 = vset.pattern.permute.xlu0 %v4409_v32  ;;  %v2941_v32 = vld [vmem:[#allocation7 + $0x194] sm:$0xf0] }
 0x193   :  { %v3039_v41 = vpop.eup %3038  ;;  %v849_v17 = vmul.f32 %v3037_v16, %v802_v15  ;;  %vm854_vm2 = vweird.f32 %v3037_v16  ;;  %v2950_v15 = vld [vmem:[#allocation7 + $0x1e4] sm:$0xf] }
 0x194   :  { %v819_v46 = vmul.f32 %v3039_v41, %v800_v37  ;;  %vm824_vm3 = vweird.f32 %v3039_v41  ;;  %vm855_vm5 = vmor %vm853_vm4, %vm854_vm2  ;;  %v3041_v48 = vpop.eup %3040  ;;  %v3668_v37 = vor.u32 %v2948_v14, %v2731_v13  ;;  %v3695_v13 = vor.u32 %v2910_v10, %v2589_v30  ;;  %v2717_v14 = vld [vmem:[#allocation7 + $0x1b0] sm:$0xf0]  ;;  %v2924_v10 = vld [vmem:[#allocation7 + $0x10c] sm:$0xf0] }
 0x195   :  { %v850_v18 = vsub.f32 1.0, %v849_v17  ;;  %vm825_vm8 = vmor %vm823_vm6, %vm824_vm3  ;;  %v3043_v49 = vpop.eup %3042 }
 0x196   :  { %v820_v54 = vsub.f32 1.0, %v819_v46  ;;  %v400_v51 = vsel %vm399_vm11, %v3041_v48, %v3043_v49  ;;  %1338 = vmatpush.bf16.msrb.mxu3 %v3668_v37 }
 0x197   :  { %v851_v19 = vmul.f32 %v3037_v16, %v850_v18  ;;  %v401_v21 = vmul.f32 %v3549_v59, %v400_v51 }
 0x198   :  { %v821_v25 = vmul.f32 %v3039_v41, %v820_v54 }
 0x199   :  { %v852_v28 = vadd.f32 %v3037_v16, %v851_v19  ;;  %v3655_v6 = vpack.c.bf16 %v401_v21, %v401_v21  ;;  %v2914_v21 = vld [vmem:[#allocation7 + $0xc4] sm:$0xf] }
 0x19a   :  { %v822_v33 = vadd.f32 %v3039_v41, %v821_v25 }
 0x19b   :  { %v856_v34 = vsel %vm855_vm5, %v3037_v16, %v852_v28  ;;  %4442 = vst [vmem:[#allocation21_spill] sm:$0xff] %v3655_v6 }
 0x19c   :  { %v861_v31 = vsel %vm858_vm7, %v860_v43, %v856_v34  ;;  %v826_v39 = vsel %vm825_vm8, %v3039_v41, %v822_v33  ;;  %v2749_v41 = vld [vmem:[#allocation7 + $0x1f0] sm:$0xf0] }
 0x19d   :  { %977 = vperm.xlu1 %3005, %v861_v31   ;;  %v831_v42 = vsel %vm828_vm10, %v830_v2, %v826_v39  ;;  %v3673_v46 = vor.u32 %v2950_v15, %v2749_v41  ;;  %v2908_v15 = vld [vmem:[#allocation7 + $0x8c] sm:$0xf0]  ;;  %v2683_v41 = vld [vmem:[#allocation7 + $0x160] sm:$0xf] }
 0x19e   :  { %967 = vperm.xlu2 %3004, %v831_v42  }
 0x19f   :  { %4443 = vst [vmem:[#allocation22_spill] sm:$0xff] %v3673_v46  ;;  %1373 = vmatpush.bf16.msrb.mxu0 %v3673_v46 }
 0x1a5   :  { %3006 = vset.pattern.permute.xlu1 %v3341_v0 }
 0x1a6   :  { %3008 = vset.pattern.permute.xlu2 %v3341_v0 }
 0x1db   :  { %v866_v50 = vpop.permute.xlu0 %865 }
 0x1dc   :  { %v883_v40 = vmul.f32 %v866_v50, %v3533_v47 }
 0x1eb   :  { %v876_v55 = vpop.permute.xlu0 %875 }
 0x1ec   :  { %v885_v57 = vmul.f32 %v876_v55, %v3533_v47 }
 0x1f3   :  { %v881_v56 = vpop.permute.xlu0 %880 }
 0x1f4   :  { %v886_v58 = vmul.f32 %v881_v56, %v3557_v3  ;;  %v2603_v56 = vld [vmem:[#allocation7 + $0xc0] sm:$0xf] }
 0x1f6   :  { %v888_v61 = vpack.c.bf16 %v886_v58, %v885_v57  ;;  %v2916_v57 = vld [vmem:[#allocation7 + $0xcc] sm:$0xf0]  ;;  %v2715_v58 = vld [vmem:[#allocation7 + $0x1a0] sm:$0xf] }
 0x1f8   :  { %899 = vmatpush.bf16.msra.mxu2 %v888_v61  ;;  %v3679_v61 = vor.u32 %v2916_v57, %v2603_v56  ;;  %v2928_v57 = vld [vmem:[#allocation7 + $0x12c] sm:$0xf0] }
 0x1fa   :  { %1320 = vmatpush.bf16.msrb.mxu1 %v3679_v61 }
 0x1fb   :  { %v871_v62 = vpop.permute.xlu0 %870 }
 0x1fc   :  { %v884_v63 = vmul.f32 %v871_v62, %v3557_v3  ;;  %v2944_v62 = vld [vmem:[#allocation7 + $0x1ac] sm:$0xf0] }
 0x1fe   :  { %v887_v5 = vpack.c.bf16 %v884_v63, %v883_v40  ;;  %v2605_v40 = vld [vmem:[#allocation7 + $0xd0] sm:$0xf0]  ;;  %v3681_v63 = vor.u32 %v2944_v62, %v2715_v58  ;;  %v2898_v58 = vld [vmem:[#allocation7 + $0x44] sm:$0xf] }
 0x1ff   :  { %v2541_v62 = vld [vmem:[#allocation7 + $0x50] sm:$0xf0] }
 0x200   :  { %900 = vmatpush.bf16.msra.mxu2 %v887_v5  ;;  %v3683_v5 = vor.u32 %v2914_v21, %v2605_v40  ;;  %1339 = vmatpush.bf16.msrb.mxu3 %v3681_v63  ;;  %v3731_v40 = vor.u32 %v2898_v58, %v2541_v62  ;;  %v2921_v58 = vld [vmem:[#allocation7 + $0xf4] sm:$0xf0]  ;;  %v2739_v62 = vld [vmem:[#allocation7 + $0x1c8] sm:$0xf] }
 0x202   :  { %4450 = vst [vmem:[#allocation29_spill] sm:$0xff] %v3731_v40 }
 0x203   :  { %v770_v24 = vpop.permute.xlu0 %769  ;;  %2502 = vmatmul.msk.bf16.vlgmr.msra.gmra.mxu2 %vm889_vm13, %v3655_v6  ;;  %v2901_v6 = vld [vmem:[#allocation7 + $0x54] sm:$0xf0] }
 0x204   :  { %v775_v7 = vadd.f32 %v770_v24, %v3615_v52  ;;  %v777_v8 = vadd.f32 %v770_v24, %v3621_v4  ;;  %v2918_v52 = vld [vmem:[#allocation7 + $0xe4] sm:$0xf]  ;;  %v2621_v4 = vld [vmem:[#allocation7 + $0xf0] sm:$0xf0] }
 0x205   :  { %v3670_v16 = vor.u32 %v2918_v52, %v2621_v4  ;;  %v2946_v24 = vld [vmem:[#allocation7 + $0x1c4] sm:$0xf]  ;;  %v3697_v52 = vor.u32 %v2942_v35, %v2717_v14  ;;  %v2571_v4 = vld [vmem:[#allocation7 + $0x80] sm:$0xf] }
 0x206   :  { %v783_v9 = vadd.f32 %v3635_v1, %v775_v7  ;;  %v785_v59 = vadd.f32 %v3635_v1, %v777_v8  ;;  %v2733_v7 = vld [vmem:[#allocation7 + $0x1d0] sm:$0xf0]  ;;  %v2587_v8 = vld [vmem:[#allocation7 + $0xa0] sm:$0xf]  ;;  %v2894_v14 = vld [vmem:[#allocation7 + $0x24] sm:$0xf] }
 0x207   :  { %1355 = vmatpush.bf16.msrb.mxu2 %v3670_v16  ;;  %4445 = vst [vmem:[#allocation24_spill] sm:$0xff] %v3697_v52  ;;  %v2659_v1 = vld [vmem:[#allocation7 + $0x128] sm:$0xf] }
 0x208   :  { %v2498_v23 = vmul.f32 -1.442695, %v783_v9  ;;  %v2500_v11 = vmul.f32 -1.442695, %v785_v59  ;;  %v3686_v9 = vor.u32 %v2946_v24, %v2733_v7  ;;  %v2699_v59 = vld [vmem:[#allocation7 + $0x180] sm:$0xf] }
 0x209   :  { %v2930_v24 = vld [vmem:[#allocation7 + $0x144] sm:$0xf]  ;;  %v2669_v7 = vld [vmem:[#allocation7 + $0x150] sm:$0xf0] }
 0x20a   :  { %3044 = vpow2.f32 %v2498_v23  ;;  %4444 = vst [vmem:[#allocation23_spill] sm:$0xff] %v3686_v9  ;;  %v2940_v23 = vld [vmem:[#allocation7 + $0x18c] sm:$0xf0]  ;;  %1374 = vmatpush.bf16.msrb.mxu0 %v3686_v9 }
 0x20b   :  { %3046 = vpow2.f32 %v2500_v11  ;;  %1356 = vmatpush.bf16.msrb.mxu2 %v3683_v5  ;;  %v3692_v60 = vor.u32 %v2940_v23, %v2699_v59  ;;  %v2896_v59 = vld [vmem:[#allocation7 + $0x2c] sm:$0xf0]  ;;  %v2635_v23 = vld [vmem:[#allocation7 + $0x100] sm:$0xf] }
 0x20c   :  { %v3740_v35 = vor.u32 %v2924_v10, %v2635_v23  ;;  %v2951_v23 = vld [vmem:[#allocation7 + $0x1ec] sm:$0xf] }
 0x20d   :  { %1340 = vmatpush.bf16.msrb.mxu3 %v3692_v60 }
 0x20e   :  { %1375 = vmatpush.bf16.msrb.mxu0 %v3697_v52  ;;  %v2547_v52 = vld [vmem:[#allocation7 + $0x48] sm:$0xf] }
 0x20f   :  { %1357 = vmatpush.bf16.msrb.mxu2 %v3695_v13 }
 0x210   :  { %v3045_v17 = vpop.eup %3044 }
 0x211   :  { %v3047_v18 = vpop.eup %3046  ;;  %v799_v53 = vadd.f32 1.0, %v3045_v17  ;;  %v3703_v17 = vor.u32 %v2908_v15, %v2571_v4  ;;  %v2525_v4 = vld [vmem:[#allocation7 + $0x30] sm:$0xf0]  ;;  %v2926_v15 = vld [vmem:[#allocation7 + $0x124] sm:$0xf] }
 0x212   :  { %v801_v54 = vadd.f32 1.0, %v3047_v18  ;;  %v2936_v18 = vld [vmem:[#allocation7 + $0x16c] sm:$0xf0] }
 0x213   :  { %3048 = vrcp.f32 %v799_v53  ;;  %v814_v28 = vand.u32 2147483648, %v799_v53  ;;  %v812_v34 = vand.u32 2147483647, %v799_v53  ;;  %vm808_vm15 = vweird.f32 %v799_v53 }
 0x214   :  { %3050 = vrcp.f32 %v801_v54  ;;  %v844_v48 = vand.u32 2147483648, %v801_v54  ;;  %vm838_vm3 = vweird.f32 %v801_v54  ;;  %v842_v49 = vand.u32 2147483647, %v801_v54 }
 0x215   :  { %v815_v39 = vor.u32 1.1754944e-38, %v814_v28  ;;  %vm813_vm1 = vcmp.eq.f32.partialorder %v812_v34, 8.507059e+37  ;;  %v2932_v34 = vld [vmem:[#allocation7 + $0x14c] sm:$0xf0] }
 0x216   :  { %v845_v51 = vor.u32 1.1754944e-38, %v844_v48  ;;  %vm843_vm5 = vcmp.eq.f32.partialorder %v842_v49, 8.507059e+37  ;;  %v2685_v48 = vld [vmem:[#allocation7 + $0x170] sm:$0xf0] }
 0x219   :  { %v3049_v19 = vpop.eup %3048 }
 0x21a   :  { %v3051_v20 = vpop.eup %3050  ;;  %v804_v22 = vmul.f32 %v3049_v19, %v799_v53  ;;  %vm809_vm14 = vweird.f32 %v3049_v19  ;;  %v2906_v53 = vld [vmem:[#allocation7 + $0x84] sm:$0xf] }
 0x21b   :  { %v834_v25 = vmul.f32 %v3051_v20, %v801_v54  ;;  %vm810_vm0 = vmor %vm808_vm15, %vm809_vm14  ;;  %vm839_vm2 = vweird.f32 %v3051_v20  ;;  %v2573_v54 = vld [vmem:[#allocation7 + $0x90] sm:$0xf0] }
 0x21c   :  { %v805_v27 = vsub.f32 1.0, %v804_v22  ;;  %vm840_vm4 = vmor %vm838_vm3, %vm839_vm2  ;;  %v2938_v22 = vld [vmem:[#allocation7 + $0x184] sm:$0xf] }
 0x21d   :  { %v835_v43 = vsub.f32 1.0, %v834_v25  ;;  %v2701_v25 = vld [vmem:[#allocation7 + $0x190] sm:$0xf0] }
 0x21e   :  { %v806_v33 = vmul.f32 %v3049_v19, %v805_v27  ;;  %v2555_v27 = vld [vmem:[#allocation7 + $0x60] sm:$0xf]  ;;  %v3710_v28 = vor.u32 %v2938_v22, %v2701_v25  ;;  %v2892_v25 = vld [vmem:[#allocation7 + $0xc] sm:$0xf0] }
 0x21f   :  { %v836_v31 = vmul.f32 %v3051_v20, %v835_v43  ;;  %v2904_v43 = vld [vmem:[#allocation7 + $0x6c] sm:$0xf0]  ;;  %v2507_v22 = vld [vmem:[#allocation7] sm:$0xf] }
 0x220   :  { %v807_v2 = vadd.f32 %v3049_v19, %v806_v33  ;;  %4447 = vst [vmem:[#allocation26_spill] sm:$0xff] %v3710_v28  ;;  %v2667_v33 = vld [vmem:[#allocation7 + $0x140] sm:$0xf]  ;;  %1376 = vmatpush.bf16.msrb.mxu0 %v3710_v28 }
 0x221   :  { %v837_v45 = vadd.f32 %v3051_v20, %v836_v31  ;;  %v3716_v31 = vor.u32 %v2932_v34, %v2667_v33  ;;  %v2509_v33 = vld [vmem:[#allocation7 + $0x10] sm:$0xf0]  ;;  %v2922_v34 = vld [vmem:[#allocation7 + $0x104] sm:$0xf] }
 0x222   :  { %v811_v42 = vsel %vm810_vm0, %v3049_v19, %v807_v2  ;;  %v3705_v19 = vor.u32 %v2936_v18, %v2683_v41  ;;  %v3714_v2 = vor.u32 %v2904_v43, %v2555_v27  ;;  %v3743_v41 = vor.u32 %v2894_v14, %v2525_v4  ;;  %v2653_v18 = vld [vmem:[#allocation7 + $0x130] sm:$0xf0]  ;;  %v2890_v27 = vld [vmem:[#allocation7 + $0x4] sm:$0xf]  ;;  %v2757_v4 = vld [vmem:[#allocation7 + $0x1f8] sm:$0xf0] }
 0x223   :  { %v816_v44 = vsel %vm813_vm1, %v815_v39, %v811_v42  ;;  %v841_v50 = vsel %vm840_vm4, %v3051_v20, %v837_v45  ;;  %v3707_v20 = vor.u32 %v2906_v53, %v2573_v54  ;;  %v2902_v39 = vld [vmem:[#allocation7 + $0x64] sm:$0xf]  ;;  %v2557_v42 = vld [vmem:[#allocation7 + $0x70] sm:$0xf0]  ;;  %v3745_v53 = vor.u32 %v2926_v15, %v2653_v18  ;;  %v2611_v15 = vld [vmem:[#allocation7 + $0xc8] sm:$0xf] }
 0x224   :  { %962 = vperm.xlu0 %3003, %v816_v44   ;;  %v846_v55 = vsel %vm843_vm5, %v845_v51, %v841_v50  ;;  %1341 = vmatpush.bf16.msrb.mxu3 %v3705_v19  ;;  %v2934_v44 = vld [vmem:[#allocation7 + $0x164] sm:$0xf]  ;;  %v3719_v45 = vor.u32 %v2902_v39, %v2557_v42  ;;  %v2539_v50 = vld [vmem:[#allocation7 + $0x40] sm:$0xf]  ;;  %v2900_v51 = vld [vmem:[#allocation7 + $0x4c] sm:$0xf0]  ;;  %v3753_v54 = vpack.c.bf16 %v3533_v47, %v3526_v26 }
 0x225   :  { %4446 = vst [vmem:[#allocation25_spill] sm:$0xff] %v3707_v20  ;;  %1358 = vmatpush.bf16.msrb.mxu2 %v3707_v20  ;;  %v3721_v49 = vor.u32 %v2934_v44, %v2685_v48  ;;  %v3727_v56 = vor.u32 %v2900_v51, %v2539_v50  ;;  %v3755_v43 = vor.u32 %v2892_v25, %v2507_v22  ;;  %v2637_v39 = vld [vmem:[#allocation7 + $0x110] sm:$0xf0]  ;;  %v2755_v48 = vld [vmem:[#allocation7 + $0x1e8] sm:$0xf] }
 0x226   :  { %4448 = vst [vmem:[#allocation27_spill] sm:$0xff] %v3719_v45  ;;  %v3758_v42 = vor.u32 %v2890_v27, %v2509_v33  ;;  %v3760_v44 = vor.u32 %v2922_v34, %v2637_v39  ;;  %v2953_v50 = vld [vmem:[#allocation7 + $0x1f4] sm:$0xf0]  ;;  %v2627_v51 = vld [vmem:[#allocation7 + $0xe8] sm:$0xf]  ;;  %v3777_v22 = vor.u32 %v2951_v23, %v2757_v4  ;;  %v3781_v39 = vpop.f32.mrf.mxu3 }
 0x227   :  { %4449 = vst [vmem:[#allocation28_spill] sm:$0xff] %v3721_v49  ;;  %1377 = vmatpush.bf16.msrb.mxu0 %v3721_v49  ;;  %v2917_v18 = vld [vmem:[#allocation7 + $0xd4] sm:$0xf0]  ;;  %v2723_v27 = vld [vmem:[#allocation7 + $0x1a8] sm:$0xf] }
 0x228   :  { %1342 = vmatpush.bf16.msrb.mxu3 %v3716_v31  ;;  %4452 = vst [vmem:[#allocation31_spill] sm:$0xff] %v3743_v41  ;;  %v3779_v25 = vor.u32 %v2917_v18, %v2611_v15  ;;  %v2945_v33 = vld [vmem:[#allocation7 + $0x1b4] sm:$0xf0]  ;;  %v2915_v34 = vld [vmem:[#allocation7 + $0xcc] sm:$0xf] }
 0x229   :  { %1359 = vmatpush.bf16.msrb.mxu2 %v3719_v45  ;;  %4453 = vst [vmem:[#allocation32_spill] sm:$0xff] %v3745_v53  ;;  %v2707_v23 = vld [vmem:[#allocation7 + $0x188] sm:$0xf]  ;;  %v2911_v4 = vld [vmem:[#allocation7 + $0xac] sm:$0xf] }
 0x22a   :  { %4454 = vst [vmem:[#allocation33_spill] sm:$0xff] %v3758_v42  ;;  %v2597_v15 = vld [vmem:[#allocation7 + $0xb8] sm:$0xf0]  ;;  %v2675_v49 = vld [vmem:[#allocation7 + $0x148] sm:$0xf] }
 0x22b   :  { %4455 = vst [vmem:[#allocation34_spill] sm:$0xff] %v3760_v44  ;;  %v2923_v45 = vld [vmem:[#allocation7 + $0x10c] sm:$0xf]  ;;  %v2645_v20 = vld [vmem:[#allocation7 + $0x118] sm:$0xf0] }
 0x22c   :  { %972 = vperm.xlu0 %3003, %v846_v55   ;;  %v2651_v55 = vld [vmem:[#allocation7 + $0x120] sm:$0xf]  ;;  %4457 = vst [vmem:[#allocation36_spill] sm:$0xff] %v3777_v22 }
 0x22d   :  { %v3729_v21 = vor.u32 %v2928_v57, %v2651_v55  ;;  %1360 = vmatpush.bf16.msrb.mxu2 %v3731_v40  ;;  %v3765_v57 = vor.u32 %v2953_v50, %v2755_v48  ;;  %v2613_v48 = vld [vmem:[#allocation7 + $0xd8] sm:$0xf0]  ;;  %v2947_v50 = vld [vmem:[#allocation7 + $0x1cc] sm:$0xf]  ;;  %v2893_v40 = vld [vmem:[#allocation7 + $0x14] sm:$0xf0] }
 0x22f   :  { %1343 = vmatpush.bf16.msrb.mxu3 %v3729_v21 }
 0x231   :  { %1361 = vmatpush.bf16.msrb.mxu2 %v3743_v41 }
 0x233   :  { %1344 = vmatpush.bf16.msrb.mxu3 %v3740_v35 }
 0x234   :  { %3007 = vset.pattern.permute.xlu0 %v3341_v0  ;;  %v2912_v0 = vld [vmem:[#allocation7 + $0xac] sm:$0xf0] }
 0x235   :  { %v3690_v11 = vor.u32 %v2912_v0, %v2587_v8  ;;  %v2523_v8 = vld [vmem:[#allocation7 + $0x20] sm:$0xf]  ;;  %v3734_v0 = vor.u32 %v2930_v24, %v2669_v7  ;;  %v2949_v24 = vld [vmem:[#allocation7 + $0x1d4] sm:$0xf0]  ;;  %1362 = vmatpush.bf16.msrb.mxu2 %v3758_v42  ;;  %v3769_v7 = vor.u32 %v2921_v58, %v2627_v51  ;;  %v2741_v51 = vld [vmem:[#allocation7 + $0x1d8] sm:$0xf0]  ;;  %v3786_v58 = vor.u32 %v2915_v34, %v2613_v48 }
 0x236   :  { %v3738_v30 = vor.u32 %v2896_v59, %v2523_v8  ;;  %1345 = vmatmul.bf16.vlgmr.msrb.gmra.mxu3 %v3753_v54  ;;  %v2919_v8 = vld [vmem:[#allocation7 + $0xec] sm:$0xf]  ;;  %v2629_v59 = vld [vmem:[#allocation7 + $0xf8] sm:$0xf0]  ;;  %v3772_v10 = vor.u32 %v2949_v24, %v2739_v62  ;;  %v3788_v62 = vor.u32 %v2947_v50, %v2741_v51  ;;  %v2595_v24 = vld [vmem:[#allocation7 + $0xa8] sm:$0xf]  ;;  %v3797_v48 = vor.u32 %v2911_v4, %v2597_v15 }
 0x237   :  { %1321 = vmatpush.bf16.msrb.mxu1 %v3690_v11  ;;  %4451 = vst [vmem:[#allocation30_spill] sm:$0xff] %v3734_v0  ;;  %1378 = vmatpush.bf16.msrb.mxu0 %v3734_v0  ;;  %v3774_v14 = vor.u32 %v2919_v8, %v2629_v59  ;;  %v2913_v8 = vld [vmem:[#allocation7 + $0xb4] sm:$0xf0]  ;;  %v3791_v59 = vor.u32 %v2945_v33, %v2723_v27  ;;  %v2579_v50 = vld [vmem:[#allocation7 + $0x88] sm:$0xf] }
 0x238   :  { %1409 = vmatpush.bf16.msra.mxu3 %v3765_v57  ;;  %4458 = vst [vmem:[#allocation37_spill] sm:$0xff] %v3786_v58  ;;  %v3794_v18 = vor.u32 %v2913_v8, %v2595_v24  ;;  %v2909_v51 = vld [vmem:[#allocation7 + $0x94] sm:$0xf0]  ;;  %v2907_v33 = vld [vmem:[#allocation7 + $0x8c] sm:$0xf]  ;;  %v3803_v24 = vor.u32 %v2941_v32, %v2707_v23  ;;  %v3808_v4 = vpack.c.bf16 %v3557_v3, %v3557_v3 }
 0x239   :  { %4456 = vst [vmem:[#allocation35_spill] sm:$0xff] %v3774_v14  ;;  %1427 = vmatpush.bf16.msra.mxu2 %v3774_v14  ;;  %v2939_v8 = vld [vmem:[#allocation7 + $0x18c] sm:$0xf]  ;;  %v2709_v0 = vld [vmem:[#allocation7 + $0x198] sm:$0xf0]  ;;  %v3810_v15 = vor.u32 %v2909_v51, %v2579_v50 }
 0x23a   :  { %4459 = vst [vmem:[#allocation38_spill] sm:$0xff] %v3788_v62  ;;  %v3816_v32 = vor.u32 %v2939_v8, %v2709_v0  ;;  %v2563_v50 = vld [vmem:[#allocation7 + $0x68] sm:$0xf]  ;;  %v2905_v51 = vld [vmem:[#allocation7 + $0x74] sm:$0xf0] }
 0x23b   :  { %1322 = vmatpush.bf16.msrb.mxu1 %v3703_v17  ;;  %1379 = vmatpush.bf16.msrb.mxu0 %v3745_v53  ;;  %4460 = vst [vmem:[#allocation39_spill] sm:$0xff] %v3797_v48  ;;  %v2581_v53 = vld [vmem:[#allocation7 + $0x98] sm:$0xf0]  ;;  %v2933_v0 = vld [vmem:[#allocation7 + $0x154] sm:$0xf0] }
 0x23c   :  { %1410 = vmatpush.bf16.msra.mxu3 %v3772_v10  ;;  %4463 = vst [vmem:[#allocation42_spill] sm:$0xff] %v3816_v32  ;;  %v2565_v8 = vld [vmem:[#allocation7 + $0x78] sm:$0xf0]  ;;  %v3832_v9 = vor.u32 %v2933_v0, %v2675_v49  ;;  %v2531_v0 = vld [vmem:[#allocation7 + $0x28] sm:$0xf] }
 0x23d   :  { %1428 = vmatpush.bf16.msra.mxu2 %v3786_v58  ;;  %v2677_v49 = vld [vmem:[#allocation7 + $0x158] sm:$0xf0]  ;;  %v2927_v58 = vld [vmem:[#allocation7 + $0x12c] sm:$0xf] }
 0x23e   :  { %v2661_v14 = vld [vmem:[#allocation7 + $0x138] sm:$0xf0] }
 0x23f   :  { %1323 = vmatpush.bf16.msrb.mxu1 %v3714_v2  ;;  %1380 = vmatpush.bf16.msrb.mxu0 %v3760_v44  ;;  %v2943_v44 = vld [vmem:[#allocation7 + $0x1ac] sm:$0xf] }
 0x240   :  { %1411 = vmatpush.bf16.msra.mxu3 %v3791_v59 }
 0x241   :  { %1429 = vmatpush.bf16.msra.mxu2 %v3797_v48  ;;  %v2895_v48 = vld [vmem:[#allocation7 + $0x2c] sm:$0xf] }
 0x242   :  { %1381 = vmatmul.bf16.vlgmr.msrb.gmra.mxu0 %v3753_v54 }
 0x243   :  { %1324 = vmatpush.bf16.msrb.mxu1 %v3727_v56  ;;  %1445 = vmatpush.bf16.msra.mxu0 %v3777_v22  ;;  %v2725_v22 = vld [vmem:[#allocation7 + $0x1b8] sm:$0xf0] }
 0x244   :  { %v3800_v27 = vor.u32 %v2943_v44, %v2725_v22  ;;  %v3813_v44 = vor.u32 %v2907_v33, %v2581_v53  ;;  %v3818_v22 = vpop.f32.mrf.mxu3  ;;  %1412 = vmatpush.bf16.msra.mxu3 %v3803_v24  ;;  %v3826_v53 = vor.u32 %v2905_v51, %v2563_v50  ;;  %v2903_v33 = vld [vmem:[#allocation7 + $0x6c] sm:$0xf]  ;;  %v2929_v50 = vld [vmem:[#allocation7 + $0x134] sm:$0xf0]  ;;  %v3837_v51 = vor.u32 %v2901_v6, %v2547_v52  ;;  %v2533_v52 = vld [vmem:[#allocation7 + $0x38] sm:$0xf0] }
 0x245   :  { %v3847_v6 = vor.u32 %v2929_v50, %v2659_v1  ;;  %v3857_v50 = vor.u32 %v2927_v58, %v2661_v14  ;;  %v3870_v14 = vor.u32 %v2923_v45, %v2645_v20  ;;  %v968_v45 = vpop.permute.xlu2 %967 }
 0x246   :  { %4461 = vst [vmem:[#allocation40_spill] sm:$0xff] %v3800_v27  ;;  %1350 = vmatmul.bf16.gmra.mxu3 %v3808_v4  ;;  %1430 = vmatpush.bf16.msra.mxu2 %v3813_v44 }
 0x247   :  { %1325 = vmatpush.bf16.msrb.mxu1 %v3738_v30  ;;  %1446 = vmatpush.bf16.msra.mxu0 %v3788_v62  ;;  %v2937_v62 = vld [vmem:[#allocation7 + $0x174] sm:$0xf0]  ;;  %4462 = vst [vmem:[#allocation41_spill] sm:$0xff] %v3813_v44  ;;  %v2899_v44 = vld [vmem:[#allocation7 + $0x4c] sm:$0xf] }
 0x24b   :  { %1326 = vmatpush.bf16.msrb.mxu1 %v3755_v43  ;;  %1447 = vmatpush.bf16.msra.mxu0 %v3800_v27  ;;  %v3829_v27 = vor.u32 %v2903_v33, %v2565_v8  ;;  %v2931_v33 = vld [vmem:[#allocation7 + $0x14c] sm:$0xf] }
 0x24c   :  { %v955_v42 = vpop.f32.mrf.mxu3 }
 0x24d   :  { %4464 = vst [vmem:[#allocation43_spill] sm:$0xff] %v3829_v27  ;;  %1431 = vmatpush.bf16.msra.mxu2 %v3829_v27 }
 0x24f   :  { %1391 = vmatpush.bf16.msra.mxu1 %v3769_v7  ;;  %1448 = vmatpush.bf16.msra.mxu0 %v3816_v32  ;;  %v2549_v32 = vld [vmem:[#allocation7 + $0x58] sm:$0xf0] }
 0x250   :  { %v3841_v8 = vor.u32 %v2899_v44, %v2549_v32  ;;  %v2643_v44 = vld [vmem:[#allocation7 + $0x108] sm:$0xf]  ;;  %v2925_v32 = vld [vmem:[#allocation7 + $0x114] sm:$0xf0] }
 0x252   :  { %1386 = vmatmul.bf16.gmra.mxu0 %v3808_v4  ;;  %4466 = vst [vmem:[#allocation45_spill] sm:$0xff] %v3841_v8  ;;  %1432 = vmatpush.bf16.msra.mxu2 %v3841_v8 }
 0x253   :  { %1392 = vmatpush.bf16.msra.mxu1 %v3779_v25 }
 0x254   :  { %v957_v20 = vpop.f32.mrf.mxu3 }
 0x257   :  { %1393 = vmatpush.bf16.msra.mxu1 %v3794_v18 }
 0x25b   :  { %1394 = vmatpush.bf16.msra.mxu1 %v3810_v15 }
 0x25f   :  { %1395 = vmatpush.bf16.msra.mxu1 %v3826_v53 }
 0x263   :  { %1396 = vmatpush.bf16.msra.mxu1 %v3837_v51 }
 0x286   :  { %v3762_v55 = vpop.f32.mrf.mxu2 }
 0x28e   :  { %v904_v34 = vpop.f32.mrf.mxu2 }
 0x28f   :  { %v2691_v34 = vld [vmem:[#allocation7 + $0x168] sm:$0xf] }
 0x290   :  { %v3821_v23 = vor.u32 %v2937_v62, %v2691_v34  ;;  %v2935_v62 = vld [vmem:[#allocation7 + $0x16c] sm:$0xf]  ;;  %v2693_v34 = vld [vmem:[#allocation7 + $0x178] sm:$0xf0] }
 0x291   :  { %v3834_v46 = vor.u32 %v2935_v62, %v2693_v34  ;;  %v2897_v62 = vld [vmem:[#allocation7 + $0x34] sm:$0xf0]  ;;  %v3844_v34 = vor.u32 %v2931_v33, %v2677_v49  ;;  %v3853_v33 = vor.u32 %v2895_v48, %v2533_v52  ;;  %v2515_v49 = vld [vmem:[#allocation7 + $0x8] sm:$0xf] }
 0x292   :  { %1413 = vmatpush.bf16.msra.mxu3 %v3821_v23  ;;  %v3850_v27 = vor.u32 %v2897_v62, %v2531_v0  ;;  %v2517_v0 = vld [vmem:[#allocation7 + $0x18] sm:$0xf0]  ;;  %v3860_v62 = vor.u32 %v2925_v32, %v2643_v44  ;;  %v3146_v48 = vld [vmem:[%s4402_s4 + $0x28] sm:$0xff] }
 0x293   :  { %4465 = vst [vmem:[#allocation44_spill] sm:$0xff] %v3834_v46  ;;  %1449 = vmatpush.bf16.msra.mxu0 %v3834_v46  ;;  %1433 = vmatpush.bf16.msra.mxu2 %v3853_v33 }
 0x294   :  { %1397 = vmatpush.bf16.msra.mxu1 %v3850_v27 }
 0x296   :  { %v963_v28 = vpop.permute.xlu0 %962  ;;  %1414 = vmatpush.bf16.msra.mxu3 %v3832_v9 }
 0x297   :  { %v980_v46 = vmul.f32 %v963_v28, %v3781_v39  ;;  %1450 = vmatpush.bf16.msra.mxu0 %v3844_v34  ;;  %v3864_v28 = vor.u32 %v2893_v40, %v2515_v49  ;;  %v981_v39 = vmul.f32 %v968_v45, %v3818_v22 }
 0x299   :  { %1398 = vmatpush.bf16.msra.mxu1 %v3864_v28 }
 0x29a   :  { %1415 = vmatpush.bf16.msra.mxu3 %v3847_v6 }
 0x29b   :  { %1451 = vmatpush.bf16.msra.mxu0 %v3857_v50 }
 0x29e   :  { %v973_v41 = vpop.permute.xlu0 %972  ;;  %1416 = vmatpush.bf16.msra.mxu3 %v3860_v62 }
 0x29f   :  { %v982_v1 = vmul.f32 %v973_v41, %v955_v42  ;;  %v3866_v41 = vor.u32 %v2891_v38, %v2517_v0  ;;  %1452 = vmatpush.bf16.msra.mxu0 %v3870_v14  ;;  %v978_v38 = vpop.permute.xlu1 %977 }
 0x2a0   :  { %v983_v40 = vmul.f32 %v978_v38, %v957_v20 }
 0x2a1   :  { %v984_v8 = vadd.f32 %v982_v1, %v980_v46  ;;  %1434 = vmatpush.bf16.msra.mxu2 %v3866_v41  ;;  %1417 = vmatmul.bf16.vlgmr.msra.gmra.mxu3 %v3753_v54  ;;  %v3144_v46 = vld [vmem:[%s4402_s4 + $0x38] sm:$0xff] }
 0x2a2   :  { %1453 = vmatmul.bf16.vlgmr.msra.gmra.mxu0 %v3753_v54  ;;  %v985_v58 = vadd.f32 %v983_v40, %v981_v39  ;;  %v3147_v54 = vld [vmem:[%s4402_s4 + $0x20] sm:$0xff] }
 0x2a3   :  { %v986_v42 = vpack.c.bf16 %v984_v8, %v3762_v55  ;;  %1918 = vmatpush.bf16.msrb.mxu0 %v3665_v36  ;;  %v3145_v55 = vld [vmem:[%s4402_s4 + $0x30] sm:$0xff] }
 0x2a4   :  { %v988_v36 = vpack.c.bf16 %v985_v58, %v985_v58 }
 0x2a5   :  { %1327 = vmatmul.bf16.vlgmr.msrb.gmra.mxu1 %v986_v42  ;;  %1363 = vmatmul.bf16.vlgmr.msrb.gmra.mxu2 %v986_v42 }
 0x2a6   :  { %1603 = vmatpush.bf16.msrb.mxu1 %v3144_v46 }
 0x2a7   :  { %1919 = vmatpush.bf16.msrb.mxu0 %v3679_v61  ;;  %v3148_v61 = vld [vmem:[%s4402_s4 + $0x18] sm:$0xff] }
 0x2aa   :  { %1604 = vmatpush.bf16.msrb.mxu1 %v3145_v55 }
 0x2ab   :  { %1920 = vmatpush.bf16.msrb.mxu0 %v3690_v11  ;;  %v3149_v11 = vld [vmem:[%s4402_s4 + $0x10] sm:$0xff] }
 0x2ae   :  { %1605 = vmatpush.bf16.msrb.mxu1 %v3146_v48 }
 0x2af   :  { %1921 = vmatpush.bf16.msrb.mxu0 %v3703_v17  ;;  %v3150_v17 = vld [vmem:[%s4402_s4 + $0x8] sm:$0xff] }
 0x2b1   :  { %1422 = vmatmul.bf16.gmra.mxu3 %v3808_v4 }
 0x2b2   :  { %1606 = vmatpush.bf16.msrb.mxu1 %v3147_v54  ;;  %1458 = vmatmul.bf16.gmra.mxu0 %v3808_v4 }
 0x2b3   :  { %1922 = vmatpush.bf16.msrb.mxu0 %v3714_v2  ;;  %v3151_v2 = vld [vmem:[%s4402_s4] sm:$0xff] }
 0x2b5   :  { %1332 = vmatmul.bf16.gmra.mxu1 %v988_v36  ;;  %1368 = vmatmul.bf16.gmra.mxu2 %v988_v36 }
 0x2b6   :  { %1607 = vmatpush.bf16.msrb.mxu1 %v3148_v61 }
 0x2b7   :  { %1923 = vmatpush.bf16.msrb.mxu0 %v3727_v56 }
 0x2ba   :  { %1608 = vmatpush.bf16.msrb.mxu1 %v3149_v11 }
 0x2bb   :  { %1924 = vmatpush.bf16.msrb.mxu0 %v3738_v30 }
 0x2be   :  { %1609 = vmatpush.bf16.msrb.mxu1 %v3150_v17 }
 0x2bf   :  { %1925 = vmatpush.bf16.msrb.mxu0 %v3755_v43 }
 0x2c2   :  { %1610 = vmatpush.bf16.msrb.mxu1 %v3151_v2 }
 0x2c3   :  { %1990 = vmatpush.bf16.msra.mxu0 %v3769_v7 }
 0x2c5   :  { %1399 = vmatmul.bf16.vlgmr.msra.gmra.mxu1 %v986_v42  ;;  %1435 = vmatmul.bf16.vlgmr.msra.gmra.mxu2 %v986_v42 }
 0x2c6   :  { %1936 = vmatpush.bf16.msra.mxu1 %v3663_v12  ;;  %v1382_v12 = vpop.f32.mrf.mxu0 }
 0x2c7   :  { %1991 = vmatpush.bf16.msra.mxu0 %v3779_v25 }
 0x2ca   :  { %1937 = vmatpush.bf16.msra.mxu1 %v3668_v37  ;;  %v1346_v37 = vpop.f32.mrf.mxu3 }
 0x2cb   :  { %1992 = vmatpush.bf16.msra.mxu0 %v3794_v18 }
 0x2ce   :  { %1938 = vmatpush.bf16.msra.mxu1 %v3681_v63  ;;  %v1384_v63 = vpop.f32.mrf.mxu0 }
 0x2cf   :  { %1993 = vmatpush.bf16.msra.mxu0 %v3810_v15 }
 0x2d2   :  { %1939 = vmatpush.bf16.msra.mxu1 %v3692_v60  ;;  %v1348_v60 = vpop.f32.mrf.mxu3 }
 0x2d3   :  { %1994 = vmatpush.bf16.msra.mxu0 %v3826_v53 }
 0x2d5   :  { %1404 = vmatmul.bf16.gmra.mxu1 %v988_v36  ;;  %1440 = vmatmul.bf16.gmra.mxu2 %v988_v36 }
 0x2d6   :  { %1940 = vmatpush.bf16.msra.mxu1 %v3705_v19  ;;  %v1387_v56 = vpop.f32.mrf.mxu0 }
 0x2d7   :  { %1995 = vmatpush.bf16.msra.mxu0 %v3837_v51 }
 0x2da   :  { %1941 = vmatpush.bf16.msra.mxu1 %v3716_v31  ;;  %v1351_v19 = vpop.f32.mrf.mxu3  ;;  %v3932_v31 = vld [vmem:[%s4405_s7] ss:$4 sm:$0xf] }
 0x2db   :  { %1996 = vmatpush.bf16.msra.mxu0 %v3850_v27  ;;  %v3935_v30 = vperm.slane %v3932_v31, 0  ;;  %v3939_v18 = vperm.slane %v3932_v31, 1 }
 0x2de   :  { %1942 = vmatpush.bf16.msra.mxu1 %v3729_v21  ;;  %v1389_v21 = vpop.f32.mrf.mxu0 }
 0x2df   :  { %1997 = vmatpush.bf16.msra.mxu0 %v3864_v28 }
 0x2e2   :  { %1943 = vmatpush.bf16.msra.mxu1 %v3740_v35  ;;  %v1353_v7 = vpop.f32.mrf.mxu3 }
 0x31f   :  { %v3945_v32 = vpop.f32.mrf.mxu0 }
 0x322   :  { %v1328_v43 = vpop.f32.mrf.mxu1 }
 0x323   :  { %v1329_v35 = vadd.f32 %v1328_v43, %v3935_v30 }
 0x324   :  { %v3942_v53 = vpop.f32.mrf.mxu3 }
 0x325   :  { %v1347_v25 = vadd.f32 %v1346_v37, %v1329_v35 }
 0x327   :  { %v2761_v27 = vmul.f32 -1.442695, %v1347_v25  ;;  %v3956_v11 = vpop.f32.mrf.mxu0 }
 0x328   :  { %v1364_v4 = vpop.f32.mrf.mxu2 }
 0x329   :  { %3052 = vpow2.f32 %v2761_v27  ;;  %v1365_v15 = vadd.f32 %v1364_v4, %v3939_v18 }
 0x32a   :  { %v1330_v22 = vpop.f32.mrf.mxu1 }
 0x32b   :  { %v1383_v51 = vadd.f32 %v1382_v12, %v1365_v15  ;;  %v1331_v8 = vadd.f32 %v1330_v22, %v3935_v30 }
 0x32c   :  { %v3951_v46 = vpop.f32.mrf.mxu3 }
 0x32d   :  { %v2764_v52 = vmul.f32 -1.442695, %v1383_v51  ;;  %v1349_v44 = vadd.f32 %v1348_v60, %v1331_v8 }
 0x32f   :  { %v3053_v49 = vpop.eup %3052  ;;  %3054 = vpow2.f32 %v2764_v52  ;;  %v2762_v1 = vmul.f32 -1.442695, %v1349_v44  ;;  %v3971_v15 = vpop.f32.mrf.mxu0 }
 0x330   :  { %v3947_v0 = vadd.f32 1.0, %v3053_v49  ;;  %v1366_v28 = vpop.f32.mrf.mxu2 }
 0x331   :  { %3056 = vpow2.f32 %v2762_v1  ;;  %v1367_v42 = vadd.f32 %v1366_v28, %v3939_v18  ;;  %v3983_v28 = vperm.slane %v3932_v31, 2 }
 0x332   :  { %3058 = vrcp.f32 %v3947_v0  ;;  %v1333_v38 = vpop.f32.mrf.mxu1  ;;  %vm1480_vm7 = vweird.f32 %v3947_v0 }
 0x333   :  { %v1385_v20 = vadd.f32 %v1384_v63, %v1367_v42  ;;  %v1334_v45 = vadd.f32 %v1333_v38, %v3935_v30  ;;  %v3986_v42 = vperm.slane %v3932_v31, 3 }
 0x334   :  { %v3963_v63 = vpop.f32.mrf.mxu3 }
 0x335   :  { %v3055_v40 = vpop.eup %3054  ;;  %v2765_v55 = vmul.f32 -1.442695, %v1385_v20  ;;  %v1352_v39 = vadd.f32 %v1351_v19, %v1334_v45 }
 0x336   :  { %v3954_v58 = vadd.f32 1.0, %v3055_v40  ;;  %v1486_v40 = vand.u32 2147483648, %v3947_v0 }
 0x337   :  { %v3057_v48 = vpop.eup %3056  ;;  %3060 = vpow2.f32 %v2765_v55  ;;  %v2763_v36 = vmul.f32 -1.442695, %v1352_v39  ;;  %v1484_v39 = vand.u32 2147483647, %v3947_v0 }
 0x338   :  { %v3059_v54 = vpop.eup %3058  ;;  %v1369_v61 = vpop.f32.mrf.mxu2  ;;  %v3959_v2 = vadd.f32 1.0, %v3057_v48  ;;  %vm1537_vm15 = vweird.f32 %v3954_v58 }
 0x339   :  { %v1476_v17 = vmul.f32 %v3059_v54, %v3947_v0  ;;  %3062 = vpow2.f32 %v2763_v36  ;;  %v1370_v12 = vadd.f32 %v1369_v61, %v3939_v18  ;;  %vm1481_vm6 = vweird.f32 %v3059_v54 }
 0x33a   :  { %3064 = vrcp.f32 %v3954_v58  ;;  %v1335_v37 = vpop.f32.mrf.mxu1  ;;  %vm3994_vm8 = vmor %vm1480_vm7, %vm1481_vm6  ;;  %v1487_v0 = vor.u32 1.1754944e-38, %v1486_v40  ;;  %vm1485_vm10 = vcmp.eq.f32.partialorder %v1484_v39, 8.507059e+37  ;;  %vm1495_vm14 = vweird.f32 %v3959_v2 }
 0x33b   :  { %3066 = vrcp.f32 %v3959_v2  ;;  %v1388_v60 = vadd.f32 %v1387_v56, %v1370_v12  ;;  %v1477_v19 = vsub.f32 1.0, %v1476_v17  ;;  %v1461_v17 = vpop.f32.mrf.mxu0  ;;  %v1499_v55 = vand.u32 2147483647, %v3959_v2 }
 0x33c   :  { %v1425_v52 = vpop.f32.mrf.mxu3 }
 0x33d   :  { %v3061_v21 = vpop.eup %3060  ;;  %v2766_v43 = vmul.f32 -1.442695, %v1388_v60  ;;  %v1478_v4 = vmul.f32 %v3059_v54, %v1477_v19  ;;  %vm1500_vm4 = vcmp.eq.f32.partialorder %v1499_v55, 8.507059e+37  ;;  %v4483_v55 = vld [vmem:[#allocation31_spill] sm:$0xff] }
 0x33e   :  { %v3966_v7 = vadd.f32 1.0, %v3061_v21 }
 0x33f   :  { %v3063_v35 = vpop.eup %3062  ;;  %3068 = vpow2.f32 %v2766_v43  ;;  %v1479_v49 = vadd.f32 %v3059_v54, %v1478_v4 }
 0x340   :  { %v3968_v25 = vpop.eup %3064  ;;  %3070 = vrcp.f32 %v3966_v7  ;;  %v1371_v27 = vpop.f32.mrf.mxu2  ;;  %v3975_v51 = vadd.f32 1.0, %v3063_v35  ;;  %vm1552_vm7 = vweird.f32 %v3966_v7 }
 0x341   :  { %v3973_v22 = vpop.eup %3066  ;;  %v1533_v44 = vmul.f32 %v3968_v25, %v3954_v58  ;;  %v1483_v61 = vsel %vm3994_vm8, %v3059_v54, %v1479_v49  ;;  %v1541_v49 = vand.u32 2147483647, %v3954_v58  ;;  %vm1538_vm0 = vweird.f32 %v3968_v25 }
 0x342   :  { %v1491_v56 = vmul.f32 %v3973_v22, %v3959_v2  ;;  %v1400_v8 = vpop.f32.mrf.mxu1  ;;  %3072 = vrcp.f32 %v3975_v51  ;;  %v1488_v4 = vsel %vm1485_vm10, %v1487_v0, %v1483_v61  ;;  %vm1496_vm11 = vweird.f32 %v3973_v22  ;;  %vm4045_vm3 = vmor %vm1537_vm15, %vm1538_vm0 }
 0x343   :  { %v1534_v48 = vsub.f32 1.0, %v1533_v44  ;;  %v1401_v37 = vadd.f32 %v1400_v8, %v3983_v28  ;;  %vm4029_vm1 = vmor %vm1495_vm14, %vm1496_vm11  ;;  %vm4039_vm2 = vcmp.eq.f32.partialorder %v1541_v49, 8.507059e+37  ;;  %vm1510_vm10 = vweird.f32 %v3975_v51 }
 0x344   :  { %v1492_v38 = vsub.f32 1.0, %v1491_v56 }
 0x345   :  { %v3069_v1 = vpop.eup %3068  ;;  %v1535_v54 = vmul.f32 %v3968_v25, %v1534_v48  ;;  %v1419_v56 = vadd.f32 %v3942_v53, %v1401_v37 }
 0x346   :  { %v3988_v20 = vpop.eup %3070  ;;  %v3990_v45 = vadd.f32 1.0, %v3069_v1  ;;  %v1493_v19 = vmul.f32 %v3973_v22, %v1492_v38  ;;  %v1543_v1 = vand.u32 2147483648, %v3954_v58  ;;  %v1501_v38 = vand.u32 2147483648, %v3959_v2 }
 0x347   :  { %v1548_v31 = vmul.f32 %v3988_v20, %v3966_v7  ;;  %v1536_v39 = vadd.f32 %v3968_v25, %v1535_v54  ;;  %vm1553_vm5 = vweird.f32 %v3988_v20 }
 0x348   :  { %v1436_v36 = vpop.f32.mrf.mxu2  ;;  %v4003_v12 = vpop.eup %3072  ;;  %3074 = vrcp.f32 %v3990_v45  ;;  %v1494_v52 = vadd.f32 %v3973_v22, %v1493_v19  ;;  %v1544_v37 = vor.u32 1.1754944e-38, %v1543_v1  ;;  %v1502_v19 = vor.u32 1.1754944e-38, %v1501_v38  ;;  %vm4062_vm8 = vmor %vm1552_vm7, %vm1553_vm5 }
 0x349   :  { %v1437_v60 = vadd.f32 %v1436_v36, %v3986_v42  ;;  %v1506_v43 = vmul.f32 %v4003_v12, %v3975_v51  ;;  %v1549_v27 = vsub.f32 1.0, %v1548_v31  ;;  %v1540_v54 = vsel %vm4045_vm3, %v3968_v25, %v1536_v39 }
 0x34a   :  { %v1402_v21 = vpop.f32.mrf.mxu1  ;;  %v1498_v2 = vsel %vm4029_vm1, %v3973_v22, %v1494_v52  ;;  %vm1511_vm6 = vweird.f32 %v4003_v12  ;;  %v1545_v25 = vsel %vm4039_vm2, %v1544_v37, %v1540_v54  ;;  %v1514_v1 = vand.u32 2147483647, %v3975_v51 }
 0x34b   :  { %v1455_v35 = vadd.f32 %v3945_v32, %v1437_v60  ;;  %v1507_v44 = vsub.f32 1.0, %v1506_v43  ;;  %v1550_v53 = vmul.f32 %v3988_v20, %v1549_v27  ;;  %v1403_v36 = vadd.f32 %v1402_v21, %v3983_v28  ;;  %vm4073_vm11 = vmor %vm1510_vm10, %vm1511_vm6 }
 0x34c   :  { %v1558_v43 = vand.u32 2147483648, %v3966_v7  ;;  %v1503_v27 = vsel %vm1500_vm4, %v1502_v19, %v1498_v2  ;;  %vm1515_vm15 = vcmp.eq.f32.partialorder %v1514_v1, 8.507059e+37  ;;  %vm1567_vm1 = vweird.f32 %v3990_v45 }
 0x34d   :  { %v1577_v8 = vmul.f32 %v1488_v4, %v1455_v35  ;;  %v1508_v58 = vmul.f32 %v4003_v12, %v1507_v44  ;;  %v1551_v35 = vadd.f32 %v3988_v20, %v1550_v53  ;;  %v1421_v4 = vadd.f32 %v3951_v46, %v1403_v36 }
 0x34e   :  { %v4019_v32 = vpop.eup %3074  ;;  %v1516_v44 = vand.u32 2147483648, %v3975_v51  ;;  %v1559_v38 = vor.u32 1.1754944e-38, %v1558_v43  ;;  %v1586_v36 = vsub.f32 1.0, %v1545_v25 }
 0x34f   :  { %v1580_v40 = vadd.f32 %v1577_v8, %v1419_v56  ;;  %v1563_v60 = vmul.f32 %v4019_v32, %v3990_v45  ;;  %v1509_v8 = vadd.f32 %v4003_v12, %v1508_v58  ;;  %vm1568_vm0 = vweird.f32 %v4019_v32 }
 0x350   :  { %v1438_v48 = vpop.f32.mrf.mxu2  ;;  %vm1569_vm2 = vmor %vm1567_vm1, %vm1568_vm0 }
 0x351   :  { %v1439_v61 = vadd.f32 %v1438_v48, %v3986_v42  ;;  %3076 = vtanh.f32 %v1580_v40  ;;  %v1564_v52 = vsub.f32 1.0, %v1563_v60  ;;  %v1513_v51 = vsel %vm4073_vm11, %v4003_v12, %v1509_v8 }
 0x352   :  { %v1405_v0 = vpop.f32.mrf.mxu1 }
 0x353   :  { %v1457_v22 = vadd.f32 %v3956_v11, %v1439_v61  ;;  %v1556_v11 = vand.u32 2147483647, %v3966_v7  ;;  %v1555_v7 = vsel %vm4062_vm8, %v3988_v20, %v1551_v35  ;;  %v1406_v53 = vadd.f32 %v1405_v0, %v3983_v28 }
 0x354   :  { %v1565_v31 = vmul.f32 %v4019_v32, %v1564_v52  ;;  %v1517_v61 = vor.u32 1.1754944e-38, %v1516_v44  ;;  %v1592_v0 = vmul.f32 %v1545_v25, %v3526_v26 }
 0x355   :  { %v1578_v56 = vmul.f32 %v1503_v27, %v1457_v22  ;;  %vm1557_vm14 = vcmp.eq.f32.partialorder %v1556_v11, 8.507059e+37  ;;  %v1424_v60 = vadd.f32 %v3963_v63, %v1406_v53  ;;  %v1573_v22 = vand.u32 2147483648, %v3990_v45  ;;  %v4486_v53 = vld [vmem:[#allocation37_spill] sm:$0xff] }
 0x356   :  { %v1560_v2 = vsel %vm1557_vm14, %v1559_v38, %v1555_v7  ;;  %v1518_v37 = vsel %vm1515_vm15, %v1517_v61, %v1513_v51  ;;  %v1566_v21 = vadd.f32 %v4019_v32, %v1565_v31  ;;  %v1571_v63 = vand.u32 2147483647, %v3990_v45  ;;  %v4487_v51 = vld [vmem:[#allocation39_spill] sm:$0xff]  ;;  %v4488_v31 = vld [vmem:[#allocation41_spill] sm:$0xff] }
 0x357   :  { %v1581_v46 = vadd.f32 %v1578_v56, %v1421_v4  ;;  %v3077_v39 = vpop.eup %3076  ;;  %v1587_v12 = vsub.f32 1.0, %v1560_v2  ;;  %v1593_v27 = vmul.f32 %v1560_v2, %v3533_v47  ;;  %v1574_v8 = vor.u32 1.1754944e-38, %v1573_v22  ;;  %v4490_v61 = vld [vmem:[#allocation45_spill] sm:$0xff] }
 0x358   :  { %v1441_v40 = vpop.f32.mrf.mxu2  ;;  %v1589_v17 = vmul.f32 %v3077_v39, %v1586_v36  ;;  %v1570_v56 = vsel %vm1569_vm2, %v4019_v32, %v1566_v21  ;;  %vm1572_vm3 = vcmp.eq.f32.partialorder %v1571_v63, 8.507059e+37  ;;  %v4485_v39 = vld [vmem:[#allocation35_spill] sm:$0xff] }
 0x359   :  { %3078 = vtanh.f32 %v1581_v46  ;;  %v1442_v48 = vadd.f32 %v1441_v40, %v3986_v42  ;;  %v1575_v44 = vsel %vm1572_vm3, %v1574_v8, %v1570_v56  ;;  %v4482_v40 = vld [vmem:[#allocation29_spill] sm:$0xff]  ;;  %v3152_v21 = vld [vmem:[%s4405_s7 + $0x2] ss:$0 sm:$0xff] }
 0x35a   :  { %v1407_v20 = vpop.f32.mrf.mxu1  ;;  %v1588_v46 = vsub.f32 1.0, %v1575_v44  ;;  %v1594_v45 = vmul.f32 %v1575_v44, %v3557_v3 }
 0x35b   :  { %v1460_v58 = vadd.f32 %v3971_v15, %v1442_v48  ;;  %v4090_v15 = vadd.f32 %v1592_v0, %v1589_v17  ;;  %v4489_v20 = vld [vmem:[#allocation43_spill] sm:$0xff] }
 0x35d   :  { %v1579_v19 = vmul.f32 %v1518_v37, %v1460_v58  ;;  %v1598_v11 = vmax.f32 %v4090_v15, 0.0 }
 0x35f   :  { %v3079_v43 = vpop.eup %3078  ;;  %v1582_v35 = vadd.f32 %v1579_v19, %v1424_v60 }
 0x360   :  { %v1590_v54 = vmul.f32 %v3079_v43, %v1587_v12  ;;  %v1443_v4 = vpop.f32.mrf.mxu2 }
 0x361   :  { %3080 = vtanh.f32 %v1582_v35 }
 0x362   :  { %v4094_v26 = vadd.f32 %v1593_v27, %v1590_v54 }
 0x364   :  { %v1599_v52 = vmax.f32 %v4094_v26, 0.0  ;;  %v4113_v3 = vpack.c.bf16 %v4094_v26, %v4090_v15 }
 0x366   :  { %v1601_v49 = vpack.c.bf16 %v1599_v52, %v1598_v11 }
 0x367   :  { %v3081_v25 = vpop.eup %3080 }
 0x368   :  { %1611 = vmatmul.bf16.vlgmr.msrb.gmra.mxu1 %v1601_v49  ;;  %v1591_v47 = vmul.f32 %v3081_v25, %v1588_v46 }
 0x369   :  { %2008 = vmatpush.bf16.msrb.mxu1 %v3765_v57 }
 0x36a   :  { %v4102_v1 = vadd.f32 %v1594_v45, %v1591_v47 }
 0x36c   :  { %v1600_v32 = vmax.f32 %v4102_v1, 0.0  ;;  %v4118_v57 = vpack.c.bf16 %v4102_v1, %v4102_v1 }
 0x36d   :  { %2009 = vmatpush.bf16.msrb.mxu1 %v3772_v10 }
 0x36e   :  { %v1602_v38 = vpack.c.bf16 %v1600_v32, %v1600_v32 }
 0x371   :  { %2010 = vmatpush.bf16.msrb.mxu1 %v3791_v59 }
 0x375   :  { %2011 = vmatpush.bf16.msrb.mxu1 %v3803_v24 }
 0x378   :  { %1616 = vmatmul.bf16.gmra.mxu1 %v1602_v38 }
 0x379   :  { %2012 = vmatpush.bf16.msrb.mxu1 %v3821_v23 }
 0x37d   :  { %2013 = vmatpush.bf16.msrb.mxu1 %v3832_v9 }
 0x381   :  { %2014 = vmatpush.bf16.msrb.mxu1 %v3847_v6  ;;  %v4479_v6 = vld [vmem:[#allocation25_spill] sm:$0xff] }
 0x385   :  { %2015 = vmatpush.bf16.msrb.mxu1 %v3860_v62  ;;  %v4481_v62 = vld [vmem:[#allocation19_spill] sm:$0xff] }
 0x388   :  { %1944 = vmatmul.bf16.vlgmr.msra.gmra.mxu1 %v4113_v3 }
 0x398   :  { %1949 = vmatmul.bf16.gmra.mxu1 %v4118_v57 }
 0x3a8   :  { %2016 = vmatmul.bf16.vlgmr.msrb.gmra.mxu1 %v4113_v3 }
 0x3b8   :  { %2021 = vmatmul.bf16.gmra.mxu1 %v4118_v57 }
 0x3e5   :  { %v1612_v9 = vpop.f32.mrf.mxu1 }
 0x3e6   :  { %v1621_v10 = vpack.c.bf16 %v1612_v9, %v1612_v9 }
 0x3e8   :  { %v1623_v59 = vsel %vm653_vm9, %v1621_v10, 0 }
 0x3e9   :  { %1632 = vmatpush.bf16.msrb.mxu3 %v1623_v59 }
 0x3ec   :  { %2767 = vmatmul.msk.bf16.vlgmr.msrb.gmra.mxu3 %vm646_vm12, %v3588_v29 }
 0x3ed   :  { %1954 = vmatpush.bf16.msra.mxu3 %v3670_v16  ;;  %v4127_v24 = vpop.f32.mrf.mxu1  ;;  %v4480_v16 = vld [vmem:[#allocation27_spill] sm:$0xff] }
 0x3ee   :  { %1646 = vrot.lane.b32.xlu0 %v4127_v24, %s3345_s18 }
 0x3f1   :  { %1955 = vmatpush.bf16.msra.mxu3 %v3683_v5 }
 0x3f5   :  { %1956 = vmatpush.bf16.msra.mxu3 %v3695_v13  ;;  %v4133_v23 = vpop.f32.mrf.mxu1  ;;  %v4484_v13 = vld [vmem:[#allocation33_spill] sm:$0xff] }
 0x3f6   :  { %1648 = vrot.lane.b32.xlu2 %v4133_v23, %s3345_s18 }
 0x3f9   :  { %1957 = vmatpush.bf16.msra.mxu3 %v4479_v6 }
 0x3fc   :  { %2768 = vmatmul.msk.bf16.gmra.mxu3 %vm646_vm12, %v4481_v62 }
 0x3fd   :  { %1958 = vmatpush.bf16.msra.mxu3 %v4480_v16  ;;  %v1619_v7 = vpop.f32.mrf.mxu1 }
 0x401   :  { %1959 = vmatpush.bf16.msra.mxu3 %v4482_v40 }
 0x405   :  { %1960 = vmatpush.bf16.msra.mxu3 %v4483_v55  ;;  %v4143_v5 = vpop.f32.mrf.mxu1 }
 0x409   :  { %1961 = vmatpush.bf16.msra.mxu3 %v4484_v13 }
 0x40d   :  { %2026 = vmatpush.bf16.msrb.mxu3 %v4485_v39  ;;  %v4148_v48 = vpop.f32.mrf.mxu1 }
 0x411   :  { %2027 = vmatpush.bf16.msrb.mxu3 %v4486_v53 }
 0x415   :  { %2028 = vmatpush.bf16.msrb.mxu3 %v4487_v51  ;;  %v4152_v36 = vpop.f32.mrf.mxu1 }
 0x419   :  { %2029 = vmatpush.bf16.msrb.mxu3 %v4488_v31 }
 0x41d   :  { %2030 = vmatpush.bf16.msrb.mxu3 %v4489_v20  ;;  %v1952_v2 = vpop.f32.mrf.mxu1 }
 0x421   :  { %2031 = vmatpush.bf16.msrb.mxu3 %v4490_v61 }
 0x425   :  { %2032 = vmatpush.bf16.msrb.mxu3 %v3853_v33  ;;  %v4158_v58 = vpop.f32.mrf.mxu1 }
 0x429   :  { %2033 = vmatpush.bf16.msrb.mxu3 %v3866_v41 }
 0x42d   :  { %v4160_v17 = vpop.f32.mrf.mxu1 }
 0x435   :  { %v4162_v37 = vpop.f32.mrf.mxu1 }
 0x43d   :  { %v2024_v60 = vpop.f32.mrf.mxu1 }
 0x450   :  { %v1649_v41 = vpop.permute.xlu2 %1648 }
 0x460   :  { %v1647_v19 = vpop.permute.xlu0 %1646 }
 0x46f   :  { %v4164_v0 = vpop.f32.mrf.mxu3 }
 0x470   :  { %v1652_v12 = vadd.f32 %v1647_v19, %v4164_v0 }
 0x472   :  { %v1656_v43 = vadd.f32 %v3152_v21, %v1652_v12 }
 0x474   :  { %v2769_v33 = vmul.f32 -1.442695, %v1656_v43 }
 0x476   :  { %3082 = vpow2.f32 %v2769_v33 }
 0x477   :  { %v4170_v22 = vpop.f32.mrf.mxu3 }
 0x478   :  { %v1653_v35 = vadd.f32 %v1649_v41, %v4170_v22 }
 0x47a   :  { %v1657_v54 = vadd.f32 %v3152_v21, %v1653_v35 }
 0x47c   :  { %v3083_v27 = vpop.eup %3082  ;;  %v2770_v63 = vmul.f32 -1.442695, %v1657_v54 }
 0x47d   :  { %v1672_v4 = vadd.f32 1.0, %v3083_v27 }
 0x47e   :  { %3084 = vpow2.f32 %v2770_v63 }
 0x47f   :  { %3086 = vrcp.f32 %v1672_v4  ;;  %v4173_v56 = vpop.f32.mrf.mxu3  ;;  %v1687_v38 = vand.u32 2147483648, %v1672_v4  ;;  %v1685_v59 = vand.u32 2147483647, %v1672_v4  ;;  %vm1681_vm5 = vweird.f32 %v1672_v4 }
 0x480   :  { %v1654_v8 = vadd.f32 %v1647_v19, %v4173_v56 }
 0x481   :  { %v1688_v55 = vor.u32 1.1754944e-38, %v1687_v38  ;;  %vm1686_vm7 = vcmp.eq.f32.partialorder %v1685_v59, 8.507059e+37 }
 0x482   :  { %v1658_v11 = vadd.f32 %v3152_v21, %v1654_v8 }
 0x484   :  { %v3085_v52 = vpop.eup %3084  ;;  %v2771_v44 = vmul.f32 -1.442695, %v1658_v11 }
 0x485   :  { %v3087_v49 = vpop.eup %3086  ;;  %v4176_v46 = vadd.f32 1.0, %v3085_v52 }
 0x486   :  { %3088 = vpow2.f32 %v2771_v44  ;;  %v1677_v25 = vmul.f32 %v3087_v49, %v1672_v4  ;;  %vm1682_vm4 = vweird.f32 %v3087_v49 }
 0x487   :  { %v4178_v47 = vpop.f32.mrf.mxu3  ;;  %3090 = vrcp.f32 %v4176_v46  ;;  %vm1683_vm6 = vmor %vm1681_vm5, %vm1682_vm4  ;;  %vm1696_vm0 = vweird.f32 %v4176_v46  ;;  %v1702_v44 = vand.u32 2147483648, %v4176_v46 }
 0x488   :  { %v1655_v45 = vadd.f32 %v1649_v41, %v4178_v47  ;;  %v1678_v32 = vsub.f32 1.0, %v1677_v25 }
 0x48a   :  { %v1659_v9 = vadd.f32 %v3152_v21, %v1655_v45  ;;  %v1679_v10 = vmul.f32 %v3087_v49, %v1678_v32  ;;  %v4491_v21 = vmov 3   ;;  %v1700_v45 = vand.u32 2147483647, %v4176_v46 }
 0x48c   :  { %v3089_v6 = vpop.eup %3088  ;;  %v2772_v16 = vmul.f32 -1.442695, %v1659_v9  ;;  %v1680_v7 = vadd.f32 %v3087_v49, %v1679_v10  ;;  %v1703_v10 = vor.u32 1.1754944e-38, %v1702_v44 }
 0x48d   :  { %v1674_v40 = vadd.f32 1.0, %v3089_v6  ;;  %v3091_v53 = vpop.eup %3090 }
 0x48e   :  { %3092 = vpow2.f32 %v2772_v16  ;;  %v1684_v13 = vsel %vm1683_vm6, %v3087_v49, %v1680_v7  ;;  %v1692_v31 = vmul.f32 %v3091_v53, %v4176_v46  ;;  %vm1697_vm15 = vweird.f32 %v3091_v53 }
 0x48f   :  { %3094 = vrcp.f32 %v1674_v40  ;;  %v1689_v39 = vsel %vm1686_vm7, %v1688_v55, %v1684_v13  ;;  %v1717_v12 = vand.u32 2147483648, %v1674_v40  ;;  %v1715_v33 = vand.u32 2147483647, %v1674_v40  ;;  %vm1698_vm2 = vmor %vm1696_vm0, %vm1697_vm15  ;;  %v4492_v13 = vld [vmem:[#allocation20_spill] sm:$0xff] }
 0x490   :  { %1828 = vperm.xlu2 %3008, %v1689_v39   ;;  %v1693_v19 = vsub.f32 1.0, %v1692_v31  ;;  %vm1711_vm10 = vweird.f32 %v1674_v40  ;;  %vm1701_vm6 = vcmp.eq.f32.partialorder %v1700_v45, 8.507059e+37 }
 0x491   :  { %v1718_v27 = vor.u32 1.1754944e-38, %v1717_v12  ;;  %vm1716_vm14 = vcmp.eq.f32.partialorder %v1715_v33, 8.507059e+37 }
 0x492   :  { %v1694_v35 = vmul.f32 %v3091_v53, %v1693_v19 }
 0x494   :  { %v3093_v51 = vpop.eup %3092  ;;  %v1695_v11 = vadd.f32 %v3091_v53, %v1694_v35 }
 0x495   :  { %v3095_v20 = vpop.eup %3094  ;;  %v1675_v61 = vadd.f32 1.0, %v3093_v51 }
 0x496   :  { %v1707_v2 = vmul.f32 %v3095_v20, %v1674_v40  ;;  %vm1712_vm8 = vweird.f32 %v3095_v20  ;;  %v1699_v38 = vsel %vm1698_vm2, %v3091_v53, %v1695_v11 }
 0x497   :  { %3096 = vrcp.f32 %v1675_v61  ;;  %vm1713_vm11 = vmor %vm1711_vm10, %vm1712_vm8  ;;  %v1732_v52 = vand.u32 2147483648, %v1675_v61  ;;  %v1730_v25 = vand.u32 2147483647, %v1675_v61  ;;  %vm1726_vm3 = vweird.f32 %v1675_v61 }
 0x498   :  { %1736 = vrot.lane.b32.xlu2 %v4127_v24, %s3346_s19  ;;  %v1708_v60 = vsub.f32 1.0, %v1707_v2  ;;  %v1704_v16 = vsel %vm1701_vm6, %v1703_v10, %v1699_v38 }
 0x499   :  { %3010 = vset.pattern.permute.xlu2 %v4491_v21  ;;  %v1733_v9 = vor.u32 1.1754944e-38, %v1732_v52  ;;  %vm1731_vm5 = vcmp.eq.f32.partialorder %v1730_v25, 8.507059e+37 }
 0x49a   :  { %v1709_v43 = vmul.f32 %v3095_v20, %v1708_v60 }
 0x49c   :  { %v1710_v41 = vadd.f32 %v3095_v20, %v1709_v43 }
 0x49d   :  { %v3097_v54 = vpop.eup %3096 }
 0x49e   :  { %v1714_v63 = vsel %vm1713_vm11, %v3095_v20, %v1710_v41  ;;  %v1722_v4 = vmul.f32 %v3097_v54, %v1675_v61  ;;  %vm1727_vm1 = vweird.f32 %v3097_v54 }
 0x49f   :  { %v1719_v8 = vsel %vm1716_vm14, %v1718_v27, %v1714_v63  ;;  %vm1728_vm4 = vmor %vm1726_vm3, %vm1727_vm1 }
 0x4a0   :  { %1838 = vperm.xlu1 %3006, %v1719_v8   ;;  %v1723_v24 = vsub.f32 1.0, %v1722_v4 }
 0x4a2   :  { %v1724_v49 = vmul.f32 %v3097_v54, %v1723_v24 }
 0x4a4   :  { %v1725_v32 = vadd.f32 %v3097_v54, %v1724_v49 }
 0x4a6   :  { %v1729_v59 = vsel %vm1728_vm4, %v3097_v54, %v1725_v32 }
 0x4a7   :  { %v1734_v6 = vsel %vm1731_vm5, %v1733_v9, %v1729_v59 }
 0x4a8   :  { %1843 = vperm.xlu0 %3007, %v1734_v6   ;;  %1833 = vperm.xlu1 %3006, %v1704_v16   ;;  %v1865_v16 = vpack.c.bf16 %v4090_v15, %v4090_v15 }
 0x4b0   :  { %1738 = vrot.lane.b32.xlu1 %v4133_v23, %s3346_s19  ;;  %3009 = vset.pattern.permute.xlu0 %v4491_v21 }
 0x4b1   :  { %3011 = vset.pattern.permute.xlu1 %v4491_v21 }
 0x4ea   :  { %v1829_v46 = vpop.permute.xlu2 %1828 }
 0x4eb   :  { %v1846_v6 = vmul.f32 %v1829_v46, %v4094_v26 }
 0x4f2   :  { %v1737_v7 = vpop.permute.xlu2 %1736 }
 0x4f3   :  { %v1742_v40 = vadd.f32 %v1737_v7, %v4164_v0  ;;  %v1744_v55 = vadd.f32 %v1737_v7, %v4173_v56 }
 0x4f5   :  { %v1746_v39 = vadd.f32 %v1742_v40, %v4492_v13  ;;  %v1748_v53 = vadd.f32 %v1744_v55, %v4492_v13 }
 0x4f7   :  { %v2773_v51 = vmul.f32 -1.442695, %v1746_v39  ;;  %v2775_v31 = vmul.f32 -1.442695, %v1748_v53  ;;  %v1867_v53 = vsel %vm653_vm9, %v1865_v16, 0  ;;  %v4504_v16 = vld [vmem:[#allocation40_spill] sm:$0xff] }
 0x4f9   :  { %3098 = vpow2.f32 %v2773_v51 }
 0x4fa   :  { %3100 = vpow2.f32 %v2775_v31 }
 0x4ff   :  { %v3099_v20 = vpop.eup %3098 }
 0x500   :  { %v3101_v23 = vpop.eup %3100  ;;  %v1762_v61 = vadd.f32 1.0, %v3099_v20  ;;  %v4493_v20 = vld [vmem:[#allocation21_spill] sm:$0xff] }
 0x501   :  { %v1764_v2 = vadd.f32 1.0, %v3101_v23 }
 0x502   :  { %3102 = vrcp.f32 %v1762_v61  ;;  %v1777_v43 = vand.u32 2147483648, %v1762_v61  ;;  %v1775_v35 = vand.u32 2147483647, %v1762_v61  ;;  %vm1771_vm10 = vweird.f32 %v1762_v61 }
 0x503   :  { %3104 = vrcp.f32 %v1764_v2  ;;  %v1807_v33 = vand.u32 2147483648, %v1764_v2  ;;  %v1805_v27 = vand.u32 2147483647, %v1764_v2  ;;  %vm1801_vm11 = vweird.f32 %v1764_v2 }
 0x504   :  { %v1778_v8 = vor.u32 1.1754944e-38, %v1777_v43  ;;  %vm1776_vm0 = vcmp.eq.f32.partialorder %v1775_v35, 8.507059e+37  ;;  %v4499_v35 = vld [vmem:[#allocation30_spill] sm:$0xff] }
 0x505   :  { %v1808_v24 = vor.u32 1.1754944e-38, %v1807_v33  ;;  %vm1806_vm1 = vcmp.eq.f32.partialorder %v1805_v27, 8.507059e+37 }
 0x508   :  { %v3103_v60 = vpop.eup %3102 }
 0x509   :  { %v3105_v19 = vpop.eup %3104  ;;  %v1767_v12 = vmul.f32 %v3103_v60, %v1762_v61  ;;  %vm1772_vm7 = vweird.f32 %v3103_v60  ;;  %v4494_v61 = vld [vmem:[#allocation22_spill] sm:$0xff] }
 0x50a   :  { %v1797_v0 = vmul.f32 %v3105_v19, %v1764_v2  ;;  %vm1802_vm8 = vweird.f32 %v3105_v19  ;;  %vm1773_vm14 = vmor %vm1771_vm10, %vm1772_vm7  ;;  %v4496_v2 = vld [vmem:[#allocation24_spill] sm:$0xff] }
 0x50b   :  { %v1768_v21 = vsub.f32 1.0, %v1767_v12  ;;  %vm1803_vm15 = vmor %vm1801_vm11, %vm1802_vm8 }
 0x50c   :  { %v1798_v56 = vsub.f32 1.0, %v1797_v0  ;;  %v4498_v0 = vld [vmem:[#allocation28_spill] sm:$0xff] }
 0x50d   :  { %v1769_v41 = vmul.f32 %v3103_v60, %v1768_v21 }
 0x50e   :  { %v1799_v54 = vmul.f32 %v3105_v19, %v1798_v56 }
 0x50f   :  { %v1770_v63 = vadd.f32 %v3103_v60, %v1769_v41 }
 0x510   :  { %v1800_v4 = vadd.f32 %v3105_v19, %v1799_v54 }
 0x511   :  { %v1774_v11 = vsel %vm1773_vm14, %v3103_v60, %v1770_v63 }
 0x512   :  { %v1839_v52 = vpop.permute.xlu1 %1838  ;;  %v1804_v44 = vsel %vm1803_vm15, %v3105_v19, %v1800_v4  ;;  %v1779_v49 = vsel %vm1776_vm0, %v1778_v8, %v1774_v11 }
 0x513   :  { %v1809_v25 = vsel %vm1806_vm1, %v1808_v24, %v1804_v44  ;;  %1890 = vperm.xlu0 %3009, %v1779_v49   ;;  %v1848_v38 = vmul.f32 %v1839_v52, %v4094_v26 }
 0x514   :  { %1900 = vperm.xlu2 %3010, %v1809_v25  }
 0x51a   :  { %v1844_v45 = vpop.permute.xlu0 %1843  ;;  %v1834_v32 = vpop.permute.xlu1 %1833 }
 0x51b   :  { %v1849_v9 = vmul.f32 %v1844_v45, %v4102_v1  ;;  %v1847_v59 = vmul.f32 %v1834_v32, %v4102_v1 }
 0x51d   :  { %v1851_v10 = vpack.c.bf16 %v1849_v9, %v1848_v38  ;;  %v1850_v7 = vpack.c.bf16 %v1847_v59, %v1846_v6  ;;  %v4502_v59 = vld [vmem:[#allocation36_spill] sm:$0xff]  ;;  %v4503_v6 = vld [vmem:[#allocation38_spill] sm:$0xff] }
 0x51f   :  { %1858 = vmatpush.bf16.msrb.mxu2 %v1851_v10  ;;  %v4501_v10 = vld [vmem:[#allocation34_spill] sm:$0xff] }
 0x522   :  { %v1739_v40 = vpop.permute.xlu1 %1738 }
 0x523   :  { %v1743_v55 = vadd.f32 %v1739_v40, %v4170_v22  ;;  %v1745_v39 = vadd.f32 %v1739_v40, %v4178_v47  ;;  %1859 = vmatpush.bf16.msrb.mxu2 %v1850_v7  ;;  %v4495_v22 = vld [vmem:[#allocation23_spill] sm:$0xff]  ;;  %v4505_v7 = vld [vmem:[#allocation42_spill] sm:$0xff]  ;;  %v4506_v40 = vld [vmem:[#allocation44_spill] sm:$0xff] }
 0x525   :  { %v1747_v51 = vadd.f32 %v1743_v55, %v4492_v13  ;;  %v1749_v31 = vadd.f32 %v1745_v39, %v4492_v13  ;;  %v4497_v13 = vld [vmem:[#allocation26_spill] sm:$0xff] }
 0x526   :  { %2777 = vmatmul.msk.bf16.vlgmr.msrb.gmra.mxu2 %vm889_vm13, %v4493_v20 }
 0x527   :  { %1876 = vmatpush.bf16.msra.mxu2 %v1867_v53  ;;  %v2774_v46 = vmul.f32 -1.442695, %v1747_v51  ;;  %v2776_v23 = vmul.f32 -1.442695, %v1749_v31 }
 0x529   :  { %3106 = vpow2.f32 %v2774_v46 }
 0x52a   :  { %3108 = vpow2.f32 %v2776_v23 }
 0x52b   :  { %1972 = vmatpush.bf16.msrb.mxu2 %v4494_v61 }
 0x52f   :  { %1973 = vmatpush.bf16.msrb.mxu2 %v4495_v22  ;;  %v3107_v47 = vpop.eup %3106 }
 0x530   :  { %v3109_v60 = vpop.eup %3108  ;;  %v1763_v19 = vadd.f32 1.0, %v3107_v47 }
 0x531   :  { %v1765_v12 = vadd.f32 1.0, %v3109_v60 }
 0x532   :  { %3110 = vrcp.f32 %v1763_v19  ;;  %v1792_v54 = vand.u32 2147483648, %v1763_v19  ;;  %v1790_v4 = vand.u32 2147483647, %v1763_v19  ;;  %vm1786_vm2 = vweird.f32 %v1763_v19 }
 0x533   :  { %1974 = vmatpush.bf16.msrb.mxu2 %v4496_v2  ;;  %3112 = vrcp.f32 %v1765_v12  ;;  %v1822_v8 = vand.u32 2147483648, %v1765_v12  ;;  %v1820_v11 = vand.u32 2147483647, %v1765_v12  ;;  %vm1816_vm4 = vweird.f32 %v1765_v12 }
 0x534   :  { %v1793_v44 = vor.u32 1.1754944e-38, %v1792_v54  ;;  %vm1791_vm5 = vcmp.eq.f32.partialorder %v1790_v4, 8.507059e+37 }
 0x535   :  { %v1823_v45 = vor.u32 1.1754944e-38, %v1822_v8  ;;  %vm1821_vm7 = vcmp.eq.f32.partialorder %v1820_v11, 8.507059e+37  ;;  %v2872_v8 = vld [vmem:[#allocation8 + $0xa8] sm:$0xf]  ;;  %v2975_v11 = vld [vmem:[#allocation8 + $0xac] sm:$0xf] }
 0x536   :  { %2778 = vmatmul.msk.bf16.vlgmr.msra.gmra.mxu2 %vm646_vm12, %v3588_v29  ;;  %v4500_v29 = vld [vmem:[#allocation32_spill] sm:$0xff] }
 0x537   :  { %1975 = vmatpush.bf16.msrb.mxu2 %v4497_v13 }
 0x538   :  { %v3111_v21 = vpop.eup %3110 }
 0x539   :  { %v3113_v56 = vpop.eup %3112  ;;  %v1782_v43 = vmul.f32 %v3111_v21, %v1763_v19  ;;  %vm1787_vm9 = vweird.f32 %v3111_v21 }
 0x53a   :  { %v1812_v33 = vmul.f32 %v3113_v56, %v1765_v12  ;;  %vm1817_vm13 = vweird.f32 %v3113_v56  ;;  %vm1788_vm3 = vmor %vm1786_vm2, %vm1787_vm9 }
 0x53b   :  { %1976 = vmatpush.bf16.msrb.mxu2 %v4498_v0  ;;  %v1783_v41 = vsub.f32 1.0, %v1782_v43  ;;  %vm1818_vm6 = vmor %vm1816_vm4, %vm1817_vm13 }
 0x53c   :  { %v1813_v27 = vsub.f32 1.0, %v1812_v33 }
 0x53d   :  { %v1784_v63 = vmul.f32 %v3111_v21, %v1783_v41 }
 0x53e   :  { %v1814_v24 = vmul.f32 %v3113_v56, %v1813_v27 }
 0x53f   :  { %1977 = vmatpush.bf16.msrb.mxu2 %v4499_v35  ;;  %v1785_v52 = vadd.f32 %v3111_v21, %v1784_v63 }
 0x540   :  { %v1815_v49 = vadd.f32 %v3113_v56, %v1814_v24  ;;  %v2976_v24 = vld [vmem:[#allocation8 + $0xb0] sm:$0xf0] }
 0x541   :  { %v1789_v25 = vsel %vm1788_vm3, %v3111_v21, %v1785_v52 }
 0x542   :  { %v1794_v32 = vsel %vm1791_vm5, %v1793_v44, %v1789_v25  ;;  %v1819_v38 = vsel %vm1818_vm6, %v3113_v56, %v1815_v49  ;;  %v2873_v44 = vor.u32 %v2976_v24, %v2872_v8  ;;  %v2874_v49 = vld [vmem:[#allocation8 + $0xb4] sm:$0xf0]  ;;  %v2880_v25 = vld [vmem:[#allocation8 + $0xb0] sm:$0xf] }
 0x543   :  { %1978 = vmatpush.bf16.msrb.mxu2 %v4500_v29  ;;  %1895 = vperm.xlu1 %3011, %v1794_v32   ;;  %v1824_v9 = vsel %vm1821_vm7, %v1823_v45, %v1819_v38  ;;  %v2977_v45 = vld [vmem:[#allocation8 + $0xb8] sm:$0xf0]  ;;  %v2877_v32 = vor.u32 %v2975_v11, %v2874_v49 }
 0x544   :  { %1905 = vperm.xlu2 %3010, %v1824_v9   ;;  %v2881_v38 = vor.u32 %v2977_v45, %v2880_v25  ;;  %v2824_v25 = vld [vmem:[#allocation8 + $0x48] sm:$0xf]  ;;  %v2964_v45 = vld [vmem:[#allocation8 + $0x50] sm:$0xf0] }
 0x545   :  { %2355 = vmatpush.bf16.msra.mxu1 %v2877_v32  ;;  %v2963_v32 = vld [vmem:[#allocation8 + $0x4c] sm:$0xf] }
 0x546   :  { %2779 = vmatmul.msk.bf16.gmra.mxu2 %vm646_vm12, %v4481_v62 }
 0x547   :  { %1979 = vmatpush.bf16.msrb.mxu2 %v4501_v10  ;;  %v2860_v10 = vld [vmem:[#allocation8 + $0x90] sm:$0xf] }
 0x54b   :  { %2044 = vmatpush.bf16.msra.mxu2 %v4502_v59  ;;  %v2973_v59 = vld [vmem:[#allocation8 + $0x98] sm:$0xf0] }
 0x54f   :  { %2045 = vmatpush.bf16.msra.mxu2 %v4503_v6  ;;  %v2972_v6 = vld [vmem:[#allocation8 + $0x94] sm:$0xf] }
 0x553   :  { %2046 = vmatpush.bf16.msra.mxu2 %v4504_v16 }
 0x556   :  { %1980 = vmatmul.bf16.vlgmr.msrb.gmra.mxu2 %v4113_v3 }
 0x557   :  { %2047 = vmatpush.bf16.msra.mxu2 %v4505_v7 }
 0x55b   :  { %2048 = vmatpush.bf16.msra.mxu2 %v4506_v40  ;;  %v2861_v40 = vor.u32 %v2973_v59, %v2860_v10 }
 0x55f   :  { %2049 = vmatpush.bf16.msra.mxu2 %v3844_v34 }
 0x563   :  { %2050 = vmatpush.bf16.msra.mxu2 %v3857_v50 }
 0x566   :  { %1985 = vmatmul.bf16.gmra.mxu2 %v4118_v57 }
 0x567   :  { %2051 = vmatpush.bf16.msra.mxu2 %v3870_v14 }
 0x56e   :  { %v1901_v51 = vpop.permute.xlu2 %1900 }
 0x576   :  { %2052 = vmatmul.bf16.vlgmr.msra.gmra.mxu2 %v4113_v3 }
 0x585   :  { %v1891_v31 = vpop.permute.xlu0 %1890 }
 0x586   :  { %2057 = vmatmul.bf16.gmra.mxu2 %v4118_v57 }
 0x59e   :  { %v1906_v14 = vpop.permute.xlu2 %1905 }
 0x5a9   :  { %v1861_v62 = vpop.f32.mrf.mxu2 }
 0x5b1   :  { %v1863_v55 = vpop.f32.mrf.mxu2 }
 0x5b2   :  { %v2868_v55 = vld [vmem:[#allocation8 + $0x98] sm:$0xf] }
 0x5b5   :  { %v1896_v47 = vpop.permute.xlu1 %1895 }
 0x5b9   :  { %v1878_v39 = vpop.f32.mrf.mxu2 }
 0x5ba   :  { %v1908_v46 = vmul.f32 %v1891_v31, %v1878_v39  ;;  %v2974_v31 = vld [vmem:[#allocation8 + $0xa0] sm:$0xf0] }
 0x5c1   :  { %v1880_v53 = vpop.f32.mrf.mxu2 }
 0x5c2   :  { %v1909_v3 = vmul.f32 %v1896_v47, %v1880_v53 }
 0x5c9   :  { %v1883_v20 = vpop.f32.mrf.mxu2 }
 0x5ca   :  { %v1910_v23 = vmul.f32 %v1901_v51, %v1883_v20  ;;  %v2869_v20 = vor.u32 %v2974_v31, %v2868_v55  ;;  %v2812_v31 = vld [vmem:[#allocation8 + $0x30] sm:$0xf] }
 0x5cc   :  { %v1912_v34 = vadd.f32 %v1910_v23, %v1908_v46  ;;  %v2848_v46 = vld [vmem:[#allocation8 + $0x78] sm:$0xf]  ;;  %v2970_v23 = vld [vmem:[#allocation8 + $0x80] sm:$0xf0] }
 0x5cd   :  { %v2849_v47 = vor.u32 %v2970_v23, %v2848_v46 }
 0x5ce   :  { %v1914_v61 = vpack.c.bf16 %v1912_v34, %v1861_v62  ;;  %v2862_v62 = vld [vmem:[#allocation8 + $0x9c] sm:$0xf0]  ;;  %v2969_v34 = vld [vmem:[#allocation8 + $0x7c] sm:$0xf] }
 0x5cf   :  { %v2865_v51 = vor.u32 %v2972_v6, %v2862_v62  ;;  %v2825_v6 = vor.u32 %v2964_v45, %v2824_v25  ;;  %v2954_v25 = vld [vmem:[#allocation8 + $0x4] sm:$0xf]  ;;  %v2790_v45 = vld [vmem:[#allocation8 + $0xc] sm:$0xf0] }
 0x5d0   :  { %1926 = vmatmul.bf16.vlgmr.msrb.gmra.mxu0 %v1914_v61  ;;  %1962 = vmatmul.bf16.vlgmr.msra.gmra.mxu3 %v1914_v61 }
 0x5d1   :  { %v1885_v50 = vpop.f32.mrf.mxu2  ;;  %2337 = vmatpush.bf16.msrb.mxu0 %v2873_v44  ;;  %2373 = vmatpush.bf16.msra.mxu3 %v2881_v38 }
 0x5d2   :  { %v1911_v22 = vmul.f32 %v1906_v14, %v1885_v50  ;;  %2356 = vmatpush.bf16.msra.mxu1 %v2865_v51  ;;  %v2850_v50 = vld [vmem:[#allocation8 + $0x84] sm:$0xf0] }
 0x5d4   :  { %v1913_v57 = vadd.f32 %v1911_v22, %v1909_v3  ;;  %v2853_v3 = vor.u32 %v2969_v34, %v2850_v50  ;;  %v2960_v34 = vld [vmem:[#allocation8 + $0x34] sm:$0xf] }
 0x5d5   :  { %2338 = vmatpush.bf16.msrb.mxu0 %v2861_v40  ;;  %2374 = vmatpush.bf16.msra.mxu3 %v2869_v20 }
 0x5d6   :  { %v1916_v60 = vpack.c.bf16 %v1913_v57, %v1913_v57  ;;  %v2971_v57 = vld [vmem:[#allocation8 + $0x88] sm:$0xf0]  ;;  %2357 = vmatpush.bf16.msra.mxu1 %v2853_v3  ;;  %v2820_v3 = vld [vmem:[#allocation8 + $0x38] sm:$0xf] }
 0x5d9   :  { %v1981_v2 = vpop.f32.mrf.mxu2  ;;  %2339 = vmatpush.bf16.msrb.mxu0 %v2849_v47 }
 0x5e0   :  { %1931 = vmatmul.bf16.gmra.mxu0 %v1916_v60  ;;  %1967 = vmatmul.bf16.gmra.mxu3 %v1916_v60 }
 0x5e1   :  { %v1983_v19 = vpop.f32.mrf.mxu2 }
 0x5e9   :  { %v4234_v12 = vpop.f32.mrf.mxu2 }
 0x5f0   :  { %1998 = vmatmul.bf16.vlgmr.msra.gmra.mxu0 %v1914_v61  ;;  %2034 = vmatmul.bf16.vlgmr.msrb.gmra.mxu3 %v1914_v61 }
 0x5f1   :  { %v1988_v13 = vpop.f32.mrf.mxu2 }
 0x5f9   :  { %v4236_v0 = vpop.f32.mrf.mxu2 }
 0x600   :  { %2003 = vmatmul.bf16.gmra.mxu0 %v1916_v60  ;;  %2039 = vmatmul.bf16.gmra.mxu3 %v1916_v60 }
 0x601   :  { %v4238_v21 = vpop.f32.mrf.mxu2 }
 0x609   :  { %v4240_v56 = vpop.f32.mrf.mxu2 }
 0x611   :  { %v2060_v43 = vpop.f32.mrf.mxu2 }
 0x64d   :  { %v1927_v33 = vpop.f32.mrf.mxu0 }
 0x64e   :  { %v1928_v41 = vadd.f32 %v1927_v33, %v3935_v30 }
 0x650   :  { %v1946_v35 = vadd.f32 %v4143_v5, %v1928_v41 }
 0x652   :  { %v2780_v54 = vmul.f32 -1.442695, %v1946_v35  ;;  %v2836_v35 = vld [vmem:[#allocation8 + $0x60] sm:$0xf] }
 0x653   :  { %v1963_v27 = vpop.f32.mrf.mxu3 }
 0x654   :  { %3114 = vpow2.f32 %v2780_v54  ;;  %v1964_v63 = vadd.f32 %v1963_v27, %v3939_v18  ;;  %v2967_v54 = vld [vmem:[#allocation8 + $0x68] sm:$0xf0] }
 0x655   :  { %v1929_v4 = vpop.f32.mrf.mxu0 }
 0x656   :  { %v1982_v52 = vadd.f32 %v1981_v2, %v1964_v63  ;;  %v1930_v29 = vadd.f32 %v1929_v4, %v3935_v30  ;;  %v2856_v2 = vld [vmem:[#allocation8 + $0x80] sm:$0xf]  ;;  %v2966_v63 = vld [vmem:[#allocation8 + $0x64] sm:$0xf]  ;;  %v2838_v4 = vld [vmem:[#allocation8 + $0x6c] sm:$0xf0] }
 0x657   :  { %v2857_v60 = vor.u32 %v2971_v57, %v2856_v2  ;;  %v2841_v11 = vor.u32 %v2966_v63, %v2838_v4  ;;  %v2962_v57 = vld [vmem:[#allocation8 + $0x40] sm:$0xf0] }
 0x658   :  { %v2783_v9 = vmul.f32 -1.442695, %v1982_v52  ;;  %v1948_v5 = vadd.f32 %v4148_v48, %v1930_v29  ;;  %v2844_v52 = vld [vmem:[#allocation8 + $0x68] sm:$0xf]  ;;  %v2968_v29 = vld [vmem:[#allocation8 + $0x70] sm:$0xf0]  ;;  %v2821_v4 = vor.u32 %v2962_v57, %v2820_v3 }
 0x659   :  { %2375 = vmatpush.bf16.msra.mxu3 %v2857_v60  ;;  %2358 = vmatpush.bf16.msra.mxu1 %v2841_v11  ;;  %v2845_v59 = vor.u32 %v2968_v29, %v2844_v52  ;;  %v2800_v60 = vld [vmem:[#allocation8 + $0x18] sm:$0xf]  ;;  %v2788_v52 = vld [vmem:[#allocation8] sm:$0xf]  ;;  %v2955_v29 = vld [vmem:[#allocation8 + $0x8] sm:$0xf0] }
 0x65a   :  { %v3115_v16 = vpop.eup %3114  ;;  %3116 = vpow2.f32 %v2783_v9  ;;  %v2781_v7 = vmul.f32 -1.442695, %v1948_v5  ;;  %v2826_v9 = vld [vmem:[#allocation8 + $0x54] sm:$0xf0] }
 0x65b   :  { %v4247_v39 = vadd.f32 1.0, %v3115_v16  ;;  %v1965_v53 = vpop.f32.mrf.mxu3  ;;  %v2832_v16 = vld [vmem:[#allocation8 + $0x50] sm:$0xf] }
 0x65c   :  { %3118 = vpow2.f32 %v2781_v7  ;;  %v1966_v48 = vadd.f32 %v1965_v53, %v3939_v18  ;;  %v2965_v7 = vld [vmem:[#allocation8 + $0x58] sm:$0xf0] }
 0x65d   :  { %3120 = vrcp.f32 %v4247_v39  ;;  %v1932_v61 = vpop.f32.mrf.mxu0  ;;  %2376 = vmatpush.bf16.msra.mxu3 %v2845_v59  ;;  %v2833_v55 = vor.u32 %v2965_v7, %v2832_v16  ;;  %vm2079_vm8 = vweird.f32 %v4247_v39  ;;  %v2789_v59 = vor.u32 %v2955_v29, %v2788_v52  ;;  %v2796_v7 = vld [vmem:[#allocation8 + $0x8] sm:$0xf] }
 0x65e   :  { %v1984_v14 = vadd.f32 %v1983_v19, %v1966_v48  ;;  %v1933_v22 = vadd.f32 %v1932_v61, %v3935_v30  ;;  %v2837_v30 = vor.u32 %v2967_v54, %v2836_v35  ;;  %v2961_v48 = vld [vmem:[#allocation8 + $0x38] sm:$0xf0]  ;;  %v2814_v61 = vld [vmem:[#allocation8 + $0x3c] sm:$0xf0]  ;;  %v2802_v35 = vld [vmem:[#allocation8 + $0x24] sm:$0xf0]  ;;  %v2793_v16 = vor.u32 %v2954_v25, %v2790_v45 }
 0x65f   :  { %v2813_v23 = vor.u32 %v2961_v48, %v2812_v31  ;;  %v2817_v47 = vor.u32 %v2960_v34, %v2814_v61 }
 0x660   :  { %v3117_v13 = vpop.eup %3116  ;;  %v2784_v43 = vmul.f32 -1.442695, %v1984_v14  ;;  %v1951_v33 = vadd.f32 %v4152_v36, %v1933_v22  ;;  %2340 = vmatpush.bf16.msrb.mxu0 %v2837_v30  ;;  %v2959_v30 = vld [vmem:[#allocation8 + $0x28] sm:$0xf0] }
 0x661   :  { %v4253_v41 = vadd.f32 1.0, %v3117_v13  ;;  %2377 = vmatpush.bf16.msra.mxu3 %v2833_v55  ;;  %v2958_v13 = vld [vmem:[#allocation8 + $0x20] sm:$0xf0] }
 0x662   :  { %v3119_v27 = vpop.eup %3118  ;;  %3122 = vpow2.f32 %v2784_v43  ;;  %v2782_v19 = vmul.f32 -1.442695, %v1951_v33  ;;  %v2957_v33 = vld [vmem:[#allocation8 + $0x1c] sm:$0xf] }
 0x663   :  { %v4255_v8 = vpop.eup %3120  ;;  %3124 = vrcp.f32 %v4253_v41  ;;  %v4258_v24 = vadd.f32 1.0, %v3119_v27  ;;  %v1968_v36 = vpop.f32.mrf.mxu3  ;;  %v2805_v11 = vor.u32 %v2957_v33, %v2802_v35  ;;  %vm2136_vm1 = vweird.f32 %v4253_v41 }
 0x664   :  { %3126 = vpow2.f32 %v2782_v19  ;;  %v1969_v44 = vadd.f32 %v1968_v36, %v3939_v18  ;;  %v2075_v49 = vmul.f32 %v4255_v8, %v4247_v39  ;;  %v2829_v18 = vor.u32 %v2963_v32, %v2826_v9  ;;  %2341 = vmatpush.bf16.msrb.mxu0 %v2825_v6  ;;  %v2808_v19 = vld [vmem:[#allocation8 + $0x20] sm:$0xf] }
 0x665   :  { %3128 = vrcp.f32 %v4258_v24  ;;  %v1934_v38 = vpop.f32.mrf.mxu0  ;;  %vm2080_vm12 = vweird.f32 %v4255_v8  ;;  %v2801_v36 = vor.u32 %v2958_v13, %v2800_v60  ;;  %2378 = vmatpush.bf16.msra.mxu3 %v2821_v4  ;;  %vm2094_vm0 = vweird.f32 %v4258_v24 }
 0x666   :  { %v1987_v5 = vadd.f32 %v4234_v12, %v1969_v44  ;;  %v2076_v10 = vsub.f32 1.0, %v2075_v49  ;;  %2359 = vmatpush.bf16.msra.mxu1 %v2829_v18  ;;  %v2085_v49 = vand.u32 2147483648, %v4247_v39  ;;  %vm4290_vm10 = vmor %vm2079_vm8, %vm2080_vm12  ;;  %v2956_v18 = vld [vmem:[#allocation8 + $0x10] sm:$0xf0]  ;;  %v2100_v33 = vand.u32 2147483648, %v4258_v24 }
 0x667   :  { %v2140_v35 = vand.u32 2147483647, %v4253_v41 }
 0x668   :  { %v3123_v40 = vpop.eup %3122  ;;  %v2785_v62 = vmul.f32 -1.442695, %v1987_v5  ;;  %v2077_v46 = vmul.f32 %v4255_v8, %v2076_v10  ;;  %2342 = vmatpush.bf16.msrb.mxu0 %v2813_v23  ;;  %v2083_v5 = vand.u32 2147483647, %v4247_v39  ;;  %v2809_v10 = vor.u32 %v2959_v30, %v2808_v19 }
 0x669   :  { %v4265_v53 = vpop.eup %3124  ;;  %v4267_v51 = vadd.f32 1.0, %v3123_v40  ;;  %v2797_v23 = vor.u32 %v2956_v18, %v2796_v7  ;;  %v2101_v29 = vor.u32 1.1754944e-38, %v2100_v33  ;;  %vm2141_vm2 = vcmp.eq.f32.partialorder %v2140_v35, 8.507059e+37 }
 0x66a   :  { %v3127_v20 = vpop.eup %3126  ;;  %v2132_v12 = vmul.f32 %v4265_v53, %v4253_v41  ;;  %3130 = vpow2.f32 %v2785_v62  ;;  %2360 = vmatpush.bf16.msra.mxu1 %v2817_v47  ;;  %v2078_v27 = vadd.f32 %v4255_v8, %v2077_v46  ;;  %vm2084_vm11 = vcmp.eq.f32.partialorder %v2083_v5, 8.507059e+37  ;;  %2379 = vmatpush.bf16.msra.mxu3 %v2809_v10 }
 0x66b   :  { %v4272_v50 = vpop.eup %3128  ;;  %3132 = vrcp.f32 %v4267_v51  ;;  %v4275_v14 = vadd.f32 1.0, %v3127_v20  ;;  %v1970_v22 = vpop.f32.mrf.mxu3  ;;  %v2086_v20 = vor.u32 1.1754944e-38, %v2085_v49  ;;  %vm2137_vm15 = vweird.f32 %v4265_v53 }
 0x66c   :  { %v2090_v2 = vmul.f32 %v4272_v50, %v4258_v24  ;;  %v2133_v54 = vsub.f32 1.0, %v2132_v12  ;;  %2343 = vmatpush.bf16.msrb.mxu0 %v2801_v36  ;;  %v2082_v6 = vsel %vm4290_vm10, %v4255_v8, %v2078_v27  ;;  %vm2095_vm14 = vweird.f32 %v4272_v50  ;;  %vm4327_vm13 = vmor %vm2136_vm1, %vm2137_vm15 }
 0x66d   :  { %3134 = vrcp.f32 %v4275_v14  ;;  %v1999_v43 = vpop.f32.mrf.mxu0  ;;  %v2087_v61 = vsel %vm2084_vm11, %v2086_v20, %v2082_v6  ;;  %v2142_v22 = vand.u32 2147483648, %v4253_v41  ;;  %vm4320_vm9 = vmor %vm2094_vm0, %vm2095_vm14  ;;  %vm2151_vm6 = vweird.f32 %v4267_v51 }
 0x66e   :  { %v2091_v63 = vsub.f32 1.0, %v2090_v2  ;;  %2361 = vmatpush.bf16.msra.mxu1 %v2805_v11  ;;  %v2134_v62 = vmul.f32 %v4265_v53, %v2133_v54  ;;  %v2000_v48 = vadd.f32 %v1999_v43, %v3983_v28  ;;  %2380 = vmatpush.bf16.msra.mxu3 %v2797_v23  ;;  %v2155_v6 = vand.u32 2147483647, %v4267_v51 }
 0x66f   :  { %v2143_v19 = vor.u32 1.1754944e-38, %v2142_v22  ;;  %vm2109_vm7 = vweird.f32 %v4275_v14 }
 0x670   :  { %v3131_v44 = vpop.eup %3130  ;;  %v2092_v31 = vmul.f32 %v4272_v50, %v2091_v63  ;;  %2344 = vmatpush.bf16.msrb.mxu0 %v2789_v59  ;;  %v2135_v2 = vadd.f32 %v4265_v53, %v2134_v62  ;;  %v2018_v57 = vadd.f32 %v4158_v58, %v2000_v48  ;;  %v2098_v58 = vand.u32 2147483647, %v4258_v24 }
 0x671   :  { %v4284_v32 = vpop.eup %3132  ;;  %v4286_v38 = vadd.f32 1.0, %v3131_v44  ;;  %v2113_v62 = vand.u32 2147483647, %v4275_v14  ;;  %vm2156_vm10 = vcmp.eq.f32.partialorder %v2155_v6, 8.507059e+37 }
 0x672   :  { %v2147_v55 = vmul.f32 %v4284_v32, %v4267_v51  ;;  %2362 = vmatpush.bf16.msra.mxu1 %v2793_v16  ;;  %v2093_v3 = vadd.f32 %v4272_v50, %v2092_v31  ;;  %v2139_v41 = vsel %vm4327_vm13, %v4265_v53, %v2135_v2  ;;  %vm2099_vm3 = vcmp.eq.f32.partialorder %v2098_v58, 8.507059e+37 }
 0x673   :  { %v4298_v40 = vpop.eup %3134  ;;  %3136 = vrcp.f32 %v4286_v38  ;;  %v2035_v39 = vpop.f32.mrf.mxu3  ;;  %v2144_v25 = vsel %vm2141_vm2, %v2143_v19, %v2139_v41  ;;  %vm2152_vm4 = vweird.f32 %v4284_v32  ;;  %vm2114_vm11 = vcmp.eq.f32.partialorder %v2113_v62, 8.507059e+37 }
 0x674   :  { %v2036_v8 = vadd.f32 %v2035_v39, %v3986_v42  ;;  %v2105_v12 = vmul.f32 %v4298_v40, %v4275_v14  ;;  %v2148_v47 = vsub.f32 1.0, %v2147_v55  ;;  %v2097_v36 = vsel %vm4320_vm9, %v4272_v50, %v2093_v3  ;;  %vm4355_vm12 = vmor %vm2151_vm6, %vm2152_vm4 }
 0x675   :  { %v2001_v46 = vpop.f32.mrf.mxu0  ;;  %v2157_v50 = vand.u32 2147483648, %v4267_v51  ;;  %v2102_v9 = vsel %vm2099_vm3, %v2101_v29, %v2097_v36  ;;  %vm2110_vm5 = vweird.f32 %v4298_v40  ;;  %v2185_v16 = vsub.f32 1.0, %v2144_v25 }
 0x676   :  { %v2054_v34 = vadd.f32 %v4236_v0, %v2036_v8  ;;  %v2106_v13 = vsub.f32 1.0, %v2105_v12  ;;  %v2149_v30 = vmul.f32 %v4284_v32, %v2148_v47  ;;  %v2002_v24 = vadd.f32 %v2001_v46, %v3983_v28  ;;  %vm4359_vm8 = vmor %vm2109_vm7, %vm2110_vm5 }
 0x677   :  { %v2158_v55 = vor.u32 1.1754944e-38, %v2157_v50  ;;  %v2191_v8 = vmul.f32 %v2144_v25, %v4090_v15  ;;  %v2172_v3 = vand.u32 2147483648, %v4286_v38  ;;  %vm2166_vm15 = vweird.f32 %v4286_v38 }
 0x678   :  { %v2176_v60 = vmul.f32 %v2087_v61, %v2054_v34  ;;  %v2107_v52 = vmul.f32 %v4298_v40, %v2106_v13  ;;  %v2150_v53 = vadd.f32 %v4284_v32, %v2149_v30  ;;  %v2020_v5 = vadd.f32 %v4160_v17, %v2002_v24 }
 0x679   :  { %v4317_v0 = vpop.eup %3136  ;;  %v2170_v2 = vand.u32 2147483647, %v4286_v38  ;;  %v2173_v35 = vor.u32 1.1754944e-38, %v2172_v3 }
 0x67a   :  { %v2179_v54 = vadd.f32 %v2176_v60, %v2018_v57  ;;  %v2162_v63 = vmul.f32 %v4317_v0, %v4286_v38  ;;  %v2108_v59 = vadd.f32 %v4298_v40, %v2107_v52  ;;  %v2154_v51 = vsel %vm4355_vm12, %v4284_v32, %v2150_v53 }
 0x67b   :  { %v2037_v4 = vpop.f32.mrf.mxu3  ;;  %v2159_v22 = vsel %vm2156_vm10, %v2158_v55, %v2154_v51  ;;  %vm2167_vm14 = vweird.f32 %v4317_v0  ;;  %vm2171_vm1 = vcmp.eq.f32.partialorder %v2170_v2, 8.507059e+37 }
 0x67c   :  { %3138 = vtanh.f32 %v2179_v54  ;;  %v2038_v11 = vadd.f32 %v2037_v4, %v3986_v42  ;;  %v2163_v45 = vsub.f32 1.0, %v2162_v63  ;;  %v2112_v46 = vsel %vm4359_vm8, %v4298_v40, %v2108_v59  ;;  %vm2168_vm0 = vmor %vm2166_vm15, %vm2167_vm14 }
 0x67d   :  { %v2004_v44 = vpop.f32.mrf.mxu0  ;;  %v2186_v40 = vsub.f32 1.0, %v2159_v22  ;;  %v2192_v43 = vmul.f32 %v2159_v22, %v4094_v26 }
 0x67e   :  { %v2056_v49 = vadd.f32 %v4238_v21, %v2038_v11  ;;  %v2115_v21 = vand.u32 2147483648, %v4275_v14  ;;  %v2164_v20 = vmul.f32 %v4317_v0, %v2163_v45  ;;  %v2005_v14 = vadd.f32 %v2004_v44, %v3983_v28 }
 0x680   :  { %v2177_v10 = vmul.f32 %v2102_v9, %v2056_v49  ;;  %v2116_v23 = vor.u32 1.1754944e-38, %v2115_v21  ;;  %v2165_v47 = vadd.f32 %v4317_v0, %v2164_v20  ;;  %v2023_v28 = vadd.f32 %v4162_v37, %v2005_v14 }
 0x682   :  { %v3139_v7 = vpop.eup %3138  ;;  %v2180_v18 = vadd.f32 %v2177_v10, %v2020_v5  ;;  %v2117_v15 = vsel %vm2114_vm11, %v2116_v23, %v2112_v46  ;;  %v2169_v33 = vsel %vm2168_vm0, %v4317_v0, %v2165_v47 }
 0x683   :  { %v2040_v39 = vpop.f32.mrf.mxu3  ;;  %v2188_v48 = vmul.f32 %v3139_v7, %v2185_v16  ;;  %v2174_v54 = vsel %vm2171_vm1, %v2173_v35, %v2169_v33 }
 0x684   :  { %3140 = vtanh.f32 %v2180_v18  ;;  %v2041_v12 = vadd.f32 %v2040_v39, %v3986_v42  ;;  %v2187_v27 = vsub.f32 1.0, %v2174_v54  ;;  %v2193_v30 = vmul.f32 %v2174_v54, %v4102_v1  ;;  %v2459_v1 = vld [vmem:[%s4405_s7 + $0x1] ss:$4 sm:$0x7]  ;;  %s3351_s7 = smov [#allocation13]  }
 0x685   :  { %v2006_v34 = vpop.f32.mrf.mxu0  ;;  %v2194_v61 = vadd.f32 %v2191_v8, %v2188_v48  ;;  %v2203_v0 = vperm.slane %v2459_v1, 0  ;;  %v2204_v4 = vperm.slane %v2459_v1, 1  ;;  %v2205_v52 = vperm.slane %v2459_v1, 2  ;;  %s2428_s8 = sshll.u32 %s3351_s7, 4  ;;  %s2429_s8 = int_to_ptr.vmem [resolvable:$true] %s2428_s8 }
 0x686   :  { %v2059_v32 = vadd.f32 %v4240_v56, %v2041_v12 }
 0x687   :  { %2197 = vst [vmem:[#allocation10] sm:$0xff] %v2194_v61 }
 0x688   :  { %v2178_v42 = vmul.f32 %v2117_v15, %v2059_v32  ;;  %2410 = dma.vmem_to_hbm [thread:$0]  %s2406_s26, 128, %s2408_s27, [#allocation4]  }
 0x68a   :  { %v3141_v57 = vpop.eup %3140  ;;  %v2181_v56 = vadd.f32 %v2178_v42, %v2023_v28 }
 0x68b   :  { %v2042_v60 = vpop.f32.mrf.mxu3  ;;  %v2189_v13 = vmul.f32 %v3141_v57, %v2186_v40 }
 0x68c   :  { %3142 = vtanh.f32 %v2181_v56 }
 0x68d   :  { %v2195_v37 = vadd.f32 %v2192_v43, %v2189_v13 }
 0x68f   :  { %v2200_v58 = vpack.c.bf16 %v2195_v37, %v2194_v61  ;;  %2198 = vst [vmem:[#allocation11] sm:$0xff] %v2195_v37 }
 0x691   :  { %2345 = vmatmul.bf16.vlgmr.msrb.gmra.mxu0 %v2200_v58  ;;  %2363 = vmatmul.bf16.vlgmr.msra.gmra.mxu1 %v2200_v58 }
 0x692   :  { %v3143_v38 = vpop.eup %3142  ;;  %2381 = vmatmul.bf16.vlgmr.msra.gmra.mxu3 %v2200_v58 }
 0x693   :  { %v2190_v19 = vmul.f32 %v3143_v38, %v2187_v27 }
 0x695   :  { %v2196_v63 = vadd.f32 %v2193_v30, %v2190_v19 }
 0x697   :  { %2199 = vst [vmem:[#allocation11 + $0x8] sm:$0xff] %v2196_v63  ;;  %v2201_v26 = vpack.c.bf16 %v2196_v63, %v2196_v63 }
 0x698   :  { %2423 = dma.vmem_to_hbm [thread:$0]  %s2416_s24, 256, %s2418_s20, [#allocation12], %s3332_s21, %s3332_s21, %s3333_s22  }
 0x699   :  { %s2430_s22 = sshll.u32 %s4408_s10, 4  ;;  %s2431_s22 = int_to_ptr.hbm [resolvable:$true] %s2430_s22 }
 0x6a1   :  { %2350 = vmatmul.bf16.gmra.mxu0 %v2201_v26  ;;  %2368 = vmatmul.bf16.gmra.mxu1 %v2201_v26 }
 0x6a2   :  { %2386 = vmatmul.bf16.gmra.mxu3 %v2201_v26 }
 0x70e   :  { %v2346_v36 = vpop.f32.mrf.mxu0  ;;  %v2364_v41 = vpop.f32.mrf.mxu1 }
 0x70f   :  { %v2347_v24 = vadd.f32 %v2346_v36, %v2203_v0  ;;  %v2365_v11 = vadd.f32 %v2364_v41, %v2204_v4 }
 0x711   :  { %2391 = vst [vmem:[#allocation13] sm:$0xff] %v2347_v24 }
 0x712   :  { %2392 = vst [vmem:[#allocation13 + $0x8] sm:$0xff] %v2365_v11 }
 0x715   :  { %v2382_v29 = vpop.f32.mrf.mxu3 }
 0x716   :  { %v2383_v44 = vadd.f32 %v2382_v29, %v2205_v52  ;;  %v2348_v49 = vpop.f32.mrf.mxu0  ;;  %v2366_v25 = vpop.f32.mrf.mxu1 }
 0x717   :  { %v2349_v50 = vadd.f32 %v2348_v49, %v2203_v0  ;;  %v2367_v45 = vadd.f32 %v2366_v25, %v2204_v4 }
 0x718   :  { %2393 = vst [vmem:[#allocation13 + $0x10] sm:$0xff] %v2383_v44 }
 0x719   :  { %2394 = vst [vmem:[#allocation13 + $0x18] sm:$0xff] %v2349_v50 }
 0x71a   :  { %2395 = vst [vmem:[#allocation13 + $0x20] sm:$0xff] %v2367_v45 }
 0x71d   :  { %v2384_v9 = vpop.f32.mrf.mxu3 }
 0x71e   :  { %v2385_v53 = vadd.f32 %v2384_v9, %v2205_v52  ;;  %v2351_v5 = vpop.f32.mrf.mxu0  ;;  %v2369_v10 = vpop.f32.mrf.mxu1 }
 0x71f   :  { %v2352_v59 = vadd.f32 %v2351_v5, %v2203_v0  ;;  %v2370_v21 = vadd.f32 %v2369_v10, %v2204_v4 }
 0x720   :  { %2396 = vst [vmem:[#allocation13 + $0x28] sm:$0xff] %v2385_v53 }
 0x721   :  { %2397 = vst [vmem:[#allocation13 + $0x30] sm:$0xff] %v2352_v59 }
 0x722   :  { %2398 = vst [vmem:[#allocation13 + $0x38] sm:$0xff] %v2370_v21 }
 0x725   :  { %v2387_v6 = vpop.f32.mrf.mxu3 }
 0x726   :  { %v2388_v16 = vadd.f32 %v2387_v6, %v2205_v52  ;;  %v2353_v7 = vpop.f32.mrf.mxu0  ;;  %v2371_v18 = vpop.f32.mrf.mxu1 }
 0x728   :  { %2399 = vst [vmem:[#allocation13 + $0x40] sm:$0xff] %v2388_v16 }
 0x729   :  { %2436 = dma.vmem_to_hbm [thread:$0]  %s2429_s8, 1152, %s2431_s22, [#allocation12], %s3352_s30, %s3352_s30, %s3353_s11  }
 0x72d   :  { %v2389_v62 = vpop.f32.mrf.mxu3 }
 0x72e   :  { %3327 = dma.done.wait [#allocation4], 128  }
 0x72f   :  { %3328 = vsyncadd [#allocation4], 4294967168 }
 0x730   :  { %3329 = dma.done.wait [#allocation12], 1408  }
 0x731   :  { %3330 = vsyncadd [#allocation12], 4294965888 }
 0x732   :  { %2449 = vsyncpa [#allocation3], 1 }
 0x733   :  { %2450 = vsyncpa [#allocation6], 1 }
 0x734   :  { %2451 = vsyncpa [#allocation9], 1 }
 0x735   :  { %2452 = vsyncpa [#allocation4], 1 }
 0x736   :  { %2453 = vsyncpa [#allocation12], 1 }

</bundles_post_ra>
